<compile_context>
chip_gen: v5e
topology: v5e:2x2
jax: 0.10.0
libtpu: 0.0.40
codegen_flags: <defaults>
</compile_context>

<pallas_src>
import functools

import jax
import jax.numpy as jnp
from jax.experimental import pallas as pl
from jax.experimental.pallas import tpu as pltpu

LN_EPS = 1e-12   # HF BertConfig default
LANE = 128       # TPU lane width; all channel dims padded to this


# ------------------------------ fused kernel -------------------------------

def _bert_fused_kernel(
    x_ref,        # (S, Hp)    summed embeddings for this batch element
    m_ref,        # (1, 1, S)  additive attention mask for this batch element
    embg_ref, embb_ref,                      # (1, Hp)   embedding LayerNorm
    wqkv_ref, bqkv_ref,                      # (L, Hp, 3*nH*LANE), (L, 1, 3*nH*LANE)
    wo_ref, bo_ref,                          # (L, nH*LANE, Hp),   (L, 1, Hp)
    ln1g_ref, ln1b_ref,                      # (L, 1, Hp)
    w1_ref, fb1_ref,                         # (L, Hp, Ip), (L, 1, Ip)
    w2_ref, fb2_ref,                         # (L, Ip, Hp), (L, 1, Hp)
    ln2g_ref, ln2b_ref,                      # (L, 1, Hp)
    poolw_ref, poolb_ref,                    # (Hp, Hp), (1, Hp)
    outw_ref, outb_ref,                      # (Hp, Cp), (1, Cp)
    o_ref,                                   # (S, Cp)  logits broadcast over rows
    *, n_layers, n_heads, h_real, scale,
):
    S, Hp = x_ref.shape
    inv_h = 1.0 / h_real

    def pad_ln(v, g, b):
        # LayerNorm over the h_real "real" columns: padded columns are zero in
        # v, g, b so they drop out of the sums and stay zero afterwards.
        s1 = jnp.sum(v, axis=-1, keepdims=True)
        s2 = jnp.sum(v * v, axis=-1, keepdims=True)
        mu = s1 * inv_h
        var = s2 * inv_h - mu * mu
        return (v - mu) * jax.lax.rsqrt(var + LN_EPS) * g + b

    def bf(v):
        return v.astype(jnp.bfloat16)

    def mm(a, b_):  # bf16 MXU matmul, f32 accumulation
        return jnp.dot(bf(a), bf(b_), preferred_element_type=jnp.float32)

    amask = m_ref[0]                                           # (1, S)

    # --- embedding LayerNorm ---
    x = pad_ln(x_ref[...], embg_ref[...], embb_ref[...])       # (S, Hp) f32

    # --- transformer layers (unrolled; all weights resident in VMEM) ---
    for l in range(n_layers):
        qkv = mm(x, wqkv_ref[l]) + bqkv_ref[l]                 # (S, 3*nH*LANE)
        wo = wo_ref[l]                                         # (nH*LANE, Hp)

        attn = jnp.zeros((S, Hp), jnp.float32)
        for h in range(n_heads):
            q_h = qkv[:, (3 * h + 0) * LANE:(3 * h + 1) * LANE]    # (S, LANE)
            k_h = qkv[:, (3 * h + 1) * LANE:(3 * h + 2) * LANE]
            v_h = qkv[:, (3 * h + 2) * LANE:(3 * h + 3) * LANE]
            # padded lanes of q/k are zero, so they add nothing to the scores
            s = jax.lax.dot_general(
                bf(q_h), bf(k_h), (((1,), (1,)), ((), ())),
                preferred_element_type=jnp.float32) * scale        # (S, S)
            s = s + amask
            s = s - jnp.max(s, axis=-1, keepdims=True)
            p = jnp.exp(s)
            p = p * pl.reciprocal(jnp.sum(p, axis=-1, keepdims=True), approx=True)
            ctx = mm(p, v_h)                                       # (S, LANE)
            # head merge fused into the output projection (per-head accumulate)
            attn = attn + mm(ctx, wo[h * LANE:(h + 1) * LANE, :])  # (S, Hp)
        attn = attn + bo_ref[l]
        x = pad_ln(attn + x, ln1g_ref[l], ln1b_ref[l])

        hmid = mm(x, w1_ref[l]) + fb1_ref[l]                       # (S, Ip)
        # TODO(synk): HF BERT uses exact erf-based GELU; erf does not lower in
        # Mosaic, so the tanh approximation is used (max abs err ~1e-3).
        hmid = 0.5 * hmid * (1.0 + jnp.tanh(
            0.7978845608028654 * (hmid + 0.044715 * hmid * hmid * hmid)))
        ffn = mm(hmid, w2_ref[l]) + fb2_ref[l]                     # (S, Hp)
        x = pad_ln(ffn + x, ln2g_ref[l], ln2b_ref[l])

    # --- pooler: tanh(W * h_[CLS] + b); nn.Dropout(0.3) is identity at eval;
    #     then the Linear(768, 2) classification head, fused here too ---
    cls = x[0:1, :]                                                # (1, Hp)
    pooled = jnp.tanh(mm(cls, poolw_ref[...]) + poolb_ref[...])    # (1, Hp)
    logits = mm(pooled, outw_ref[...]) + outb_ref[...]             # (1, Cp)
    o_ref[...] = jnp.broadcast_to(logits, (S, logits.shape[-1]))


# ----------------------------- parameter init ------------------------------

def init_params(key, *, vocab, hidden, n_layers, n_heads, inter,
                max_pos, type_vocab, n_classes):
    keys = iter(jax.random.split(key, 16 + 16 * n_layers))

    def normal(shape):
        return 0.02 * jax.random.normal(next(keys), shape, jnp.float32)

    params = dict(
        word_emb=normal((vocab, hidden)),
        pos_emb=normal((max_pos, hidden)),
        type_emb=normal((type_vocab, hidden)),
        emb_ln_g=jnp.ones((hidden,), jnp.float32),
        emb_ln_b=jnp.zeros((hidden,), jnp.float32),
        pool_w=normal((hidden, hidden)),
        pool_b=jnp.zeros((hidden,), jnp.float32),
        out_w=normal((hidden, n_classes)),      # nn.Linear(768, 2) analogue
        out_b=jnp.zeros((n_classes,), jnp.float32),
        layers=[],
    )
    for _ in range(n_layers):
        params["layers"].append(dict(
            q_w=normal((hidden, hidden)), q_b=jnp.zeros((hidden,), jnp.float32),
            k_w=normal((hidden, hidden)), k_b=jnp.zeros((hidden,), jnp.float32),
            v_w=normal((hidden, hidden)), v_b=jnp.zeros((hidden,), jnp.float32),
            o_w=normal((hidden, hidden)), o_b=jnp.zeros((hidden,), jnp.float32),
            ln1_g=jnp.ones((hidden,), jnp.float32),
            ln1_b=jnp.zeros((hidden,), jnp.float32),
            f1_w=normal((hidden, inter)), f1_b=jnp.zeros((inter,), jnp.float32),
            f2_w=normal((inter, hidden)), f2_b=jnp.zeros((hidden,), jnp.float32),
            ln2_g=jnp.ones((hidden,), jnp.float32),
            ln2_b=jnp.zeros((hidden,), jnp.float32),
        ))
    return params


def pack_params(params, *, n_heads, head_dim):
    """Zero-pad all weights to lane-dense (128-wide) slabs and stack per layer."""
    hidden = params["word_emb"].shape[1]
    Hp = Ip = Cp = LANE

    def pad2(a, rows, cols):
        return jnp.pad(a, ((0, rows - a.shape[0]), (0, cols - a.shape[1])))

    def pad_row(v, cols):   # (n,) -> (1, cols)
        return jnp.pad(v.reshape(1, -1), ((0, 0), (0, cols - v.shape[0])))

    packed = dict(
        word_emb=pad2(params["word_emb"], params["word_emb"].shape[0], Hp),
        pos_emb=pad2(params["pos_emb"], params["pos_emb"].shape[0], Hp),
        type_emb=pad2(params["type_emb"], params["type_emb"].shape[0], Hp),
        emb_ln_g=pad_row(params["emb_ln_g"], Hp),
        emb_ln_b=pad_row(params["emb_ln_b"], Hp),
        pool_w=pad2(params["pool_w"], Hp, Hp),
        pool_b=pad_row(params["pool_b"], Hp),
        out_w=pad2(params["out_w"], Hp, Cp),
        out_b=pad_row(params["out_b"], Cp),
    )

    wqkv, bqkv, wo, bo = [], [], [], []
    ln1g, ln1b, w1, b1, w2, b2, ln2g, ln2b = [], [], [], [], [], [], [], []
    for lyr in params["layers"]:
        # fused QKV weight: one 128-lane slab per (head, q/k/v) so head split is
        # 128-aligned slicing inside the kernel; padded lanes are zero.
        wq = jnp.zeros((Hp, 3 * n_heads * LANE), jnp.float32)
        bq = jnp.zeros((1, 3 * n_heads * LANE), jnp.float32)
        wot = jnp.zeros((n_heads * LANE, Hp), jnp.float32)
        for h in range(n_heads):
            cs, ce = h * head_dim, (h + 1) * head_dim
            for j, name in enumerate(("q", "k", "v")):
                col0 = (3 * h + j) * LANE
                wq = wq.at[:hidden, col0:col0 + head_dim].set(lyr[f"{name}_w"][:, cs:ce])
                bq = bq.at[0, col0:col0 + head_dim].set(lyr[f"{name}_b"][cs:ce])
            wot = wot.at[h * LANE:h * LANE + head_dim, :hidden].set(lyr["o_w"][cs:ce, :])
        wqkv.append(wq); bqkv.append(bq); wo.append(wot)
        bo.append(pad_row(lyr["o_b"], Hp))
        ln1g.append(pad_row(lyr["ln1_g"], Hp)); ln1b.append(pad_row(lyr["ln1_b"], Hp))
        w1.append(pad2(lyr["f1_w"], Hp, Ip));   b1.append(pad_row(lyr["f1_b"], Ip))
        w2.append(pad2(lyr["f2_w"], Ip, Hp));   b2.append(pad_row(lyr["f2_b"], Hp))
        ln2g.append(pad_row(lyr["ln2_g"], Hp)); ln2b.append(pad_row(lyr["ln2_b"], Hp))

    packed.update(
        wqkv=jnp.stack(wqkv), bqkv=jnp.stack(bqkv), wo=jnp.stack(wo), bo=jnp.stack(bo),
        ln1_g=jnp.stack(ln1g), ln1_b=jnp.stack(ln1b),
        w1=jnp.stack(w1), b1=jnp.stack(b1), w2=jnp.stack(w2), b2=jnp.stack(b2),
        ln2_g=jnp.stack(ln2g), ln2_b=jnp.stack(ln2b),
    )
    return packed


# ------------------------------- forward pass ------------------------------

def bert_classifier_forward(packed, ids, mask, *, n_heads, head_dim, n_layers,
                            hidden, n_classes):
    B, S = ids.shape
    Hp = packed["word_emb"].shape[1]
    Cp = packed["out_w"].shape[1]

    # --- embeddings (data-dependent gather stays in plain JAX) ---
    we = packed["word_emb"][ids]                       # (B, S, Hp)
    pe = packed["pos_emb"][:S][None, :, :]             # (1, S, Hp)
    te = packed["type_emb"][0][None, None, :]          # token_type_ids = 0
    x = (we + pe + te).astype(jnp.float32).reshape(B * S, Hp)

    # HF-style additive attention mask
    amask = ((1.0 - mask.astype(jnp.float32)) * -10000.0).reshape(B, 1, S)

    def const_spec(a):   # whole array, same block for every grid step
        return pl.BlockSpec(a.shape, lambda b: (0,) * a.ndim)

    weights = (
        packed["emb_ln_g"], packed["emb_ln_b"],
        packed["wqkv"], packed["bqkv"], packed["wo"], packed["bo"],
        packed["ln1_g"], packed["ln1_b"],
        packed["w1"], packed["b1"], packed["w2"], packed["b2"],
        packed["ln2_g"], packed["ln2_b"],
        packed["pool_w"], packed["pool_b"], packed["out_w"], packed["out_b"],
    )

    kernel = functools.partial(
        _bert_fused_kernel, n_layers=n_layers, n_heads=n_heads,
        h_real=hidden, scale=1.0 / (head_dim ** 0.5))

    # NOTE: total VMEM footprint here is a few MB, far below the scoped limit;
    # at real BERT-base shapes, add a token-dim grid + K-split with an f32
    # accumulator and set pltpu.CompilerParams(vmem_limit_bytes=...) explicitly.
    logits_pad = pl.pallas_call(
        kernel,
        out_shape=jax.ShapeDtypeStruct((B * S, Cp), jnp.float32),
        grid=(B,),
        in_specs=[pl.BlockSpec((S, Hp), lambda b: (b, 0)),        # activations
                  pl.BlockSpec((1, 1, S), lambda b: (b, 0, 0))]   # additive mask
                 + [const_spec(w) for w in weights],
        out_specs=pl.BlockSpec((S, Cp), lambda b: (b, 0)),
        compiler_params=pltpu.CompilerParams(
            dimension_semantics=("parallel",)),   # shard batch over v7x's 2 TCs
    )(x, amask, *weights)

    # row 0 of each batch element's block carries the logits; real classes first
    return logits_pad.reshape(B, S, Cp)[:, 0, :n_classes]


# ----------------------------------- main -----------------------------------

if __name__ == "__main__":
    B, S = 2, 8
    VOCAB, HIDDEN, LAYERS, HEADS, INTER = 64, 32, 2, 2, 64
    HEAD_DIM = HIDDEN // HEADS
    MAX_POS, TYPE_VOCAB, N_CLASSES = 16, 2, 2

    root = jax.random.PRNGKey(0)
    pkey, ikey = jax.random.split(root)
    params = init_params(pkey, vocab=VOCAB, hidden=HIDDEN, n_layers=LAYERS,
                         n_heads=HEADS, inter=INTER, max_pos=MAX_POS,
                         type_vocab=TYPE_VOCAB, n_classes=N_CLASSES)
    packed = pack_params(params, n_heads=HEADS, head_dim=HEAD_DIM)

    ids = jax.random.randint(ikey, (B, S), 0, VOCAB, dtype=jnp.int32)
    mask = jnp.ones((B, S), dtype=jnp.int32).at[1, 6:].set(0)   # pad last 2 tokens

    logits = bert_classifier_forward(packed, ids, mask, n_heads=HEADS,
                                     head_dim=HEAD_DIM, n_layers=LAYERS,
                                     hidden=HIDDEN, n_classes=N_CLASSES)
    logits = jax.block_until_ready(logits)
    assert logits.shape == (B, N_CLASSES) and logits.dtype == jnp.float32
    print("KERNEL_OK")
</pallas_src>

<mosaic_0001>
module attributes {stable_mosaic.version = 11 : i64} {
  func.func @_bert_fused_kernel(%arg0: i32, %arg1: memref<8x128xf32, #tpu.memory_space<vmem>>, %arg2: memref<1x1x8xf32, #tpu.memory_space<vmem>>, %arg3: memref<1x128xf32, #tpu.memory_space<vmem>>, %arg4: memref<1x128xf32, #tpu.memory_space<vmem>>, %arg5: memref<2x128x768xf32, #tpu.memory_space<vmem>>, %arg6: memref<2x1x768xf32, #tpu.memory_space<vmem>>, %arg7: memref<2x256x128xf32, #tpu.memory_space<vmem>>, %arg8: memref<2x1x128xf32, #tpu.memory_space<vmem>>, %arg9: memref<2x1x128xf32, #tpu.memory_space<vmem>>, %arg10: memref<2x1x128xf32, #tpu.memory_space<vmem>>, %arg11: memref<2x128x128xf32, #tpu.memory_space<vmem>>, %arg12: memref<2x1x128xf32, #tpu.memory_space<vmem>>, %arg13: memref<2x128x128xf32, #tpu.memory_space<vmem>>, %arg14: memref<2x1x128xf32, #tpu.memory_space<vmem>>, %arg15: memref<2x1x128xf32, #tpu.memory_space<vmem>>, %arg16: memref<2x1x128xf32, #tpu.memory_space<vmem>>, %arg17: memref<128x128xf32, #tpu.memory_space<vmem>>, %arg18: memref<1x128xf32, #tpu.memory_space<vmem>>, %arg19: memref<128x128xf32, #tpu.memory_space<vmem>>, %arg20: memref<1x128xf32, #tpu.memory_space<vmem>>, %arg21: memref<8x128xf32, #tpu.memory_space<vmem>>) attributes {dimension_semantics = [#tpu.dimension_semantics<parallel>], iteration_bounds = array<i64: 2>, scalar_prefetch = 0 : i64, scratch_operands = 0 : i64, tpu.core_type = #tpu.core_type<tc>, window_params = [{transform_indices = @transform_0, window_bounds = array<i64: 8, 128>}, {transform_indices = @transform_1, window_bounds = array<i64: 1, 1, 8>}, {pipeline_mode = #tpu.pipeline_mode<synchronous>, transform_indices = @transform_2, window_bounds = array<i64: 1, 128>}, {pipeline_mode = #tpu.pipeline_mode<synchronous>, transform_indices = @transform_3, window_bounds = array<i64: 1, 128>}, {pipeline_mode = #tpu.pipeline_mode<synchronous>, transform_indices = @transform_4, window_bounds = array<i64: 2, 128, 768>}, {pipeline_mode = #tpu.pipeline_mode<synchronous>, transform_indices = @transform_5, window_bounds = array<i64: 2, 1, 768>}, {pipeline_mode = #tpu.pipeline_mode<synchronous>, transform_indices = @transform_6, window_bounds = array<i64: 2, 256, 128>}, {pipeline_mode = #tpu.pipeline_mode<synchronous>, transform_indices = @transform_7, window_bounds = array<i64: 2, 1, 128>}, {pipeline_mode = #tpu.pipeline_mode<synchronous>, transform_indices = @transform_8, window_bounds = array<i64: 2, 1, 128>}, {pipeline_mode = #tpu.pipeline_mode<synchronous>, transform_indices = @transform_9, window_bounds = array<i64: 2, 1, 128>}, {pipeline_mode = #tpu.pipeline_mode<synchronous>, transform_indices = @transform_10, window_bounds = array<i64: 2, 128, 128>}, {pipeline_mode = #tpu.pipeline_mode<synchronous>, transform_indices = @transform_11, window_bounds = array<i64: 2, 1, 128>}, {pipeline_mode = #tpu.pipeline_mode<synchronous>, transform_indices = @transform_12, window_bounds = array<i64: 2, 128, 128>}, {pipeline_mode = #tpu.pipeline_mode<synchronous>, transform_indices = @transform_13, window_bounds = array<i64: 2, 1, 128>}, {pipeline_mode = #tpu.pipeline_mode<synchronous>, transform_indices = @transform_14, window_bounds = array<i64: 2, 1, 128>}, {pipeline_mode = #tpu.pipeline_mode<synchronous>, transform_indices = @transform_15, window_bounds = array<i64: 2, 1, 128>}, {pipeline_mode = #tpu.pipeline_mode<synchronous>, transform_indices = @transform_16, window_bounds = array<i64: 128, 128>}, {pipeline_mode = #tpu.pipeline_mode<synchronous>, transform_indices = @transform_17, window_bounds = array<i64: 1, 128>}, {pipeline_mode = #tpu.pipeline_mode<synchronous>, transform_indices = @transform_18, window_bounds = array<i64: 128, 128>}, {pipeline_mode = #tpu.pipeline_mode<synchronous>, transform_indices = @transform_19, window_bounds = array<i64: 1, 128>}, {transform_indices = @transform_20, window_bounds = array<i64: 8, 128>}]} {
    %c0 = arith.constant 0 : index
    %c0_0 = arith.constant 0 : index
    %c0_1 = arith.constant 0 : index
    %0 = vector.load %arg2[%c0, %c0_0, %c0_1] : memref<1x1x8xf32, #tpu.memory_space<vmem>>, vector<1x1x8xf32>
    %1 = vector.shape_cast %0 : vector<1x1x8xf32> to vector<1x8xf32>
    %c0_2 = arith.constant 0 : index
    %c0_3 = arith.constant 0 : index
    %2 = vector.load %arg1[%c0_2, %c0_3] : memref<8x128xf32, #tpu.memory_space<vmem>>, vector<8x128xf32>
    %c0_4 = arith.constant 0 : index
    %c0_5 = arith.constant 0 : index
    %3 = vector.load %arg3[%c0_4, %c0_5] : memref<1x128xf32, #tpu.memory_space<vmem>>, vector<1x128xf32>
    %c0_6 = arith.constant 0 : index
    %c0_7 = arith.constant 0 : index
    %4 = vector.load %arg4[%c0_6, %c0_7] : memref<1x128xf32, #tpu.memory_space<vmem>>, vector<1x128xf32>
    %cst = arith.constant dense<0.000000e+00> : vector<8xf32>
    %5 = vector.multi_reduction <add>, %2, %cst [1] : vector<8x128xf32> to vector<8xf32>
    %6 = vector.shape_cast %5 : vector<8xf32> to vector<8x1xf32>
    %7 = arith.mulf %2, %2 : vector<8x128xf32>
    %cst_8 = arith.constant dense<0.000000e+00> : vector<8xf32>
    %8 = vector.multi_reduction <add>, %7, %cst_8 [1] : vector<8x128xf32> to vector<8xf32>
    %9 = vector.shape_cast %8 : vector<8xf32> to vector<8x1xf32>
    %cst_9 = arith.constant 3.125000e-02 : f32
    %10 = vector.broadcast %cst_9 : f32 to vector<8x1xf32>
    %11 = arith.mulf %6, %10 : vector<8x1xf32>
    %cst_10 = arith.constant 3.125000e-02 : f32
    %12 = vector.broadcast %cst_10 : f32 to vector<8x1xf32>
    %13 = arith.mulf %9, %12 : vector<8x1xf32>
    %14 = arith.mulf %11, %11 : vector<8x1xf32>
    %15 = arith.subf %13, %14 : vector<8x1xf32>
    %16 = vector.broadcast %11 : vector<8x1xf32> to vector<8x128xf32>
    %17 = arith.subf %2, %16 : vector<8x128xf32>
    %cst_11 = arith.constant 9.99999996E-13 : f32
    %18 = vector.broadcast %cst_11 : f32 to vector<8x1xf32>
    %19 = arith.addf %15, %18 : vector<8x1xf32>
    %20 = math.rsqrt %19 : vector<8x1xf32>
    %21 = vector.broadcast %20 : vector<8x1xf32> to vector<8x128xf32>
    %22 = arith.mulf %17, %21 : vector<8x128xf32>
    %23 = vector.broadcast %3 : vector<1x128xf32> to vector<8x128xf32>
    %24 = arith.mulf %22, %23 : vector<8x128xf32>
    %25 = vector.broadcast %4 : vector<1x128xf32> to vector<8x128xf32>
    %26 = arith.addf %24, %25 : vector<8x128xf32>
    %c0_12 = arith.constant 0 : index
    %c0_13 = arith.constant 0 : index
    %c0_14 = arith.constant 0 : index
    %27 = vector.load %arg5[%c0_12, %c0_13, %c0_14] : memref<2x128x768xf32, #tpu.memory_space<vmem>>, vector<1x128x768xf32>
    %28 = vector.shape_cast %27 : vector<1x128x768xf32> to vector<128x768xf32>
    %29 = arith.truncf %26 : vector<8x128xf32> to vector<8x128xbf16>
    %30 = arith.truncf %28 : vector<128x768xf32> to vector<128x768xbf16>
    %cst_15 = arith.constant dense<0.000000e+00> : vector<8x768xf32>
    %31 = tpu.matmul %29, %30, %cst_15 {dimension_numbers = #tpu.dot_dimension_numbers<[1], [0], [0], [1], [0, 0, 1, 1], [], []>} : vector<8x128xbf16>, vector<128x768xbf16>, vector<8x768xf32> -> vector<8x768xf32>
    %c0_16 = arith.constant 0 : index
    %c0_17 = arith.constant 0 : index
    %c0_18 = arith.constant 0 : index
    %32 = vector.load %arg6[%c0_16, %c0_17, %c0_18] : memref<2x1x768xf32, #tpu.memory_space<vmem>>, vector<1x1x768xf32>
    %33 = vector.shape_cast %32 : vector<1x1x768xf32> to vector<1x768xf32>
    %34 = vector.broadcast %33 : vector<1x768xf32> to vector<8x768xf32>
    %35 = arith.addf %31, %34 : vector<8x768xf32>
    %c0_19 = arith.constant 0 : index
    %c0_20 = arith.constant 0 : index
    %c0_21 = arith.constant 0 : index
    %36 = vector.load %arg7[%c0_19, %c0_20, %c0_21] : memref<2x256x128xf32, #tpu.memory_space<vmem>>, vector<1x256x128xf32>
    %37 = vector.shape_cast %36 : vector<1x256x128xf32> to vector<256x128xf32>
    %cst_22 = arith.constant 0.000000e+00 : f32
    %38 = vector.broadcast %cst_22 : f32 to vector<8x128xf32>
    %39 = vector.extract_strided_slice %35 {offsets = [0, 0], sizes = [8, 128], strides = [1, 1]} : vector<8x768xf32> to vector<8x128xf32>
    %40 = vector.extract_strided_slice %35 {offsets = [0, 128], sizes = [8, 128], strides = [1, 1]} : vector<8x768xf32> to vector<8x128xf32>
    %41 = vector.extract_strided_slice %35 {offsets = [0, 256], sizes = [8, 128], strides = [1, 1]} : vector<8x768xf32> to vector<8x128xf32>
    %42 = arith.truncf %39 : vector<8x128xf32> to vector<8x128xbf16>
    %43 = arith.truncf %40 : vector<8x128xf32> to vector<8x128xbf16>
    %cst_23 = arith.constant dense<0.000000e+00> : vector<8x8xf32>
    %44 = tpu.matmul %42, %43, %cst_23 {dimension_numbers = #tpu.dot_dimension_numbers<[1], [1], [0], [0], [0, 0, 1, 0], [], []>} : vector<8x128xbf16>, vector<8x128xbf16>, vector<8x8xf32> -> vector<8x8xf32>
    %cst_24 = arith.constant 2.500000e-01 : f32
    %45 = vector.broadcast %cst_24 : f32 to vector<8x8xf32>
    %46 = arith.mulf %44, %45 : vector<8x8xf32>
    %47 = vector.broadcast %1 : vector<1x8xf32> to vector<8x8xf32>
    %48 = arith.addf %46, %47 : vector<8x8xf32>
    %cst_25 = arith.constant dense<0xFF800000> : vector<8xf32>
    %49 = vector.multi_reduction <maximumf>, %48, %cst_25 [1] : vector<8x8xf32> to vector<8xf32>
    %50 = vector.shape_cast %49 : vector<8xf32> to vector<8x1xf32>
    %51 = vector.broadcast %50 : vector<8x1xf32> to vector<8x8xf32>
    %52 = arith.subf %48, %51 : vector<8x8xf32>
    %53 = math.exp %52 : vector<8x8xf32>
    %cst_26 = arith.constant dense<0.000000e+00> : vector<8xf32>
    %54 = vector.multi_reduction <add>, %53, %cst_26 [1] : vector<8x8xf32> to vector<8xf32>
    %55 = vector.shape_cast %54 : vector<8xf32> to vector<8x1xf32>
    %56 = tpu.reciprocal %55 {approx = true} : vector<8x1xf32> -> vector<8x1xf32>
    %57 = vector.broadcast %56 : vector<8x1xf32> to vector<8x8xf32>
    %58 = arith.mulf %53, %57 : vector<8x8xf32>
    %59 = arith.truncf %58 : vector<8x8xf32> to vector<8x8xbf16>
    %60 = arith.truncf %41 : vector<8x128xf32> to vector<8x128xbf16>
    %cst_27 = arith.constant dense<0.000000e+00> : vector<8x128xf32>
    %61 = tpu.matmul %59, %60, %cst_27 {dimension_numbers = #tpu.dot_dimension_numbers<[1], [0], [0], [1], [0, 0, 1, 1], [], []>} : vector<8x8xbf16>, vector<8x128xbf16>, vector<8x128xf32> -> vector<8x128xf32>
    %62 = vector.extract_strided_slice %37 {offsets = [0, 0], sizes = [128, 128], strides = [1, 1]} : vector<256x128xf32> to vector<128x128xf32>
    %63 = arith.truncf %61 : vector<8x128xf32> to vector<8x128xbf16>
    %64 = arith.truncf %62 : vector<128x128xf32> to vector<128x128xbf16>
    %cst_28 = arith.constant dense<0.000000e+00> : vector<8x128xf32>
    %65 = tpu.matmul %63, %64, %cst_28 {dimension_numbers = #tpu.dot_dimension_numbers<[1], [0], [0], [1], [0, 0, 1, 1], [], []>} : vector<8x128xbf16>, vector<128x128xbf16>, vector<8x128xf32> -> vector<8x128xf32>
    %66 = arith.addf %38, %65 : vector<8x128xf32>
    %67 = vector.extract_strided_slice %35 {offsets = [0, 384], sizes = [8, 128], strides = [1, 1]} : vector<8x768xf32> to vector<8x128xf32>
    %68 = vector.extract_strided_slice %35 {offsets = [0, 512], sizes = [8, 128], strides = [1, 1]} : vector<8x768xf32> to vector<8x128xf32>
    %69 = vector.extract_strided_slice %35 {offsets = [0, 640], sizes = [8, 128], strides = [1, 1]} : vector<8x768xf32> to vector<8x128xf32>
    %70 = arith.truncf %67 : vector<8x128xf32> to vector<8x128xbf16>
    %71 = arith.truncf %68 : vector<8x128xf32> to vector<8x128xbf16>
    %cst_29 = arith.constant dense<0.000000e+00> : vector<8x8xf32>
    %72 = tpu.matmul %70, %71, %cst_29 {dimension_numbers = #tpu.dot_dimension_numbers<[1], [1], [0], [0], [0, 0, 1, 0], [], []>} : vector<8x128xbf16>, vector<8x128xbf16>, vector<8x8xf32> -> vector<8x8xf32>
    %cst_30 = arith.constant 2.500000e-01 : f32
    %73 = vector.broadcast %cst_30 : f32 to vector<8x8xf32>
    %74 = arith.mulf %72, %73 : vector<8x8xf32>
    %75 = vector.broadcast %1 : vector<1x8xf32> to vector<8x8xf32>
    %76 = arith.addf %74, %75 : vector<8x8xf32>
    %cst_31 = arith.constant dense<0xFF800000> : vector<8xf32>
    %77 = vector.multi_reduction <maximumf>, %76, %cst_31 [1] : vector<8x8xf32> to vector<8xf32>
    %78 = vector.shape_cast %77 : vector<8xf32> to vector<8x1xf32>
    %79 = vector.broadcast %78 : vector<8x1xf32> to vector<8x8xf32>
    %80 = arith.subf %76, %79 : vector<8x8xf32>
    %81 = math.exp %80 : vector<8x8xf32>
    %cst_32 = arith.constant dense<0.000000e+00> : vector<8xf32>
    %82 = vector.multi_reduction <add>, %81, %cst_32 [1] : vector<8x8xf32> to vector<8xf32>
    %83 = vector.shape_cast %82 : vector<8xf32> to vector<8x1xf32>
    %84 = tpu.reciprocal %83 {approx = true} : vector<8x1xf32> -> vector<8x1xf32>
    %85 = vector.broadcast %84 : vector<8x1xf32> to vector<8x8xf32>
    %86 = arith.mulf %81, %85 : vector<8x8xf32>
    %87 = arith.truncf %86 : vector<8x8xf32> to vector<8x8xbf16>
    %88 = arith.truncf %69 : vector<8x128xf32> to vector<8x128xbf16>
    %cst_33 = arith.constant dense<0.000000e+00> : vector<8x128xf32>
    %89 = tpu.matmul %87, %88, %cst_33 {dimension_numbers = #tpu.dot_dimension_numbers<[1], [0], [0], [1], [0, 0, 1, 1], [], []>} : vector<8x8xbf16>, vector<8x128xbf16>, vector<8x128xf32> -> vector<8x128xf32>
    %90 = vector.extract_strided_slice %37 {offsets = [128, 0], sizes = [128, 128], strides = [1, 1]} : vector<256x128xf32> to vector<128x128xf32>
    %91 = arith.truncf %89 : vector<8x128xf32> to vector<8x128xbf16>
    %92 = arith.truncf %90 : vector<128x128xf32> to vector<128x128xbf16>
    %cst_34 = arith.constant dense<0.000000e+00> : vector<8x128xf32>
    %93 = tpu.matmul %91, %92, %cst_34 {dimension_numbers = #tpu.dot_dimension_numbers<[1], [0], [0], [1], [0, 0, 1, 1], [], []>} : vector<8x128xbf16>, vector<128x128xbf16>, vector<8x128xf32> -> vector<8x128xf32>
    %94 = arith.addf %66, %93 : vector<8x128xf32>
    %c0_35 = arith.constant 0 : index
    %c0_36 = arith.constant 0 : index
    %c0_37 = arith.constant 0 : index
    %95 = vector.load %arg8[%c0_35, %c0_36, %c0_37] : memref<2x1x128xf32, #tpu.memory_space<vmem>>, vector<1x1x128xf32>
    %96 = vector.shape_cast %95 : vector<1x1x128xf32> to vector<1x128xf32>
    %97 = vector.broadcast %96 : vector<1x128xf32> to vector<8x128xf32>
    %98 = arith.addf %94, %97 : vector<8x128xf32>
    %99 = arith.addf %98, %26 : vector<8x128xf32>
    %c0_38 = arith.constant 0 : index
    %c0_39 = arith.constant 0 : index
    %c0_40 = arith.constant 0 : index
    %100 = vector.load %arg9[%c0_38, %c0_39, %c0_40] : memref<2x1x128xf32, #tpu.memory_space<vmem>>, vector<1x1x128xf32>
    %101 = vector.shape_cast %100 : vector<1x1x128xf32> to vector<1x128xf32>
    %c0_41 = arith.constant 0 : index
    %c0_42 = arith.constant 0 : index
    %c0_43 = arith.constant 0 : index
    %102 = vector.load %arg10[%c0_41, %c0_42, %c0_43] : memref<2x1x128xf32, #tpu.memory_space<vmem>>, vector<1x1x128xf32>
    %103 = vector.shape_cast %102 : vector<1x1x128xf32> to vector<1x128xf32>
    %cst_44 = arith.constant dense<0.000000e+00> : vector<8xf32>
    %104 = vector.multi_reduction <add>, %99, %cst_44 [1] : vector<8x128xf32> to vector<8xf32>
    %105 = vector.shape_cast %104 : vector<8xf32> to vector<8x1xf32>
    %106 = arith.mulf %99, %99 : vector<8x128xf32>
    %cst_45 = arith.constant dense<0.000000e+00> : vector<8xf32>
    %107 = vector.multi_reduction <add>, %106, %cst_45 [1] : vector<8x128xf32> to vector<8xf32>
    %108 = vector.shape_cast %107 : vector<8xf32> to vector<8x1xf32>
    %cst_46 = arith.constant 3.125000e-02 : f32
    %109 = vector.broadcast %cst_46 : f32 to vector<8x1xf32>
    %110 = arith.mulf %105, %109 : vector<8x1xf32>
    %cst_47 = arith.constant 3.125000e-02 : f32
    %111 = vector.broadcast %cst_47 : f32 to vector<8x1xf32>
    %112 = arith.mulf %108, %111 : vector<8x1xf32>
    %113 = arith.mulf %110, %110 : vector<8x1xf32>
    %114 = arith.subf %112, %113 : vector<8x1xf32>
    %115 = vector.broadcast %110 : vector<8x1xf32> to vector<8x128xf32>
    %116 = arith.subf %99, %115 : vector<8x128xf32>
    %cst_48 = arith.constant 9.99999996E-13 : f32
    %117 = vector.broadcast %cst_48 : f32 to vector<8x1xf32>
    %118 = arith.addf %114, %117 : vector<8x1xf32>
    %119 = math.rsqrt %118 : vector<8x1xf32>
    %120 = vector.broadcast %119 : vector<8x1xf32> to vector<8x128xf32>
    %121 = arith.mulf %116, %120 : vector<8x128xf32>
    %122 = vector.broadcast %101 : vector<1x128xf32> to vector<8x128xf32>
    %123 = arith.mulf %121, %122 : vector<8x128xf32>
    %124 = vector.broadcast %103 : vector<1x128xf32> to vector<8x128xf32>
    %125 = arith.addf %123, %124 : vector<8x128xf32>
    %c0_49 = arith.constant 0 : index
    %c0_50 = arith.constant 0 : index
    %c0_51 = arith.constant 0 : index
    %126 = vector.load %arg11[%c0_49, %c0_50, %c0_51] : memref<2x128x128xf32, #tpu.memory_space<vmem>>, vector<1x128x128xf32>
    %127 = vector.shape_cast %126 : vector<1x128x128xf32> to vector<128x128xf32>
    %128 = arith.truncf %125 : vector<8x128xf32> to vector<8x128xbf16>
    %129 = arith.truncf %127 : vector<128x128xf32> to vector<128x128xbf16>
    %cst_52 = arith.constant dense<0.000000e+00> : vector<8x128xf32>
    %130 = tpu.matmul %128, %129, %cst_52 {dimension_numbers = #tpu.dot_dimension_numbers<[1], [0], [0], [1], [0, 0, 1, 1], [], []>} : vector<8x128xbf16>, vector<128x128xbf16>, vector<8x128xf32> -> vector<8x128xf32>
    %c0_53 = arith.constant 0 : index
    %c0_54 = arith.constant 0 : index
    %c0_55 = arith.constant 0 : index
    %131 = vector.load %arg12[%c0_53, %c0_54, %c0_55] : memref<2x1x128xf32, #tpu.memory_space<vmem>>, vector<1x1x128xf32>
    %132 = vector.shape_cast %131 : vector<1x1x128xf32> to vector<1x128xf32>
    %133 = vector.broadcast %132 : vector<1x128xf32> to vector<8x128xf32>
    %134 = arith.addf %130, %133 : vector<8x128xf32>
    %cst_56 = arith.constant 5.000000e-01 : f32
    %135 = vector.broadcast %cst_56 : f32 to vector<8x128xf32>
    %136 = arith.mulf %135, %134 : vector<8x128xf32>
    %cst_57 = arith.constant 4.471500e-02 : f32
    %137 = vector.broadcast %cst_57 : f32 to vector<8x128xf32>
    %138 = arith.mulf %137, %134 : vector<8x128xf32>
    %139 = arith.mulf %138, %134 : vector<8x128xf32>
    %140 = arith.mulf %139, %134 : vector<8x128xf32>
    %141 = arith.addf %134, %140 : vector<8x128xf32>
    %cst_58 = arith.constant 0.797884583 : f32
    %142 = vector.broadcast %cst_58 : f32 to vector<8x128xf32>
    %143 = arith.mulf %142, %141 : vector<8x128xf32>
    %144 = math.tanh %143 : vector<8x128xf32>
    %cst_59 = arith.constant 1.000000e+00 : f32
    %145 = vector.broadcast %cst_59 : f32 to vector<8x128xf32>
    %146 = arith.addf %145, %144 : vector<8x128xf32>
    %147 = arith.mulf %136, %146 : vector<8x128xf32>
    %c0_60 = arith.constant 0 : index
    %c0_61 = arith.constant 0 : index
    %c0_62 = arith.constant 0 : index
    %148 = vector.load %arg13[%c0_60, %c0_61, %c0_62] : memref<2x128x128xf32, #tpu.memory_space<vmem>>, vector<1x128x128xf32>
    %149 = vector.shape_cast %148 : vector<1x128x128xf32> to vector<128x128xf32>
    %150 = arith.truncf %147 : vector<8x128xf32> to vector<8x128xbf16>
    %151 = arith.truncf %149 : vector<128x128xf32> to vector<128x128xbf16>
    %cst_63 = arith.constant dense<0.000000e+00> : vector<8x128xf32>
    %152 = tpu.matmul %150, %151, %cst_63 {dimension_numbers = #tpu.dot_dimension_numbers<[1], [0], [0], [1], [0, 0, 1, 1], [], []>} : vector<8x128xbf16>, vector<128x128xbf16>, vector<8x128xf32> -> vector<8x128xf32>
    %c0_64 = arith.constant 0 : index
    %c0_65 = arith.constant 0 : index
    %c0_66 = arith.constant 0 : index
    %153 = vector.load %arg14[%c0_64, %c0_65, %c0_66] : memref<2x1x128xf32, #tpu.memory_space<vmem>>, vector<1x1x128xf32>
    %154 = vector.shape_cast %153 : vector<1x1x128xf32> to vector<1x128xf32>
    %155 = vector.broadcast %154 : vector<1x128xf32> to vector<8x128xf32>
    %156 = arith.addf %152, %155 : vector<8x128xf32>
    %157 = arith.addf %156, %125 : vector<8x128xf32>
    %c0_67 = arith.constant 0 : index
    %c0_68 = arith.constant 0 : index
    %c0_69 = arith.constant 0 : index
    %158 = vector.load %arg15[%c0_67, %c0_68, %c0_69] : memref<2x1x128xf32, #tpu.memory_space<vmem>>, vector<1x1x128xf32>
    %159 = vector.shape_cast %158 : vector<1x1x128xf32> to vector<1x128xf32>
    %c0_70 = arith.constant 0 : index
    %c0_71 = arith.constant 0 : index
    %c0_72 = arith.constant 0 : index
    %160 = vector.load %arg16[%c0_70, %c0_71, %c0_72] : memref<2x1x128xf32, #tpu.memory_space<vmem>>, vector<1x1x128xf32>
    %161 = vector.shape_cast %160 : vector<1x1x128xf32> to vector<1x128xf32>
    %cst_73 = arith.constant dense<0.000000e+00> : vector<8xf32>
    %162 = vector.multi_reduction <add>, %157, %cst_73 [1] : vector<8x128xf32> to vector<8xf32>
    %163 = vector.shape_cast %162 : vector<8xf32> to vector<8x1xf32>
    %164 = arith.mulf %157, %157 : vector<8x128xf32>
    %cst_74 = arith.constant dense<0.000000e+00> : vector<8xf32>
    %165 = vector.multi_reduction <add>, %164, %cst_74 [1] : vector<8x128xf32> to vector<8xf32>
    %166 = vector.shape_cast %165 : vector<8xf32> to vector<8x1xf32>
    %cst_75 = arith.constant 3.125000e-02 : f32
    %167 = vector.broadcast %cst_75 : f32 to vector<8x1xf32>
    %168 = arith.mulf %163, %167 : vector<8x1xf32>
    %cst_76 = arith.constant 3.125000e-02 : f32
    %169 = vector.broadcast %cst_76 : f32 to vector<8x1xf32>
    %170 = arith.mulf %166, %169 : vector<8x1xf32>
    %171 = arith.mulf %168, %168 : vector<8x1xf32>
    %172 = arith.subf %170, %171 : vector<8x1xf32>
    %173 = vector.broadcast %168 : vector<8x1xf32> to vector<8x128xf32>
    %174 = arith.subf %157, %173 : vector<8x128xf32>
    %cst_77 = arith.constant 9.99999996E-13 : f32
    %175 = vector.broadcast %cst_77 : f32 to vector<8x1xf32>
    %176 = arith.addf %172, %175 : vector<8x1xf32>
    %177 = math.rsqrt %176 : vector<8x1xf32>
    %178 = vector.broadcast %177 : vector<8x1xf32> to vector<8x128xf32>
    %179 = arith.mulf %174, %178 : vector<8x128xf32>
    %180 = vector.broadcast %159 : vector<1x128xf32> to vector<8x128xf32>
    %181 = arith.mulf %179, %180 : vector<8x128xf32>
    %182 = vector.broadcast %161 : vector<1x128xf32> to vector<8x128xf32>
    %183 = arith.addf %181, %182 : vector<8x128xf32>
    %c1 = arith.constant 1 : index
    %c0_78 = arith.constant 0 : index
    %c0_79 = arith.constant 0 : index
    %184 = vector.load %arg5[%c1, %c0_78, %c0_79] : memref<2x128x768xf32, #tpu.memory_space<vmem>>, vector<1x128x768xf32>
    %185 = vector.shape_cast %184 : vector<1x128x768xf32> to vector<128x768xf32>
    %186 = arith.truncf %183 : vector<8x128xf32> to vector<8x128xbf16>
    %187 = arith.truncf %185 : vector<128x768xf32> to vector<128x768xbf16>
    %cst_80 = arith.constant dense<0.000000e+00> : vector<8x768xf32>
    %188 = tpu.matmul %186, %187, %cst_80 {dimension_numbers = #tpu.dot_dimension_numbers<[1], [0], [0], [1], [0, 0, 1, 1], [], []>} : vector<8x128xbf16>, vector<128x768xbf16>, vector<8x768xf32> -> vector<8x768xf32>
    %c1_81 = arith.constant 1 : index
    %c0_82 = arith.constant 0 : index
    %c0_83 = arith.constant 0 : index
    %189 = vector.load %arg6[%c1_81, %c0_82, %c0_83] : memref<2x1x768xf32, #tpu.memory_space<vmem>>, vector<1x1x768xf32>
    %190 = vector.shape_cast %189 : vector<1x1x768xf32> to vector<1x768xf32>
    %191 = vector.broadcast %190 : vector<1x768xf32> to vector<8x768xf32>
    %192 = arith.addf %188, %191 : vector<8x768xf32>
    %c1_84 = arith.constant 1 : index
    %c0_85 = arith.constant 0 : index
    %c0_86 = arith.constant 0 : index
    %193 = vector.load %arg7[%c1_84, %c0_85, %c0_86] : memref<2x256x128xf32, #tpu.memory_space<vmem>>, vector<1x256x128xf32>
    %194 = vector.shape_cast %193 : vector<1x256x128xf32> to vector<256x128xf32>
    %cst_87 = arith.constant 0.000000e+00 : f32
    %195 = vector.broadcast %cst_87 : f32 to vector<8x128xf32>
    %196 = vector.extract_strided_slice %192 {offsets = [0, 0], sizes = [8, 128], strides = [1, 1]} : vector<8x768xf32> to vector<8x128xf32>
    %197 = vector.extract_strided_slice %192 {offsets = [0, 128], sizes = [8, 128], strides = [1, 1]} : vector<8x768xf32> to vector<8x128xf32>
    %198 = vector.extract_strided_slice %192 {offsets = [0, 256], sizes = [8, 128], strides = [1, 1]} : vector<8x768xf32> to vector<8x128xf32>
    %199 = arith.truncf %196 : vector<8x128xf32> to vector<8x128xbf16>
    %200 = arith.truncf %197 : vector<8x128xf32> to vector<8x128xbf16>
    %cst_88 = arith.constant dense<0.000000e+00> : vector<8x8xf32>
    %201 = tpu.matmul %199, %200, %cst_88 {dimension_numbers = #tpu.dot_dimension_numbers<[1], [1], [0], [0], [0, 0, 1, 0], [], []>} : vector<8x128xbf16>, vector<8x128xbf16>, vector<8x8xf32> -> vector<8x8xf32>
    %cst_89 = arith.constant 2.500000e-01 : f32
    %202 = vector.broadcast %cst_89 : f32 to vector<8x8xf32>
    %203 = arith.mulf %201, %202 : vector<8x8xf32>
    %204 = vector.broadcast %1 : vector<1x8xf32> to vector<8x8xf32>
    %205 = arith.addf %203, %204 : vector<8x8xf32>
    %cst_90 = arith.constant dense<0xFF800000> : vector<8xf32>
    %206 = vector.multi_reduction <maximumf>, %205, %cst_90 [1] : vector<8x8xf32> to vector<8xf32>
    %207 = vector.shape_cast %206 : vector<8xf32> to vector<8x1xf32>
    %208 = vector.broadcast %207 : vector<8x1xf32> to vector<8x8xf32>
    %209 = arith.subf %205, %208 : vector<8x8xf32>
    %210 = math.exp %209 : vector<8x8xf32>
    %cst_91 = arith.constant dense<0.000000e+00> : vector<8xf32>
    %211 = vector.multi_reduction <add>, %210, %cst_91 [1] : vector<8x8xf32> to vector<8xf32>
    %212 = vector.shape_cast %211 : vector<8xf32> to vector<8x1xf32>
    %213 = tpu.reciprocal %212 {approx = true} : vector<8x1xf32> -> vector<8x1xf32>
    %214 = vector.broadcast %213 : vector<8x1xf32> to vector<8x8xf32>
    %215 = arith.mulf %210, %214 : vector<8x8xf32>
    %216 = arith.truncf %215 : vector<8x8xf32> to vector<8x8xbf16>
    %217 = arith.truncf %198 : vector<8x128xf32> to vector<8x128xbf16>
    %cst_92 = arith.constant dense<0.000000e+00> : vector<8x128xf32>
    %218 = tpu.matmul %216, %217, %cst_92 {dimension_numbers = #tpu.dot_dimension_numbers<[1], [0], [0], [1], [0, 0, 1, 1], [], []>} : vector<8x8xbf16>, vector<8x128xbf16>, vector<8x128xf32> -> vector<8x128xf32>
    %219 = vector.extract_strided_slice %194 {offsets = [0, 0], sizes = [128, 128], strides = [1, 1]} : vector<256x128xf32> to vector<128x128xf32>
    %220 = arith.truncf %218 : vector<8x128xf32> to vector<8x128xbf16>
    %221 = arith.truncf %219 : vector<128x128xf32> to vector<128x128xbf16>
    %cst_93 = arith.constant dense<0.000000e+00> : vector<8x128xf32>
    %222 = tpu.matmul %220, %221, %cst_93 {dimension_numbers = #tpu.dot_dimension_numbers<[1], [0], [0], [1], [0, 0, 1, 1], [], []>} : vector<8x128xbf16>, vector<128x128xbf16>, vector<8x128xf32> -> vector<8x128xf32>
    %223 = arith.addf %195, %222 : vector<8x128xf32>
    %224 = vector.extract_strided_slice %192 {offsets = [0, 384], sizes = [8, 128], strides = [1, 1]} : vector<8x768xf32> to vector<8x128xf32>
    %225 = vector.extract_strided_slice %192 {offsets = [0, 512], sizes = [8, 128], strides = [1, 1]} : vector<8x768xf32> to vector<8x128xf32>
    %226 = vector.extract_strided_slice %192 {offsets = [0, 640], sizes = [8, 128], strides = [1, 1]} : vector<8x768xf32> to vector<8x128xf32>
    %227 = arith.truncf %224 : vector<8x128xf32> to vector<8x128xbf16>
    %228 = arith.truncf %225 : vector<8x128xf32> to vector<8x128xbf16>
    %cst_94 = arith.constant dense<0.000000e+00> : vector<8x8xf32>
    %229 = tpu.matmul %227, %228, %cst_94 {dimension_numbers = #tpu.dot_dimension_numbers<[1], [1], [0], [0], [0, 0, 1, 0], [], []>} : vector<8x128xbf16>, vector<8x128xbf16>, vector<8x8xf32> -> vector<8x8xf32>
    %cst_95 = arith.constant 2.500000e-01 : f32
    %230 = vector.broadcast %cst_95 : f32 to vector<8x8xf32>
    %231 = arith.mulf %229, %230 : vector<8x8xf32>
    %232 = vector.broadcast %1 : vector<1x8xf32> to vector<8x8xf32>
    %233 = arith.addf %231, %232 : vector<8x8xf32>
    %cst_96 = arith.constant dense<0xFF800000> : vector<8xf32>
    %234 = vector.multi_reduction <maximumf>, %233, %cst_96 [1] : vector<8x8xf32> to vector<8xf32>
    %235 = vector.shape_cast %234 : vector<8xf32> to vector<8x1xf32>
    %236 = vector.broadcast %235 : vector<8x1xf32> to vector<8x8xf32>
    %237 = arith.subf %233, %236 : vector<8x8xf32>
    %238 = math.exp %237 : vector<8x8xf32>
    %cst_97 = arith.constant dense<0.000000e+00> : vector<8xf32>
    %239 = vector.multi_reduction <add>, %238, %cst_97 [1] : vector<8x8xf32> to vector<8xf32>
    %240 = vector.shape_cast %239 : vector<8xf32> to vector<8x1xf32>
    %241 = tpu.reciprocal %240 {approx = true} : vector<8x1xf32> -> vector<8x1xf32>
    %242 = vector.broadcast %241 : vector<8x1xf32> to vector<8x8xf32>
    %243 = arith.mulf %238, %242 : vector<8x8xf32>
    %244 = arith.truncf %243 : vector<8x8xf32> to vector<8x8xbf16>
    %245 = arith.truncf %226 : vector<8x128xf32> to vector<8x128xbf16>
    %cst_98 = arith.constant dense<0.000000e+00> : vector<8x128xf32>
    %246 = tpu.matmul %244, %245, %cst_98 {dimension_numbers = #tpu.dot_dimension_numbers<[1], [0], [0], [1], [0, 0, 1, 1], [], []>} : vector<8x8xbf16>, vector<8x128xbf16>, vector<8x128xf32> -> vector<8x128xf32>
    %247 = vector.extract_strided_slice %194 {offsets = [128, 0], sizes = [128, 128], strides = [1, 1]} : vector<256x128xf32> to vector<128x128xf32>
    %248 = arith.truncf %246 : vector<8x128xf32> to vector<8x128xbf16>
    %249 = arith.truncf %247 : vector<128x128xf32> to vector<128x128xbf16>
    %cst_99 = arith.constant dense<0.000000e+00> : vector<8x128xf32>
    %250 = tpu.matmul %248, %249, %cst_99 {dimension_numbers = #tpu.dot_dimension_numbers<[1], [0], [0], [1], [0, 0, 1, 1], [], []>} : vector<8x128xbf16>, vector<128x128xbf16>, vector<8x128xf32> -> vector<8x128xf32>
    %251 = arith.addf %223, %250 : vector<8x128xf32>
    %c1_100 = arith.constant 1 : index
    %c0_101 = arith.constant 0 : index
    %c0_102 = arith.constant 0 : index
    %252 = vector.load %arg8[%c1_100, %c0_101, %c0_102] : memref<2x1x128xf32, #tpu.memory_space<vmem>>, vector<1x1x128xf32>
    %253 = vector.shape_cast %252 : vector<1x1x128xf32> to vector<1x128xf32>
    %254 = vector.broadcast %253 : vector<1x128xf32> to vector<8x128xf32>
    %255 = arith.addf %251, %254 : vector<8x128xf32>
    %256 = arith.addf %255, %183 : vector<8x128xf32>
    %c1_103 = arith.constant 1 : index
    %c0_104 = arith.constant 0 : index
    %c0_105 = arith.constant 0 : index
    %257 = vector.load %arg9[%c1_103, %c0_104, %c0_105] : memref<2x1x128xf32, #tpu.memory_space<vmem>>, vector<1x1x128xf32>
    %258 = vector.shape_cast %257 : vector<1x1x128xf32> to vector<1x128xf32>
    %c1_106 = arith.constant 1 : index
    %c0_107 = arith.constant 0 : index
    %c0_108 = arith.constant 0 : index
    %259 = vector.load %arg10[%c1_106, %c0_107, %c0_108] : memref<2x1x128xf32, #tpu.memory_space<vmem>>, vector<1x1x128xf32>
    %260 = vector.shape_cast %259 : vector<1x1x128xf32> to vector<1x128xf32>
    %cst_109 = arith.constant dense<0.000000e+00> : vector<8xf32>
    %261 = vector.multi_reduction <add>, %256, %cst_109 [1] : vector<8x128xf32> to vector<8xf32>
    %262 = vector.shape_cast %261 : vector<8xf32> to vector<8x1xf32>
    %263 = arith.mulf %256, %256 : vector<8x128xf32>
    %cst_110 = arith.constant dense<0.000000e+00> : vector<8xf32>
    %264 = vector.multi_reduction <add>, %263, %cst_110 [1] : vector<8x128xf32> to vector<8xf32>
    %265 = vector.shape_cast %264 : vector<8xf32> to vector<8x1xf32>
    %cst_111 = arith.constant 3.125000e-02 : f32
    %266 = vector.broadcast %cst_111 : f32 to vector<8x1xf32>
    %267 = arith.mulf %262, %266 : vector<8x1xf32>
    %cst_112 = arith.constant 3.125000e-02 : f32
    %268 = vector.broadcast %cst_112 : f32 to vector<8x1xf32>
    %269 = arith.mulf %265, %268 : vector<8x1xf32>
    %270 = arith.mulf %267, %267 : vector<8x1xf32>
    %271 = arith.subf %269, %270 : vector<8x1xf32>
    %272 = vector.broadcast %267 : vector<8x1xf32> to vector<8x128xf32>
    %273 = arith.subf %256, %272 : vector<8x128xf32>
    %cst_113 = arith.constant 9.99999996E-13 : f32
    %274 = vector.broadcast %cst_113 : f32 to vector<8x1xf32>
    %275 = arith.addf %271, %274 : vector<8x1xf32>
    %276 = math.rsqrt %275 : vector<8x1xf32>
    %277 = vector.broadcast %276 : vector<8x1xf32> to vector<8x128xf32>
    %278 = arith.mulf %273, %277 : vector<8x128xf32>
    %279 = vector.broadcast %258 : vector<1x128xf32> to vector<8x128xf32>
    %280 = arith.mulf %278, %279 : vector<8x128xf32>
    %281 = vector.broadcast %260 : vector<1x128xf32> to vector<8x128xf32>
    %282 = arith.addf %280, %281 : vector<8x128xf32>
    %c1_114 = arith.constant 1 : index
    %c0_115 = arith.constant 0 : index
    %c0_116 = arith.constant 0 : index
    %283 = vector.load %arg11[%c1_114, %c0_115, %c0_116] : memref<2x128x128xf32, #tpu.memory_space<vmem>>, vector<1x128x128xf32>
    %284 = vector.shape_cast %283 : vector<1x128x128xf32> to vector<128x128xf32>
    %285 = arith.truncf %282 : vector<8x128xf32> to vector<8x128xbf16>
    %286 = arith.truncf %284 : vector<128x128xf32> to vector<128x128xbf16>
    %cst_117 = arith.constant dense<0.000000e+00> : vector<8x128xf32>
    %287 = tpu.matmul %285, %286, %cst_117 {dimension_numbers = #tpu.dot_dimension_numbers<[1], [0], [0], [1], [0, 0, 1, 1], [], []>} : vector<8x128xbf16>, vector<128x128xbf16>, vector<8x128xf32> -> vector<8x128xf32>
    %c1_118 = arith.constant 1 : index
    %c0_119 = arith.constant 0 : index
    %c0_120 = arith.constant 0 : index
    %288 = vector.load %arg12[%c1_118, %c0_119, %c0_120] : memref<2x1x128xf32, #tpu.memory_space<vmem>>, vector<1x1x128xf32>
    %289 = vector.shape_cast %288 : vector<1x1x128xf32> to vector<1x128xf32>
    %290 = vector.broadcast %289 : vector<1x128xf32> to vector<8x128xf32>
    %291 = arith.addf %287, %290 : vector<8x128xf32>
    %cst_121 = arith.constant 5.000000e-01 : f32
    %292 = vector.broadcast %cst_121 : f32 to vector<8x128xf32>
    %293 = arith.mulf %292, %291 : vector<8x128xf32>
    %cst_122 = arith.constant 4.471500e-02 : f32
    %294 = vector.broadcast %cst_122 : f32 to vector<8x128xf32>
    %295 = arith.mulf %294, %291 : vector<8x128xf32>
    %296 = arith.mulf %295, %291 : vector<8x128xf32>
    %297 = arith.mulf %296, %291 : vector<8x128xf32>
    %298 = arith.addf %291, %297 : vector<8x128xf32>
    %cst_123 = arith.constant 0.797884583 : f32
    %299 = vector.broadcast %cst_123 : f32 to vector<8x128xf32>
    %300 = arith.mulf %299, %298 : vector<8x128xf32>
    %301 = math.tanh %300 : vector<8x128xf32>
    %cst_124 = arith.constant 1.000000e+00 : f32
    %302 = vector.broadcast %cst_124 : f32 to vector<8x128xf32>
    %303 = arith.addf %302, %301 : vector<8x128xf32>
    %304 = arith.mulf %293, %303 : vector<8x128xf32>
    %c1_125 = arith.constant 1 : index
    %c0_126 = arith.constant 0 : index
    %c0_127 = arith.constant 0 : index
    %305 = vector.load %arg13[%c1_125, %c0_126, %c0_127] : memref<2x128x128xf32, #tpu.memory_space<vmem>>, vector<1x128x128xf32>
    %306 = vector.shape_cast %305 : vector<1x128x128xf32> to vector<128x128xf32>
    %307 = arith.truncf %304 : vector<8x128xf32> to vector<8x128xbf16>
    %308 = arith.truncf %306 : vector<128x128xf32> to vector<128x128xbf16>
    %cst_128 = arith.constant dense<0.000000e+00> : vector<8x128xf32>
    %309 = tpu.matmul %307, %308, %cst_128 {dimension_numbers = #tpu.dot_dimension_numbers<[1], [0], [0], [1], [0, 0, 1, 1], [], []>} : vector<8x128xbf16>, vector<128x128xbf16>, vector<8x128xf32> -> vector<8x128xf32>
    %c1_129 = arith.constant 1 : index
    %c0_130 = arith.constant 0 : index
    %c0_131 = arith.constant 0 : index
    %310 = vector.load %arg14[%c1_129, %c0_130, %c0_131] : memref<2x1x128xf32, #tpu.memory_space<vmem>>, vector<1x1x128xf32>
    %311 = vector.shape_cast %310 : vector<1x1x128xf32> to vector<1x128xf32>
    %312 = vector.broadcast %311 : vector<1x128xf32> to vector<8x128xf32>
    %313 = arith.addf %309, %312 : vector<8x128xf32>
    %314 = arith.addf %313, %282 : vector<8x128xf32>
    %c1_132 = arith.constant 1 : index
    %c0_133 = arith.constant 0 : index
    %c0_134 = arith.constant 0 : index
    %315 = vector.load %arg15[%c1_132, %c0_133, %c0_134] : memref<2x1x128xf32, #tpu.memory_space<vmem>>, vector<1x1x128xf32>
    %316 = vector.shape_cast %315 : vector<1x1x128xf32> to vector<1x128xf32>
    %c1_135 = arith.constant 1 : index
    %c0_136 = arith.constant 0 : index
    %c0_137 = arith.constant 0 : index
    %317 = vector.load %arg16[%c1_135, %c0_136, %c0_137] : memref<2x1x128xf32, #tpu.memory_space<vmem>>, vector<1x1x128xf32>
    %318 = vector.shape_cast %317 : vector<1x1x128xf32> to vector<1x128xf32>
    %cst_138 = arith.constant dense<0.000000e+00> : vector<8xf32>
    %319 = vector.multi_reduction <add>, %314, %cst_138 [1] : vector<8x128xf32> to vector<8xf32>
    %320 = vector.shape_cast %319 : vector<8xf32> to vector<8x1xf32>
    %321 = arith.mulf %314, %314 : vector<8x128xf32>
    %cst_139 = arith.constant dense<0.000000e+00> : vector<8xf32>
    %322 = vector.multi_reduction <add>, %321, %cst_139 [1] : vector<8x128xf32> to vector<8xf32>
    %323 = vector.shape_cast %322 : vector<8xf32> to vector<8x1xf32>
    %cst_140 = arith.constant 3.125000e-02 : f32
    %324 = vector.broadcast %cst_140 : f32 to vector<8x1xf32>
    %325 = arith.mulf %320, %324 : vector<8x1xf32>
    %cst_141 = arith.constant 3.125000e-02 : f32
    %326 = vector.broadcast %cst_141 : f32 to vector<8x1xf32>
    %327 = arith.mulf %323, %326 : vector<8x1xf32>
    %328 = arith.mulf %325, %325 : vector<8x1xf32>
    %329 = arith.subf %327, %328 : vector<8x1xf32>
    %330 = vector.broadcast %325 : vector<8x1xf32> to vector<8x128xf32>
    %331 = arith.subf %314, %330 : vector<8x128xf32>
    %cst_142 = arith.constant 9.99999996E-13 : f32
    %332 = vector.broadcast %cst_142 : f32 to vector<8x1xf32>
    %333 = arith.addf %329, %332 : vector<8x1xf32>
    %334 = math.rsqrt %333 : vector<8x1xf32>
    %335 = vector.broadcast %334 : vector<8x1xf32> to vector<8x128xf32>
    %336 = arith.mulf %331, %335 : vector<8x128xf32>
    %337 = vector.broadcast %316 : vector<1x128xf32> to vector<8x128xf32>
    %338 = arith.mulf %336, %337 : vector<8x128xf32>
    %339 = vector.broadcast %318 : vector<1x128xf32> to vector<8x128xf32>
    %340 = arith.addf %338, %339 : vector<8x128xf32>
    %341 = vector.extract_strided_slice %340 {offsets = [0, 0], sizes = [1, 128], strides = [1, 1]} : vector<8x128xf32> to vector<1x128xf32>
    %c0_143 = arith.constant 0 : index
    %c0_144 = arith.constant 0 : index
    %342 = vector.load %arg17[%c0_143, %c0_144] : memref<128x128xf32, #tpu.memory_space<vmem>>, vector<128x128xf32>
    %343 = arith.truncf %341 : vector<1x128xf32> to vector<1x128xbf16>
    %344 = arith.truncf %342 : vector<128x128xf32> to vector<128x128xbf16>
    %cst_145 = arith.constant dense<0.000000e+00> : vector<1x128xf32>
    %345 = tpu.matmul %343, %344, %cst_145 {dimension_numbers = #tpu.dot_dimension_numbers<[1], [0], [0], [1], [0, 0, 1, 1], [], []>} : vector<1x128xbf16>, vector<128x128xbf16>, vector<1x128xf32> -> vector<1x128xf32>
    %c0_146 = arith.constant 0 : index
    %c0_147 = arith.constant 0 : index
    %346 = vector.load %arg18[%c0_146, %c0_147] : memref<1x128xf32, #tpu.memory_space<vmem>>, vector<1x128xf32>
    %347 = arith.addf %345, %346 : vector<1x128xf32>
    %348 = math.tanh %347 : vector<1x128xf32>
    %c0_148 = arith.constant 0 : index
    %c0_149 = arith.constant 0 : index
    %349 = vector.load %arg19[%c0_148, %c0_149] : memref<128x128xf32, #tpu.memory_space<vmem>>, vector<128x128xf32>
    %350 = arith.truncf %348 : vector<1x128xf32> to vector<1x128xbf16>
    %351 = arith.truncf %349 : vector<128x128xf32> to vector<128x128xbf16>
    %cst_150 = arith.constant dense<0.000000e+00> : vector<1x128xf32>
    %352 = tpu.matmul %350, %351, %cst_150 {dimension_numbers = #tpu.dot_dimension_numbers<[1], [0], [0], [1], [0, 0, 1, 1], [], []>} : vector<1x128xbf16>, vector<128x128xbf16>, vector<1x128xf32> -> vector<1x128xf32>
    %c0_151 = arith.constant 0 : index
    %c0_152 = arith.constant 0 : index
    %353 = vector.load %arg20[%c0_151, %c0_152] : memref<1x128xf32, #tpu.memory_space<vmem>>, vector<1x128xf32>
    %354 = arith.addf %352, %353 : vector<1x128xf32>
    %355 = vector.shape_cast %354 : vector<1x128xf32> to vector<1x128xf32>
    %356 = vector.broadcast %355 : vector<1x128xf32> to vector<8x128xf32>
    %c0_153 = arith.constant 0 : index
    %c0_154 = arith.constant 0 : index
    %357 = vector.load %arg21[%c0_153, %c0_154] : memref<8x128xf32, #tpu.memory_space<vmem>>, vector<8x128xf32>
    tpu.vector_store %arg21[%c0_153, %c0_154], %356 {strides = array<i32>} : memref<8x128xf32, #tpu.memory_space<vmem>>, vector<8x128xf32>,
    return
  }
  func.func @transform_0(%arg0: i32) -> (i32, i32) {
    %c0_i32 = arith.constant 0 : i32
    %c0_i32_0 = arith.constant 0 : i32
    return %arg0, %c0_i32 : i32, i32
  }
  func.func @transform_1(%arg0: i32) -> (i32, i32, i32) {
    %c0_i32 = arith.constant 0 : i32
    %c0_i32_0 = arith.constant 0 : i32
    %c0_i32_1 = arith.constant 0 : i32
    return %arg0, %c0_i32, %c0_i32_0 : i32, i32, i32
  }
  func.func @transform_2(%arg0: i32) -> (i32, i32) {
    %c0_i32 = arith.constant 0 : i32
    %c0_i32_0 = arith.constant 0 : i32
    %c0_i32_1 = arith.constant 0 : i32
    return %c0_i32, %c0_i32_0 : i32, i32
  }
  func.func @transform_3(%arg0: i32) -> (i32, i32) {
    %c0_i32 = arith.constant 0 : i32
    %c0_i32_0 = arith.constant 0 : i32
    %c0_i32_1 = arith.constant 0 : i32
    return %c0_i32, %c0_i32_0 : i32, i32
  }
  func.func @transform_4(%arg0: i32) -> (i32, i32, i32) {
    %c0_i32 = arith.constant 0 : i32
    %c0_i32_0 = arith.constant 0 : i32
    %c0_i32_1 = arith.constant 0 : i32
    %c0_i32_2 = arith.constant 0 : i32
    return %c0_i32, %c0_i32_0, %c0_i32_1 : i32, i32, i32
  }
  func.func @transform_5(%arg0: i32) -> (i32, i32, i32) {
    %c0_i32 = arith.constant 0 : i32
    %c0_i32_0 = arith.constant 0 : i32
    %c0_i32_1 = arith.constant 0 : i32
    %c0_i32_2 = arith.constant 0 : i32
    return %c0_i32, %c0_i32_0, %c0_i32_1 : i32, i32, i32
  }
  func.func @transform_6(%arg0: i32) -> (i32, i32, i32) {
    %c0_i32 = arith.constant 0 : i32
    %c0_i32_0 = arith.constant 0 : i32
    %c0_i32_1 = arith.constant 0 : i32
    %c0_i32_2 = arith.constant 0 : i32
    return %c0_i32, %c0_i32_0, %c0_i32_1 : i32, i32, i32
  }
  func.func @transform_7(%arg0: i32) -> (i32, i32, i32) {
    %c0_i32 = arith.constant 0 : i32
    %c0_i32_0 = arith.constant 0 : i32
    %c0_i32_1 = arith.constant 0 : i32
    %c0_i32_2 = arith.constant 0 : i32
    return %c0_i32, %c0_i32_0, %c0_i32_1 : i32, i32, i32
  }
  func.func @transform_8(%arg0: i32) -> (i32, i32, i32) {
    %c0_i32 = arith.constant 0 : i32
    %c0_i32_0 = arith.constant 0 : i32
    %c0_i32_1 = arith.constant 0 : i32
    %c0_i32_2 = arith.constant 0 : i32
    return %c0_i32, %c0_i32_0, %c0_i32_1 : i32, i32, i32
  }
  func.func @transform_9(%arg0: i32) -> (i32, i32, i32) {
    %c0_i32 = arith.constant 0 : i32
    %c0_i32_0 = arith.constant 0 : i32
    %c0_i32_1 = arith.constant 0 : i32
    %c0_i32_2 = arith.constant 0 : i32
    return %c0_i32, %c0_i32_0, %c0_i32_1 : i32, i32, i32
  }
  func.func @transform_10(%arg0: i32) -> (i32, i32, i32) {
    %c0_i32 = arith.constant 0 : i32
    %c0_i32_0 = arith.constant 0 : i32
    %c0_i32_1 = arith.constant 0 : i32
    %c0_i32_2 = arith.constant 0 : i32
    return %c0_i32, %c0_i32_0, %c0_i32_1 : i32, i32, i32
  }
  func.func @transform_11(%arg0: i32) -> (i32, i32, i32) {
    %c0_i32 = arith.constant 0 : i32
    %c0_i32_0 = arith.constant 0 : i32
    %c0_i32_1 = arith.constant 0 : i32
    %c0_i32_2 = arith.constant 0 : i32
    return %c0_i32, %c0_i32_0, %c0_i32_1 : i32, i32, i32
  }
  func.func @transform_12(%arg0: i32) -> (i32, i32, i32) {
    %c0_i32 = arith.constant 0 : i32
    %c0_i32_0 = arith.constant 0 : i32
    %c0_i32_1 = arith.constant 0 : i32
    %c0_i32_2 = arith.constant 0 : i32
    return %c0_i32, %c0_i32_0, %c0_i32_1 : i32, i32, i32
  }
  func.func @transform_13(%arg0: i32) -> (i32, i32, i32) {
    %c0_i32 = arith.constant 0 : i32
    %c0_i32_0 = arith.constant 0 : i32
    %c0_i32_1 = arith.constant 0 : i32
    %c0_i32_2 = arith.constant 0 : i32
    return %c0_i32, %c0_i32_0, %c0_i32_1 : i32, i32, i32
  }
  func.func @transform_14(%arg0: i32) -> (i32, i32, i32) {
    %c0_i32 = arith.constant 0 : i32
    %c0_i32_0 = arith.constant 0 : i32
    %c0_i32_1 = arith.constant 0 : i32
    %c0_i32_2 = arith.constant 0 : i32
    return %c0_i32, %c0_i32_0, %c0_i32_1 : i32, i32, i32
  }
  func.func @transform_15(%arg0: i32) -> (i32, i32, i32) {
    %c0_i32 = arith.constant 0 : i32
    %c0_i32_0 = arith.constant 0 : i32
    %c0_i32_1 = arith.constant 0 : i32
    %c0_i32_2 = arith.constant 0 : i32
    return %c0_i32, %c0_i32_0, %c0_i32_1 : i32, i32, i32
  }
  func.func @transform_16(%arg0: i32) -> (i32, i32) {
    %c0_i32 = arith.constant 0 : i32
    %c0_i32_0 = arith.constant 0 : i32
    %c0_i32_1 = arith.constant 0 : i32
    return %c0_i32, %c0_i32_0 : i32, i32
  }
  func.func @transform_17(%arg0: i32) -> (i32, i32) {
    %c0_i32 = arith.constant 0 : i32
    %c0_i32_0 = arith.constant 0 : i32
    %c0_i32_1 = arith.constant 0 : i32
    return %c0_i32, %c0_i32_0 : i32, i32
  }
  func.func @transform_18(%arg0: i32) -> (i32, i32) {
    %c0_i32 = arith.constant 0 : i32
    %c0_i32_0 = arith.constant 0 : i32
    %c0_i32_1 = arith.constant 0 : i32
    return %c0_i32, %c0_i32_0 : i32, i32
  }
  func.func @transform_19(%arg0: i32) -> (i32, i32) {
    %c0_i32 = arith.constant 0 : i32
    %c0_i32_0 = arith.constant 0 : i32
    %c0_i32_1 = arith.constant 0 : i32
    return %c0_i32, %c0_i32_0 : i32, i32
  }
  func.func @transform_20(%arg0: i32) -> (i32, i32) {
    %c0_i32 = arith.constant 0 : i32
    %c0_i32_0 = arith.constant 0 : i32
    return %arg0, %c0_i32 : i32, i32
  }
}

</mosaic_0001>

<bundles_post_ra>
// kernel: tpu_custom_call.1
= control target key start
LH: loop header
LB: loop body
LE: loop exit
PB: predicated region body
PF: predicated region fallthrough
CT: control target
= control target key end

     0   :  { %s3449_s0 = inlined_call_operand.hbm [shape: f32[16,128], index: 0, kind: input, shape index: {}]   ;;  %s3450_s1 = inlined_call_operand.hbm [shape: f32[2,1,8], index: 1, kind: input, shape index: {}]   ;;  %s3451_s2 = inlined_call_operand.hbm [shape: f32[1,128], index: 2, kind: input, shape index: {}]   ;;  %s3452_s3 = inlined_call_operand.hbm [shape: f32[1,128], index: 3, kind: input, shape index: {}]   ;;  %s3453_s4 = inlined_call_operand.hbm [shape: f32[2,128,768], index: 4, kind: input, shape index: {}]   ;;  %s3454_s5 = inlined_call_operand.hbm [shape: f32[2,1,768], index: 5, kind: input, shape index: {}]   ;;  %s3455_s6 = inlined_call_operand.hbm [shape: f32[2,256,128], index: 6, kind: input, shape index: {}]   ;;  %s3456_s7 = inlined_call_operand.vmem [shape: f32[2,1,128], index: 7, kind: input, shape index: {}]   ;;  %s3457_s8 = inlined_call_operand.vmem [shape: f32[2,1,128], index: 8, kind: input, shape index: {}]   ;;  %s3458_s9 = inlined_call_operand.vmem [shape: f32[2,1,128], index: 9, kind: input, shape index: {}]   ;;  %s3459_s10 = inlined_call_operand.hbm [shape: f32[2,128,128], index: 10, kind: input, shape index: {}]   ;;  %s3460_s11 = inlined_call_operand.vmem [shape: f32[2,1,128], index: 11, kind: input, shape index: {}]   ;;  %s3461_s12 = inlined_call_operand.hbm [shape: f32[2,128,128], index: 12, kind: input, shape index: {}]   ;;  %s3462_s13 = inlined_call_operand.vmem [shape: f32[2,1,128], index: 13, kind: input, shape index: {}]   ;;  %s3463_s14 = inlined_call_operand.vmem [shape: f32[2,1,128], index: 14, kind: input, shape index: {}]   ;;  %s3464_s15 = inlined_call_operand.vmem [shape: f32[2,1,128], index: 15, kind: input, shape index: {}]   ;;  %s3465_s16 = inlined_call_operand.hbm [shape: f32[128,128], index: 16, kind: input, shape index: {}]   ;;  %s3466_s17 = inlined_call_operand.vmem [shape: f32[1,128], index: 17, kind: input, shape index: {}]   ;;  %s3467_s18 = inlined_call_operand.hbm [shape: f32[128,128], index: 18, kind: input, shape index: {}]   ;;  %s3468_s19 = inlined_call_operand.vmem [shape: f32[1,128], index: 19, kind: input, shape index: {}]   ;;  %s3469_s20 = inlined_call_operand.hbm [shape: f32[16,128], index: 20, kind: output, shape index: {}]  }
   0x1   :  { %3480 = sst [smem:[#allocation33_spill]] %s3449_s0 }
   0x2   :  { %3481 = sst [smem:[#allocation34_spill]] %s3450_s1 }
   0x3   :  { %3482 = sst [smem:[#allocation35_spill]] %s3451_s2 }
   0x4   :  { %3483 = sst [smem:[#allocation36_spill]] %s3452_s3 }
   0x5   :  { %3484 = sst [smem:[#allocation37_spill]] %s3453_s4 }
   0x6   :  { %3485 = sst [smem:[#allocation38_spill]] %s3454_s5 }
   0x7   :  { %3486 = sst [smem:[#allocation39_spill]] %s3455_s6 }
   0x8   :  { %3487 = sst [smem:[#allocation40_spill]] %s3459_s10 }
   0x9   :  { %3488 = sst [smem:[#allocation41_spill]] %s3461_s12 }
   0xa   :  { %3489 = sst [smem:[#allocation42_spill]] %s3462_s13 }
   0xb   :  { %3490 = sst [smem:[#allocation43_spill]] %s3463_s14 }
   0xc   :  { %3491 = sst [smem:[#allocation44_spill]] %s3464_s15 }
   0xd   :  { %3492 = sst [smem:[#allocation45_spill]] %s3465_s16 }
   0xe   :  { %3493 = sst [smem:[#allocation46_spill]] %s3466_s17 }
   0xf   :  { %3494 = sst [smem:[#allocation47_spill]] %s3467_s18 }
  0x10   :  { %3495 = sst [smem:[#allocation48_spill]] %s3468_s19 }
  0x11   :  { %3496 = sst [smem:[#allocation49_spill]] %s3469_s20 }
  0x12   :  { %25 = vsyncpa [#allocation3], 0 }
  0x13   :  { %27 = vsyncpa [#allocation3 + $0x1], 0 }
  0x14   :  { %28 = vsyncpa [#allocation6], 0 }
  0x15   :  { %30 = vsyncpa [#allocation6 + $0x1], 0 }
  0x16   :  { %31 = vsyncpa [#allocation9], 0 }
  0x17   :  { %32 = vsyncpa [#allocation12], 0 }
  0x18   :  { %33 = vsyncpa [#allocation15], 0 }
  0x19   :  { %34 = vsyncpa [#allocation18], 0 }
  0x1a   :  { %35 = vsyncpa [#allocation4], 0 }
  0x1b   :  { %37 = vsyncpa [#allocation4 + $0x1], 0  ;;  %s3079_s1 = smov 0   ;;  %s3081_s22 = smov 0  }
  0x1c   :  { %s3083_s23 = smov 0   ;;  %s3085_s24 = smov 0  }
  0x1d LB: > { %3497 = sst [smem:[#allocation29_spill]] %s2953_s23  ;;  %s3103_s27 = sadd.s32 4294967295, %s2957_s24   ;;  %s2957_s24 = sphi %s3085_s24, %s3527_s24   ;;  %s2953_s23 = sphi %s3083_s23, %s3529_s23   ;;  %s2949_s22 = sphi %s3081_s22, %s3531_s22   ;;  %s2945_s1 = sphi %s3079_s1, %s3530_s1  }
  0x1e   : > { %3498 = sst [smem:[#allocation30_spill]] %s2957_s24  ;;  %p2300_p0 = scmp.ge.s32.totalorder %s2957_s24, 1 }
  0x1f   : > { %s3499_s3 = sld [smem:[#allocation35_spill]]  ;;  %p64_p1 = scmp.eq.s32.totalorder %s3103_s27, 0 }
  0x20   : > { %p504_p2 = scmp.lt.s32.totalorder %s2957_s24, 3  ;;  %s2959_s4 = smov [#allocation7]  }
  0x21   : > { %s518_s29 = sshll.u32 %s2959_s4, 4  ;;  %s3501_s21 = sld [smem:[#allocation36_spill]]  ;;  %s519_s29 = int_to_ptr.vmem [resolvable:$true] %s518_s29 }
  0x22   : > { %p3108_p3 = pnand %p2300_p0, %p504_p2  ;;  %s3503_s5 = sld [smem:[#allocation38_spill]] }
  0x23   : > { %s2961_s30 = smov [#allocation11]   ;;  %s2963_s15 = smov 6  }
  0x24   : > { %p2382_p5 = pneg %p3108_p3  ;;  %s555_s0 = sshll.u32 %s2961_s30, 4  ;;  %s556_s0 = int_to_ptr.vmem [resolvable:$true] %s555_s0 }
  0x25   : > { %s516_s26 = sshll.u32 %s3499_s3, 4  ;;  %s2960_s3 = smov [#allocation8]   ;;  %s517_s26 = int_to_ptr.hbm [resolvable:$true] %s516_s26 }
  0x26   : > { %p3120_p6 = pnand %p2382_p5, %p64_p1  ;;  %s530_s19 = sshll.u32 %s2960_s3, 4  ;;  %s531_s19 = int_to_ptr.vmem [resolvable:$true] %s530_s19 }
  0x27   : > { %s528_s2 = sshll.u32 %s3501_s21, 4  ;;  %s2962_s21 = smov 96   ;;  %s529_s2 = int_to_ptr.hbm [resolvable:$true] %s528_s2 }
  0x28   : > { %s553_s17 = sshll.u32 %s3503_s5, 4  ;;  %s3504_s10 = sld [smem:[#allocation40_spill]]  ;;  %s554_s17 = int_to_ptr.hbm [resolvable:$true] %s553_s17 }
  0x29   : > { %2385 = dma.hbm_to_vmem [thread:$0]  (!%p3120_p6), %s517_s26, 16, %s519_s29, [#allocation6]  }
  0x2a   : > { %2388 = dma.hbm_to_vmem [thread:$0]  (!%p3120_p6), %s529_s2, 16, %s531_s19, [#allocation9]  }
  0x2b   : > { %2394 = dma.hbm_to_vmem [thread:$0]  (!%p3120_p6), %s554_s17, 192, %s556_s0, [#allocation12], %s2962_s21, %s2962_s21, %s2963_s15  }
  0x2c   : > { %s2964_s20 = smov [#allocation14]   ;;  %s3505_s16 = sld [smem:[#allocation45_spill]] }
  0x2d   : > { %s592_s4 = sshll.u32 %s2964_s20, 4  ;;  %s2965_s29 = smov 128   ;;  %s593_s4 = int_to_ptr.vmem [resolvable:$true] %s592_s4 }
  0x2e   : > { %s590_s13 = sshll.u32 %s3504_s10, 4  ;;  %s2966_s2 = smov 8   ;;  %s591_s13 = int_to_ptr.hbm [resolvable:$true] %s590_s13 }
  0x2f   : > { %2400 = dma.hbm_to_vmem [thread:$0]  (!%p3120_p6), %s591_s13, 4096, %s593_s4, [#allocation15], %s2965_s29, %s2965_s29, %s2966_s2  }
  0x30   : > { %s3506_s17 = sld [smem:[#allocation37_spill]]  ;;  %s2967_s0 = smov [#allocation17]  }
  0x31   : > { %s632_s21 = sshll.u32 %s2967_s0, 4  ;;  %s2968_s5 = smov [#allocation10]   ;;  %s633_s21 = int_to_ptr.vmem [resolvable:$true] %s632_s21 }
  0x32   : > { %s630_s19 = sshll.u32 %s3505_s16, 4  ;;  %s541_s3 = sshll.u32 %s2968_s5, 4  ;;  %s631_s19 = int_to_ptr.hbm [resolvable:$true] %s630_s19  ;;  %s542_s3 = int_to_ptr.vmem [resolvable:$true] %s541_s3 }
  0x33   : > { %2406 = dma.hbm_to_vmem [thread:$0]  (!%p3120_p6), %s631_s19, 2048, %s633_s21, [#allocation18], %s2965_s29, %s2965_s29, %s2966_s2  }
  0x34   : > { %s2969_s20 = smov 768   ;;  %s2970_s13 = smov 48  }
  0x35   : > { %s3507_s6 = sld [smem:[#allocation39_spill]]  ;;  %s2971_s15 = smov [#allocation13]  }
  0x36   : > { %s539_s30 = sshll.u32 %s3506_s17, 4  ;;  %s569_s17 = sshll.u32 %s2971_s15, 4  ;;  %s540_s30 = int_to_ptr.hbm [resolvable:$true] %s539_s30  ;;  %s570_s17 = int_to_ptr.vmem [resolvable:$true] %s569_s17 }
  0x37   : > { %2391 = dma.hbm_to_vmem [thread:$0]  (!%p3120_p6), %s540_s30, 24576, %s542_s3, [#allocation9], %s2969_s20, %s2969_s20, %s2970_s13  }
  0x38   : > { %s3508_s12 = sld [smem:[#allocation41_spill]]  ;;  %s2972_s30 = smov [#allocation16]  }
  0x39   : > { %s609_s5 = sshll.u32 %s2972_s30, 4  ;;  %s3509_s18 = sld [smem:[#allocation47_spill]]  ;;  %s610_s5 = int_to_ptr.vmem [resolvable:$true] %s609_s5 }
  0x3a   : > { %s2973_s4 = smov [#allocation19]   ;;  %s3180_s15 = sadd.s32 1, %s2957_s24  }
  0x3b   : > { %s567_s14 = sshll.u32 %s3507_s6, 4  ;;  %s649_s26 = sshll.u32 %s2973_s4, 4  ;;  %s568_s14 = int_to_ptr.hbm [resolvable:$true] %s567_s14  ;;  %s650_s26 = int_to_ptr.vmem [resolvable:$true] %s649_s26 }
  0x3c   : > { %2397 = dma.hbm_to_vmem [thread:$0]  (!%p3120_p6), %s568_s14, 8192, %s570_s17, [#allocation12], %s2965_s29, %s2965_s29, %s2966_s2  }
  0x3d   : > { %s2299_s14 = sadd.s32 4294967294, %s2957_s24   ;;  %3510 = sst [smem:[#allocation31_spill]] %s3180_s15 }
  0x3e   : > { %s607_s21 = sshll.u32 %s3508_s12, 4  ;;  %s50_s17 = sadd.s32 1, %s2953_s23  ;;  %s608_s21 = int_to_ptr.hbm [resolvable:$true] %s607_s21 }
  0x3f   : > { %s647_s13 = sshll.u32 %s3509_s18, 4  ;;  %s47_s19 = ssub.s32 %s2957_s24, %s3180_s15  ;;  %s648_s13 = int_to_ptr.hbm [resolvable:$true] %s647_s13 }
  0x40   : > { %2403 = dma.hbm_to_vmem [thread:$0]  (!%p3120_p6), %s608_s21, 4096, %s610_s5, [#allocation15], %s2965_s29, %s2965_s29, %s2966_s2  }
  0x41   : > { %2409 = dma.hbm_to_vmem [thread:$0]  (!%p3120_p6), %s648_s13, 2048, %s650_s26, [#allocation18], %s2965_s29, %s2965_s29, %s2966_s2  }
  0x42   : > { %p57_p7 = scmp.ne.s32.totalorder %s2953_s23, %s2949_s22  ;;  %p48_p8 = scmp.eq.s32.totalorder %s47_s19, 0 }
  0x43   : > { %p58_p9 = scmp.eq.s32.totalorder %s2957_s24, 0  ;;  %p63_p10 = scmp.ne.s32.totalorder %s2949_s22, %s2945_s1 }
  0x44   : > { %p491_p11 = scmp.eq.s32.totalorder %s3103_s27, 1  ;;  %p497_p2 = scmp.eq.s32.totalorder %s2299_s14, 1 }
  0x45   : > { %s3192_s0 = scalar_select %p48_p8, %s2953_s23, %s50_s17  }
  0x46   : > { %p3194_p12 = por %p58_p9, %p57_p7  ;;  %p3200_p13 = por %p64_p1, %p63_p10 }
  0x47   : > { %3511 = sst [smem:[#allocation32_spill]] %s3192_s0  ;;  %p3204_p0 = por %p491_p11, %p57_p7 }
  0x48   : > { %p2430_p5 = scmp.lt.s32.totalorder %s2957_s24, 2  ;;  %s3210_s21 = sand.u32 1, %s2953_s23  }
  0x49   : > { %p3212_p6 = por %p497_p2, %p63_p10  ;;  %s2311_s5 = sshll.u32 %s3210_s21, 3 }
  0x4a   : > { %s2312_s3 = sshll.u32 %s2957_s24, 3  ;;  %s3516_s4 = sld [smem:[#allocation33_spill]] }
  0x4b   : > { %s670_s19 = scalar_lea.vmem [#allocation2], %s2311_s5  ;;  %p3223_p7 = pnand %p2430_p5, %p3194_p12 }
  0x4c   : > { %s678_s6 = sshll.u32 %s670_s19, 4  ;;  %s685_s10 = sand.u32 1, %s2957_s24   ;;  %s679_s6 = int_to_ptr.vmem [resolvable:$true] %s678_s6 }
  0x4d   : > { %s3518_s18 = sld [smem:[#allocation34_spill]]  ;;  %s667_s23 = scalar_lea.sflag [#allocation3], %s3210_s21 }
  0x4e   : > { %p2811_p9 = pneg %p3223_p7 }
  0x50   : > { %s674_s26 = scalar_lea.hbm %s3516_s4, %s2312_s3  ;;  %s2814_s13 = scalar_lea.hbm %s3516_s4, 16 }
  0x51   : > { %s676_s17 = sshll.u32 %s674_s26, 4  ;;  %s677_s17 = int_to_ptr.hbm [resolvable:$true] %s676_s17 }
  0x52   : > { %s2807_s20 = sshra.s32 %s677_s17, 4  ;;  %s2808_s20 = int_to_ptr.hbm [resolvable:$true] %s2807_s20 }
  0x53   : > { %s691_s0 = scalar_lea.hbm %s3518_s18, %s2957_s24  ;;  %s2809_s3 = scalar_lea.hbm %s2808_s20, 8 }
  0x54   : > { %p2810_p8 = scmp.ne.s32.totalorder %s2808_s20, %s2809_s3  ;;  %p2815_p12 = scmp.lt.s32.totalorder %s2808_s20, %s3516_s4 }
  0x55   : > { %p2816_p2 = scmp.lt.s32.totalorder %s2814_s13, %s2809_s3 }
  0x56   : > { %p2812_p10 = pnand %p2811_p9, %p2810_p8 }
  0x57   : > { %p2817_p5 = por %p2816_p2, %p2815_p12 }
  0x58   : > { %p2813_p11 = pneg %p2812_p10 }
  0x5a   : > { %p2818_p4 = pnand %p2817_p5, %p2813_p11 }
  0x5c   : > { %2821 = shalt.err (!%p2818_p4)
}
  0x5d   : > { %2413 = dma.hbm_to_vmem [thread:$0]  (!%p3223_p7), %s677_s17, 128, %s679_s6, %s667_s23  }
  0x5e   : > { %s693_s12 = sshll.u32 %s691_s0, 4  ;;  %s688_s16 = scalar_lea.vmem [#allocation5], %s3210_s21  ;;  %s694_s12 = int_to_ptr.hbm [resolvable:$true] %s693_s12 }
  0x5f   : > { %s695_s15 = sshll.u32 %s688_s16, 4  ;;  %s686_s25 = scalar_lea.sflag [#allocation6], %s685_s10  ;;  %s696_s15 = int_to_ptr.vmem [resolvable:$true] %s695_s15 }
  0x60   : > { %s2837_s5 = sshra.s32 %s694_s12, 4  ;;  %s2844_s13 = scalar_lea.hbm %s3518_s18, 2  ;;  %s2838_s5 = int_to_ptr.hbm [resolvable:$true] %s2837_s5 }
  0x61   : > { %s2839_s24 = scalar_lea.hbm %s2838_s5, 1  ;;  %p2845_p4 = scmp.lt.s32.totalorder %s2838_s5, %s3518_s18 }
  0x62   : > { %p2840_p8 = scmp.ne.s32.totalorder %s2838_s5, %s2839_s24  ;;  %p2846_p12 = scmp.lt.s32.totalorder %s2844_s13, %s2839_s24 }
  0x64   : > { %p2842_p10 = pnand %p2840_p8, %p2811_p9  ;;  %p2847_p2 = por %p2846_p12, %p2845_p4 }
  0x66   : > { %p2843_p11 = pneg %p2842_p10 }
  0x68   : > { %p2848_p5 = pnand %p2847_p2, %p2843_p11 }
  0x6a   : > { %2851 = shalt.err (!%p2848_p5)
}
  0x6b   : > { %2416 = dma.hbm_to_vmem [thread:$0]  (!%p3223_p7), %s694_s12, 16, %s696_s15, %s686_s25  }
  0x6c   : > { %704 = sbr.rel (%p3108_p3) target bundleno = 3363 (0xd23), region = 100  ;;  %s3261_s10 = sand.u32 (!%p3108_p3), 1, %s2949_s22  }
  0x6d   : > { %s2314_s23 = sshll.u32 (!%p3108_p3), %s3261_s10, 3  ;;  %s707_s0 = scalar_lea.sflag (!%p3108_p3), [#allocation3], %s3261_s10 }
  0x6e   : > { %s710_s24 = scalar_lea.vmem (!%p3108_p3), [#allocation2], %s2314_s23 }
  0x71   : > { %2912 = dma.done.wait (%p3200_p13), %s707_s0, 128  }
  0x72   : > { %2914 = vsyncadd (%p3200_p13), %s707_s0, 4294967168  ;;  %s716_s28 = sand.u32 1, %s3103_s27   ;;  %s719_s21 = scalar_lea.vmem [#allocation5], %s3261_s10 }
  0x73   : > { %s717_s15 = scalar_lea.sflag [#allocation6], %s716_s28 }
  0x74   : > { %2916 = dma.done.wait (%p3200_p13), %s717_s15, 16  }
  0x75   : > { %2918 = vsyncadd (%p3200_p13), %s717_s15, 4294967280 }
  0x76   : > { %2920 = dma.done.wait (%p64_p1), [#allocation6], 16  }
  0x77   : > { %2922 = vsyncadd (%p64_p1), [#allocation6], 4294967280 }
  0x78   : > { %2924 = dma.done.wait (%p64_p1), [#allocation9], 24592  }
  0x79   : > { %2926 = vsyncadd (%p64_p1), [#allocation9], 4294942704 }
  0x7a   : > { %2928 = dma.done.wait (%p64_p1), [#allocation12], 8384  }
  0x7b   : > { %2930 = vsyncadd (%p64_p1), [#allocation12], 4294958912 }
  0x7c   : > { %2932 = dma.done.wait (%p64_p1), [#allocation15], 8192  }
  0x7d   : > { %2934 = vsyncadd (%p64_p1), [#allocation15], 4294959104 }
  0x7e   : > { %2936 = dma.done.wait (%p64_p1), [#allocation18], 4096  }
  0x7f   : > { %2938 = vsyncadd (%p64_p1), [#allocation18], 4294963200  ;;  %v3297_v0 = vld [vmem:[%s710_s24] sm:$0xff]  ;;  %v945_v1 = vld [vmem:[#allocation10 + $0x2a0] sm:$0xff]  ;;  %vm1167_vm3 = vcmask 1043456   ;;  %vm1150_vm4 = vcmask 64512  }
  0x80   : > { %v951_v2 = vld [vmem:[#allocation10 + $0x2d0] sm:$0xff]  ;;  %831 = vadd.xlane.f32.xlu0 %v3297_v0  ;;  %v946_v4 = vld [vmem:[#allocation10 + $0x2a8] sm:$0xff]  ;;  %v952_v5 = vld [vmem:[#allocation10 + $0x2d8] sm:$0xff]  ;;  %v833_v7 = vmul.f32 %v3297_v0, %v3297_v0  ;;  %s3519_s13 = sld [smem:[#allocation42_spill]]  ;;  %s2337_s17 = sshll.u32 %s3103_s27, 3 }
  0x81   : > { %v1000_v3 = vpack.c.bf16 %v951_v2, %v945_v1  ;;  %v1001_v6 = vpack.c.bf16 %v952_v5, %v946_v4  ;;  %v933_v8 = vld [vmem:[#allocation10 + $0x240] sm:$0xff]  ;;  %v939_v9 = vld [vmem:[#allocation10 + $0x270] sm:$0xff]  ;;  %v934_v10 = vld [vmem:[#allocation10 + $0x248] sm:$0xff]  ;;  %s3520_s0 = sld [smem:[#allocation43_spill]]  ;;  %s825_s3 = scalar_lea.vmem [#allocation20], %s2314_s23 }
  0x82   : > { %v994_v11 = vpack.c.bf16 %v939_v9, %v933_v8  ;;  %v940_v12 = vld [vmem:[#allocation10 + $0x278] sm:$0xff]  ;;  %v921_v14 = vld [vmem:[#allocation10 + $0x1e0] sm:$0xff]  ;;  %v927_v15 = vld [vmem:[#allocation10 + $0x210] sm:$0xff]  ;;  %s3521_s15 = sld [smem:[#allocation44_spill]]  ;;  %s2122_s26 = sshll.u32 %s825_s3, 4  ;;  %s2123_s26 = int_to_ptr.vmem [resolvable:$true] %s2122_s26 }
  0x83   : > { %1020 = vmatpush.bf16.msra.mxu0 %v1000_v3  ;;  %1033 = vmatpush.bf16.msra.mxu1 %v1001_v6  ;;  %v995_v13 = vpack.c.bf16 %v940_v12, %v934_v10  ;;  %v922_v16 = vld [vmem:[#allocation10 + $0x1e8] sm:$0xff]  ;;  %v988_v17 = vpack.c.bf16 %v927_v15, %v921_v14  ;;  %v928_v18 = vld [vmem:[#allocation10 + $0x218] sm:$0xff]  ;;  %v909_v20 = vld [vmem:[#allocation10 + $0x180] sm:$0xff]  ;;  %s3522_s29 = sld [smem:[#allocation46_spill]]  ;;  %s2110_s27 = scalar_lea.sflag [#allocation4], %s3261_s10 }
  0x84   : > { %v989_v19 = vpack.c.bf16 %v928_v18, %v922_v16  ;;  %v915_v21 = vld [vmem:[#allocation10 + $0x1b0] sm:$0xff]  ;;  %v910_v22 = vld [vmem:[#allocation10 + $0x188] sm:$0xff]  ;;  %v916_v24 = vld [vmem:[#allocation10 + $0x1b8] sm:$0xff]  ;;  %s3523_s12 = sld [smem:[#allocation49_spill]] }
  0x85   : > { %v982_v23 = vpack.c.bf16 %v915_v21, %v909_v20  ;;  %v947_v25 = vld [vmem:[#allocation10 + $0x2b0] sm:$0xff]  ;;  %v953_v26 = vld [vmem:[#allocation10 + $0x2e0] sm:$0xff]  ;;  %v983_v27 = vpack.c.bf16 %v916_v24, %v910_v22  ;;  %v948_v29 = vld [vmem:[#allocation10 + $0x2b8] sm:$0xff]  ;;  %s3524_s20 = sld [smem:[#allocation48_spill]] }
  0x86   : > { %v1002_v28 = vpack.c.bf16 %v953_v26, %v947_v25  ;;  %v954_v30 = vld [vmem:[#allocation10 + $0x2e8] sm:$0xff]  ;;  %v897_v32 = vld [vmem:[#allocation10 + $0x120] sm:$0xff]  ;;  %v903_v33 = vld [vmem:[#allocation10 + $0x150] sm:$0xff] }
  0x87   : > { %1021 = vmatpush.bf16.msra.mxu0 %v994_v11  ;;  %1034 = vmatpush.bf16.msra.mxu1 %v995_v13  ;;  %v1003_v31 = vpack.c.bf16 %v954_v30, %v948_v29  ;;  %v898_v34 = vld [vmem:[#allocation10 + $0x128] sm:$0xff]  ;;  %v976_v35 = vpack.c.bf16 %v903_v33, %v897_v32  ;;  %v904_v36 = vld [vmem:[#allocation10 + $0x158] sm:$0xff]  ;;  %v935_v37 = vld [vmem:[#allocation10 + $0x250] sm:$0xff] }
  0x88   : > { %834 = vadd.xlane.f32.xlu0 %v833_v7  ;;  %1046 = vmatpush.bf16.msra.mxu2 %v1002_v28  ;;  %v941_v38 = vld [vmem:[#allocation10 + $0x280] sm:$0xff]  ;;  %v977_v39 = vpack.c.bf16 %v904_v36, %v898_v34  ;;  %v936_v41 = vld [vmem:[#allocation10 + $0x258] sm:$0xff]  ;;  %v942_v42 = vld [vmem:[#allocation10 + $0x288] sm:$0xff] }
  0x89   : > { %1059 = vmatpush.bf16.msra.mxu3 %v1003_v31  ;;  %v996_v40 = vpack.c.bf16 %v941_v38, %v935_v37  ;;  %v997_v43 = vpack.c.bf16 %v942_v42, %v936_v41  ;;  %v885_v44 = vld [vmem:[#allocation10 + $0xc0] sm:$0xff]  ;;  %v891_v45 = vld [vmem:[#allocation10 + $0xf0] sm:$0xff]  ;;  %v886_v46 = vld [vmem:[#allocation10 + $0xc8] sm:$0xff] }
  0x8a   : > { %v970_v47 = vpack.c.bf16 %v891_v45, %v885_v44  ;;  %v892_v48 = vld [vmem:[#allocation10 + $0xf8] sm:$0xff]  ;;  %v923_v49 = vld [vmem:[#allocation10 + $0x1f0] sm:$0xff]  ;;  %v929_v50 = vld [vmem:[#allocation10 + $0x220] sm:$0xff]  ;;  %s2120_s16 = scalar_lea.hbm %s3523_s12, %s2337_s17  ;;  %s2887_s17 = scalar_lea.hbm %s3523_s12, 16 }
  0x8b   : > { %1022 = vmatpush.bf16.msra.mxu0 %v988_v17  ;;  %1035 = vmatpush.bf16.msra.mxu1 %v989_v19  ;;  %v971_v51 = vpack.c.bf16 %v892_v48, %v886_v46  ;;  %v990_v52 = vpack.c.bf16 %v929_v50, %v923_v49  ;;  %v924_v53 = vld [vmem:[#allocation10 + $0x1f8] sm:$0xff]  ;;  %v930_v54 = vld [vmem:[#allocation10 + $0x228] sm:$0xff]  ;;  %v873_v56 = vld [vmem:[#allocation10 + $0x60] sm:$0xff]  ;;  %s2124_s6 = sshll.u32 %s2120_s16, 4  ;;  %s2125_s6 = int_to_ptr.hbm [resolvable:$true] %s2124_s6 }
  0x8c   : > { %1047 = vmatpush.bf16.msra.mxu2 %v996_v40  ;;  %v991_v55 = vpack.c.bf16 %v930_v54, %v924_v53  ;;  %v879_v57 = vld [vmem:[#allocation10 + $0x90] sm:$0xff]  ;;  %v874_v58 = vld [vmem:[#allocation10 + $0x68] sm:$0xff]  ;;  %v880_v60 = vld [vmem:[#allocation10 + $0x98] sm:$0xff]  ;;  %s2881_s24 = sshra.s32 %s2125_s6, 4  ;;  %s2882_s24 = int_to_ptr.hbm [resolvable:$true] %s2881_s24 }
  0x8d   : > { %1060 = vmatpush.bf16.msra.mxu3 %v997_v43  ;;  %v964_v59 = vpack.c.bf16 %v879_v57, %v873_v56  ;;  %v911_v61 = vld [vmem:[#allocation10 + $0x190] sm:$0xff]  ;;  %v917_v62 = vld [vmem:[#allocation10 + $0x1c0] sm:$0xff]  ;;  %v965_v63 = vpack.c.bf16 %v880_v60, %v874_v58  ;;  %v912_v2 = vld [vmem:[#allocation10 + $0x198] sm:$0xff]  ;;  %s2883_s28 = scalar_lea.hbm %s2882_s24, 8  ;;  %p2888_p7 = scmp.lt.s32.totalorder %s2882_s24, %s3523_s12 }
  0x8e   : > { %v984_v1 = vpack.c.bf16 %v917_v62, %v911_v61  ;;  %v918_v3 = vld [vmem:[#allocation10 + $0x1c8] sm:$0xff]  ;;  %v861_v5 = vld [vmem:[#allocation10] sm:$0xff]  ;;  %v867_v6 = vld [vmem:[#allocation10 + $0x30] sm:$0xff]  ;;  %p2884_p1 = scmp.ne.s32.totalorder %s2882_s24, %s2883_s28  ;;  %p2889_p9 = scmp.lt.s32.totalorder %s2887_s17, %s2883_s28 }
  0x8f   : > { %1023 = vmatpush.bf16.msra.mxu0 %v982_v23  ;;  %1036 = vmatpush.bf16.msra.mxu1 %v983_v27  ;;  %v985_v4 = vpack.c.bf16 %v918_v3, %v912_v2  ;;  %v862_v7 = vld [vmem:[#allocation10 + $0x8] sm:$0xff]  ;;  %v958_v8 = vpack.c.bf16 %v867_v6, %v861_v5  ;;  %v868_v9 = vld [vmem:[#allocation10 + $0x38] sm:$0xff]  ;;  %v899_v10 = vld [vmem:[#allocation10 + $0x130] sm:$0xff] }
  0x90   : > { %1048 = vmatpush.bf16.msra.mxu2 %v990_v52  ;;  %v905_v11 = vld [vmem:[#allocation10 + $0x160] sm:$0xff]  ;;  %v959_v12 = vpack.c.bf16 %v868_v9, %v862_v7  ;;  %v900_v14 = vld [vmem:[#allocation10 + $0x138] sm:$0xff]  ;;  %v906_v15 = vld [vmem:[#allocation10 + $0x168] sm:$0xff]  ;;  %p2885_p3 = pnand %p2884_p1, %p3204_p0  ;;  %p2890_p8 = por %p2889_p9, %p2888_p7 }
  0x91   : > { %1061 = vmatpush.bf16.msra.mxu3 %v991_v55  ;;  %v978_v13 = vpack.c.bf16 %v905_v11, %v899_v10  ;;  %v949_v16 = vld [vmem:[#allocation10 + $0x2c0] sm:$0xff]  ;;  %v979_v17 = vpack.c.bf16 %v906_v15, %v900_v14  ;;  %v955_v18 = vld [vmem:[#allocation10 + $0x2f0] sm:$0xff]  ;;  %v950_v19 = vld [vmem:[#allocation10 + $0x2c8] sm:$0xff] }
  0x92   : > { %v956_v20 = vld [vmem:[#allocation10 + $0x2f8] sm:$0xff]  ;;  %v1004_v21 = vpack.c.bf16 %v955_v18, %v949_v16  ;;  %v887_v23 = vld [vmem:[#allocation10 + $0xd0] sm:$0xff]  ;;  %v893_v24 = vld [vmem:[#allocation10 + $0x100] sm:$0xff]  ;;  %p2886_p13 = pneg %p2885_p3 }
  0x93   : > { %1024 = vmatpush.bf16.msra.mxu0 %v976_v35  ;;  %1037 = vmatpush.bf16.msra.mxu1 %v977_v39  ;;  %v1005_v22 = vpack.c.bf16 %v956_v20, %v950_v19  ;;  %v888_v25 = vld [vmem:[#allocation10 + $0xd8] sm:$0xff]  ;;  %v972_v26 = vpack.c.bf16 %v893_v24, %v887_v23  ;;  %v894_v27 = vld [vmem:[#allocation10 + $0x108] sm:$0xff]  ;;  %v937_v28 = vld [vmem:[#allocation10 + $0x260] sm:$0xff] }
  0x94   : > { %1049 = vmatpush.bf16.msra.mxu2 %v984_v1  ;;  %v943_v29 = vld [vmem:[#allocation10 + $0x290] sm:$0xff]  ;;  %v973_v30 = vpack.c.bf16 %v894_v27, %v888_v25  ;;  %v938_v32 = vld [vmem:[#allocation10 + $0x268] sm:$0xff]  ;;  %v944_v33 = vld [vmem:[#allocation10 + $0x298] sm:$0xff]  ;;  %p2891_p10 = pnand %p2890_p8, %p2886_p13 }
  0x95   : > { %1062 = vmatpush.bf16.msra.mxu3 %v985_v4  ;;  %v998_v31 = vpack.c.bf16 %v943_v29, %v937_v28  ;;  %v999_v34 = vpack.c.bf16 %v944_v33, %v938_v32  ;;  %v875_v35 = vld [vmem:[#allocation10 + $0x70] sm:$0xff]  ;;  %v881_v36 = vld [vmem:[#allocation10 + $0xa0] sm:$0xff]  ;;  %v876_v37 = vld [vmem:[#allocation10 + $0x78] sm:$0xff] }
  0x96   : > { %v966_v39 = vpack.c.bf16 %v881_v36, %v875_v35  ;;  %v882_v40 = vld [vmem:[#allocation10 + $0xa8] sm:$0xff]  ;;  %v925_v41 = vld [vmem:[#allocation10 + $0x200] sm:$0xff]  ;;  %v931_v42 = vld [vmem:[#allocation10 + $0x230] sm:$0xff] }
  0x97   : > { %1025 = vmatpush.bf16.msra.mxu0 %v970_v47  ;;  %1038 = vmatpush.bf16.msra.mxu1 %v971_v51  ;;  %v967_v43 = vpack.c.bf16 %v882_v40, %v876_v37  ;;  %v992_v44 = vpack.c.bf16 %v931_v42, %v925_v41  ;;  %v926_v45 = vld [vmem:[#allocation10 + $0x208] sm:$0xff]  ;;  %v932_v46 = vld [vmem:[#allocation10 + $0x238] sm:$0xff]  ;;  %v863_v48 = vld [vmem:[#allocation10 + $0x10] sm:$0xff] }
  0x98   : > { %1050 = vmatpush.bf16.msra.mxu2 %v978_v13  ;;  %v993_v47 = vpack.c.bf16 %v932_v46, %v926_v45  ;;  %v869_v49 = vld [vmem:[#allocation10 + $0x40] sm:$0xff]  ;;  %v864_v50 = vld [vmem:[#allocation10 + $0x18] sm:$0xff]  ;;  %v870_v52 = vld [vmem:[#allocation10 + $0x48] sm:$0xff] }
  0x99   : > { %1063 = vmatpush.bf16.msra.mxu3 %v979_v17  ;;  %v960_v51 = vpack.c.bf16 %v869_v49, %v863_v48  ;;  %v913_v53 = vld [vmem:[#allocation10 + $0x1a0] sm:$0xff]  ;;  %v919_v54 = vld [vmem:[#allocation10 + $0x1d0] sm:$0xff]  ;;  %v961_v56 = vpack.c.bf16 %v870_v52, %v864_v50  ;;  %v914_v58 = vld [vmem:[#allocation10 + $0x1a8] sm:$0xff] }
  0x9a   : > { %v986_v57 = vpack.c.bf16 %v919_v54, %v913_v53  ;;  %v901_v62 = vld [vmem:[#allocation10 + $0x140] sm:$0xff]  ;;  %v902_v1 = vld [vmem:[#allocation10 + $0x148] sm:$0xff]  ;;  %v908_v5 = vld [vmem:[#allocation10 + $0x178] sm:$0xff] }
  0x9b   : > { %1026 = vmatpush.bf16.msra.mxu0 %v964_v59  ;;  %1039 = vmatpush.bf16.msra.mxu1 %v965_v63  ;;  %v920_v59 = vld [vmem:[#allocation10 + $0x1d8] sm:$0xff]  ;;  %v907_v63 = vld [vmem:[#allocation10 + $0x170] sm:$0xff]  ;;  %v981_v6 = vpack.c.bf16 %v908_v5, %v902_v1  ;;  %v889_v7 = vld [vmem:[#allocation10 + $0xe0] sm:$0xff] }
  0x9c   : > { %1051 = vmatpush.bf16.msra.mxu2 %v972_v26  ;;  %v987_v60 = vpack.c.bf16 %v920_v59, %v914_v58  ;;  %v980_v4 = vpack.c.bf16 %v907_v63, %v901_v62  ;;  %v890_v9 = vld [vmem:[#allocation10 + $0xe8] sm:$0xff]  ;;  %v896_v11 = vld [vmem:[#allocation10 + $0x118] sm:$0xff]  ;;  %v877_v14 = vld [vmem:[#allocation10 + $0x80] sm:$0xff] }
  0x9d   : > { %1064 = vmatpush.bf16.msra.mxu3 %v973_v30  ;;  %v975_v13 = vpack.c.bf16 %v896_v11, %v890_v9  ;;  %v883_v16 = vld [vmem:[#allocation10 + $0xb0] sm:$0xff]  ;;  %v878_v17 = vld [vmem:[#allocation10 + $0x88] sm:$0xff]  ;;  %v884_v18 = vld [vmem:[#allocation10 + $0xb8] sm:$0xff] }
  0x9e   : > { %v968_v19 = vpack.c.bf16 %v883_v16, %v877_v14  ;;  %v969_v20 = vpack.c.bf16 %v884_v18, %v878_v17  ;;  %v866_v23 = vld [vmem:[#allocation10 + $0x28] sm:$0xff]  ;;  %v872_v24 = vld [vmem:[#allocation10 + $0x58] sm:$0xff]  ;;  %v1006_v41 = vld [vmem:[#allocation11] sm:$0x3f] }
  0x9f   : > { %1027 = vmatpush.bf16.msra.mxu0 %v958_v8  ;;  %1040 = vmatpush.bf16.msra.mxu1 %v959_v12  ;;  %v895_v8 = vld [vmem:[#allocation10 + $0x110] sm:$0xff]  ;;  %v963_v26 = vpack.c.bf16 %v872_v24, %v866_v23  ;;  %v2489_v36 = vld [vmem:[#allocation8] ss:$0 sm:$0xff]  ;;  %v1009_v42 = vperm.slane %v1006_v41, 1  ;;  %v1008_v45 = vperm.slane %v1006_v41, 0  ;;  %v1013_v58 = vperm.slane %v1006_v41, 5 }
  0xa0   : > { %1052 = vmatpush.bf16.msra.mxu2 %v966_v39  ;;  %v974_v12 = vpack.c.bf16 %v895_v8, %v889_v7 }
  0xa1   : > { %1065 = vmatpush.bf16.msra.mxu3 %v967_v43 }
  0xa3   : > { %1072 = vmatpush.bf16.msrb.mxu0 %v1004_v21  ;;  %1085 = vmatpush.bf16.msrb.mxu1 %v1005_v22  ;;  %v865_v21 = vld [vmem:[#allocation10 + $0x20] sm:$0xff]  ;;  %v871_v22 = vld [vmem:[#allocation10 + $0x50] sm:$0xff] }
  0xa4   : > { %1053 = vmatpush.bf16.msra.mxu2 %v960_v51  ;;  %v962_v25 = vpack.c.bf16 %v871_v22, %v865_v21 }
  0xa5   : > { %1066 = vmatpush.bf16.msra.mxu3 %v961_v56 }
  0xa7   : > { %1073 = vmatpush.bf16.msrb.mxu0 %v998_v31  ;;  %1086 = vmatpush.bf16.msrb.mxu1 %v999_v34  ;;  %v2488_v34 = vld [vmem:[#allocation7] ss:$0 sm:$0xff] }
  0xab   : > { %1074 = vmatpush.bf16.msrb.mxu0 %v992_v44  ;;  %1087 = vmatpush.bf16.msrb.mxu1 %v993_v47  ;;  %v1010_v47 = vperm.slane %v1006_v41, 2 }
  0xaf   : > { %1075 = vmatpush.bf16.msrb.mxu0 %v986_v57  ;;  %1088 = vmatpush.bf16.msrb.mxu1 %v987_v60  ;;  %v1012_v57 = vperm.slane %v1006_v41, 4 }
  0xb3   : > { %1076 = vmatpush.bf16.msrb.mxu0 %v980_v4  ;;  %1089 = vmatpush.bf16.msrb.mxu1 %v981_v6 }
  0xb7   : > { %1077 = vmatpush.bf16.msrb.mxu0 %v974_v12  ;;  %1090 = vmatpush.bf16.msrb.mxu1 %v975_v13 }
  0xbb   : > { %1078 = vmatpush.bf16.msrb.mxu0 %v968_v19  ;;  %1091 = vmatpush.bf16.msrb.mxu1 %v969_v20 }
  0xbf   : > { %1079 = vmatpush.bf16.msrb.mxu0 %v962_v25  ;;  %1092 = vmatpush.bf16.msrb.mxu1 %v963_v26 }
  0xf3   : > { %v832_v38 = vpop.xlane.xlu0 %831 }
  0xf4   : > { %v836_v55 = vmul.f32 0.03125, %v832_v38 }
  0xf6   : > { %v838_v2 = vmul.f32 %v836_v55, %v836_v55  ;;  %v840_v33 = vsub.f32 %v3297_v0, %v836_v55 }
  0xfb   : > { %v835_v61 = vpop.xlane.xlu0 %834 }
  0xfc   : > { %v837_v3 = vmul.f32 0.03125, %v835_v61 }
  0xfe   : > { %v839_v10 = vsub.f32 %v837_v3, %v838_v2  ;;  %v1011_v2 = vperm.slane %v1006_v41, 3 }
 0x100   : > { %v841_v15 = vadd.f32 1e-12, %v839_v10  ;;  %v3311_v10 = vld [vmem:[%s719_s21] ss:$0 sm:$0xff] }
 0x102   : > { %2505 = vrsqrt.f32 %v841_v15  ;;  %vm848_vm1 = vweird.f32 %v841_v15 }
 0x108   : > { %v2506_v27 = vpop.eup %2505 }
 0x109   : > { %v843_v28 = vmul.f32 %v2506_v27, %v841_v15  ;;  %vm849_vm0 = vweird.f32 %v2506_v27 }
 0x10a   : > { %vm850_vm2 = vmor %vm848_vm1, %vm849_vm0 }
 0x10b   : > { %v844_v29 = vmul.f32 %v2506_v27, %v843_v28 }
 0x10d   : > { %v845_v30 = vmul.f32 0.5, %v844_v29 }
 0x10f   : > { %v846_v31 = vsub.f32 1.5, %v845_v30 }
 0x111   : > { %v847_v32 = vmul.f32 %v2506_v27, %v846_v31  ;;  %v1112_v31 = vld [vmem:[#allocation13 + $0x70] sm:$0xff] }
 0x113   : > { %v851_v35 = vsel %vm850_vm2, %v2506_v27, %v847_v32  ;;  %v1113_v32 = vld [vmem:[#allocation13 + $0x78] sm:$0xff] }
 0x114   : > { %v852_v37 = vmul.f32 %v851_v35, %v840_v33  ;;  %v1110_v33 = vld [vmem:[#allocation13 + $0x60] sm:$0xff]  ;;  %v1111_v35 = vld [vmem:[#allocation13 + $0x68] sm:$0xff] }
 0x116   : > { %v856_v38 = vmul.f32 %v2488_v34, %v852_v37  ;;  %v1192_v34 = vpack.c.bf16 %v1113_v32, %v1112_v31  ;;  %v1191_v37 = vpack.c.bf16 %v1111_v35, %v1110_v33  ;;  %v2491_v33 = vld [vmem:[%s3456_s7] ss:$0 sm:$0xff] }
 0x118   : > { %v3303_v39 = vadd.f32 %v2489_v36, %v856_v38  ;;  %v1128_v36 = vld [vmem:[#allocation13 + $0xf0] sm:$0xff] }
 0x119   : > { %v1108_v38 = vld [vmem:[#allocation13 + $0x50] sm:$0xff] }
 0x11a   : > { %v957_v40 = vpack.c.bf16 %v3303_v39, %v3303_v39 }
 0x11c   : > { %1028 = vmatmul.bf16.vlgmr.msra.gmra.mxu0 %v957_v40  ;;  %1041 = vmatmul.bf16.vlgmr.msra.gmra.mxu1 %v957_v40 }
 0x11d   : > { %1054 = vmatmul.bf16.vlgmr.msra.gmra.mxu2 %v957_v40  ;;  %1067 = vmatmul.bf16.vlgmr.msra.gmra.mxu3 %v957_v40 }
 0x11e   : > { %1264 = vmatpush.bf16.msra.mxu1 %v1192_v34 }
 0x122   : > { %1265 = vmatpush.bf16.msra.mxu1 %v1191_v37 }
 0x12c   : > { %1080 = vmatmul.bf16.vlgmr.msrb.gmra.mxu0 %v957_v40  ;;  %1093 = vmatmul.bf16.vlgmr.msrb.gmra.mxu1 %v957_v40  ;;  %v1129_v40 = vld [vmem:[#allocation13 + $0xf8] sm:$0xff] }
 0x199   : > { %v1029_v0 = vpop.f32.mrf.mxu0  ;;  %v1042_v43 = vpop.f32.mrf.mxu1 }
 0x19a   : > { %v1043_v44 = vadd.f32 %v1042_v43, %v1009_v42  ;;  %v1030_v48 = vadd.f32 %v1029_v0, %v1008_v45  ;;  %v1109_v42 = vld [vmem:[#allocation13 + $0x58] sm:$0xff]  ;;  %v1250_v0 = vpack.c.bf16 %v1129_v40, %v1128_v36  ;;  %v1126_v43 = vld [vmem:[#allocation13 + $0xe0] sm:$0xff] }
 0x19c   : > { %v1131_v46 = vpack.c.bf16 %v1043_v44, %v1043_v44  ;;  %v1130_v54 = vpack.c.bf16 %v1030_v48, %v1030_v48  ;;  %v1127_v44 = vld [vmem:[#allocation13 + $0xe8] sm:$0xff]  ;;  %1251 = vmatpush.bf16.msra.mxu0 %v1250_v0  ;;  %v1125_v48 = vld [vmem:[#allocation13 + $0xd8] sm:$0xff] }
 0x19d   : > { %v1249_v45 = vpack.c.bf16 %v1127_v44, %v1126_v43  ;;  %v1327_v43 = vld [vmem:[#allocation14 + $0x60] sm:$0xff]  ;;  %v1328_v44 = vld [vmem:[#allocation14 + $0x68] sm:$0xff] }
 0x19e   : > { %1139 = vmatpush.bf16.xpose.msrb.mxu2 %v1131_v46  ;;  %v1190_v46 = vpack.c.bf16 %v1109_v42, %v1108_v38  ;;  %v1330_v42 = vld [vmem:[#allocation14 + $0x78] sm:$0xff] }
 0x1a0   : > { %v1055_v49 = vpop.f32.mrf.mxu2  ;;  %v1068_v50 = vpop.f32.mrf.mxu3  ;;  %1252 = vmatpush.bf16.msra.mxu0 %v1249_v45  ;;  %1266 = vmatpush.bf16.msra.mxu1 %v1190_v46  ;;  %v1338_v45 = vpack.c.bf16 %v1328_v44, %v1327_v43  ;;  %v1325_v46 = vld [vmem:[#allocation14 + $0x50] sm:$0xff]  ;;  %v1366_v43 = vld [vmem:[#allocation16] sm:$0xff]  ;;  %v1367_v44 = vld [vmem:[#allocation16 + $0x8] sm:$0xff] }
 0x1a1   : > { %v1056_v51 = vadd.f32 %v1055_v49, %v1010_v47  ;;  %v1031_v52 = vpop.f32.mrf.mxu0  ;;  %v1044_v53 = vpop.f32.mrf.mxu1  ;;  %v1069_v6 = vadd.f32 %v1068_v50, %v1011_v2  ;;  %v1124_v47 = vld [vmem:[#allocation13 + $0xd0] sm:$0xff]  ;;  %v1106_v49 = vld [vmem:[#allocation13 + $0x40] sm:$0xff]  ;;  %v1107_v50 = vld [vmem:[#allocation13 + $0x48] sm:$0xff] }
 0x1a2   : > { %v1189_v53 = vpack.c.bf16 %v1107_v50, %v1106_v49  ;;  %v1324_v49 = vld [vmem:[#allocation14 + $0x48] sm:$0xff] }
 0x1a3   : > { %v1163_v55 = vpack.c.bf16 %v1056_v51, %v1056_v51  ;;  %v1193_v9 = vpack.c.bf16 %v1069_v6, %v1069_v6  ;;  %v1248_v51 = vpack.c.bf16 %v1125_v48, %v1124_v47  ;;  %v1122_v6 = vld [vmem:[#allocation13 + $0xc0] sm:$0xff]  ;;  %v1326_v47 = vld [vmem:[#allocation14 + $0x58] sm:$0xff] }
 0x1a4   : > { %1267 = vmatpush.bf16.msra.mxu1 %v1189_v53  ;;  %v1337_v48 = vpack.c.bf16 %v1326_v47, %v1325_v46  ;;  %v2494_v46 = vld [vmem:[%s3460_s11] ss:$0 sm:$0xff] }
 0x1a5   : > { %1140 = vmatmul.bf16.vlgmr.msrb.gmra.mxu2 %v1130_v54  ;;  %v1169_v56 = vsel %vm1167_vm3, %v1163_v55, 0  ;;  %v1104_v55 = vld [vmem:[#allocation13 + $0x30] sm:$0xff]  ;;  %1253 = vmatpush.bf16.msra.mxu0 %v1248_v51 }
 0x1a6   : > { %1178 = vmatpush.bf16.msrb.mxu3 %v1169_v56  ;;  %v1105_v56 = vld [vmem:[#allocation13 + $0x38] sm:$0xff]  ;;  %v1321_v51 = vld [vmem:[#allocation14 + $0x30] sm:$0xff] }
 0x1a8   : > { %v1057_v59 = vpop.f32.mrf.mxu2  ;;  %v1070_v60 = vpop.f32.mrf.mxu3 }
 0x1a9   : > { %v1081_v61 = vpop.f32.mrf.mxu0  ;;  %v1094_v62 = vpop.f32.mrf.mxu1  ;;  %v1102_v59 = vld [vmem:[#allocation13 + $0x20] sm:$0xff]  ;;  %v1103_v60 = vld [vmem:[#allocation13 + $0x28] sm:$0xff] }
 0x1aa   : > { %v1082_v63 = vadd.f32 %v1081_v61, %v1012_v57  ;;  %v1095_v1 = vadd.f32 %v1094_v62, %v1013_v58  ;;  %v1188_v58 = vpack.c.bf16 %v1105_v56, %v1104_v55  ;;  %v1187_v61 = vpack.c.bf16 %v1103_v60, %v1102_v59  ;;  %v1320_v55 = vld [vmem:[#allocation14 + $0x28] sm:$0xff]  ;;  %v1315_v60 = vld [vmem:[#allocation14] sm:$0xff] }
 0x1ac   : > { %v1194_v3 = vpack.c.bf16 %v1082_v63, %v1082_v63  ;;  %v1222_v4 = vpack.c.bf16 %v1095_v1, %v1095_v1  ;;  %1268 = vmatpush.bf16.msra.mxu1 %v1188_v58  ;;  %v1100_v63 = vld [vmem:[#allocation13 + $0x10] sm:$0xff]  ;;  %v1101_v1 = vld [vmem:[#allocation13 + $0x18] sm:$0xff] }
 0x1ad   : > { %v1186_v2 = vpack.c.bf16 %v1101_v1, %v1100_v63  ;;  %v1318_v58 = vld [vmem:[#allocation14 + $0x18] sm:$0xff] }
 0x1ae   : > { %v1227_v5 = vsel %vm1167_vm3, %v1222_v4, 0  ;;  %1202 = vmatpush.bf16.xpose.msra.mxu2 %v1194_v3 }
 0x1af   : > { %1236 = vmatpush.bf16.msra.mxu3 %v1227_v5 }
 0x1b0   : > { %1269 = vmatpush.bf16.msra.mxu1 %v1187_v61  ;;  %v1316_v61 = vld [vmem:[#allocation14 + $0x8] sm:$0xff] }
 0x1b1   : > { %v1083_v7 = vpop.f32.mrf.mxu0  ;;  %v1096_v8 = vpop.f32.mrf.mxu1 }
 0x1b2   : > { %v1123_v7 = vld [vmem:[#allocation13 + $0xc8] sm:$0xff]  ;;  %v1098_v8 = vld [vmem:[#allocation13] sm:$0xff] }
 0x1b4   : > { %1270 = vmatpush.bf16.msra.mxu1 %v1186_v2 }
 0x1b5   : > { %1203 = vmatmul.bf16.vlgmr.msra.gmra.mxu2 %v1193_v9  ;;  %v1247_v9 = vpack.c.bf16 %v1123_v7, %v1122_v6  ;;  %v1381_v6 = vld [vmem:[#allocation16 + $0x78] sm:$0xff]  ;;  %v1378_v7 = vld [vmem:[#allocation16 + $0x60] sm:$0xff] }
 0x1b7   : > { %1254 = vmatpush.bf16.msra.mxu0 %v1247_v9  ;;  %v1379_v9 = vld [vmem:[#allocation16 + $0x68] sm:$0xff] }
 0x228   : > { %v1141_v11 = vpop.f32.mrf.mxu2 }
 0x229   : > { %v1145_v12 = vmul.f32 0.25, %v1141_v11  ;;  %v1099_v11 = vld [vmem:[#allocation13 + $0x8] sm:$0xff] }
 0x22b   : > { %v1149_v13 = vadd.f32 %v3311_v10, %v1145_v12  ;;  %v1185_v12 = vpack.c.bf16 %v1099_v11, %v1098_v8 }
 0x22d   : > { %v1151_v14 = vsel %vm1150_vm4, %v1149_v13, -inf  ;;  %1271 = vmatpush.bf16.msra.mxu1 %v1185_v12  ;;  %v1389_v12 = vpack.c.bf16 %v1379_v9, %v1378_v7  ;;  %v1508_v9 = vld [vmem:[#allocation10 + $0x510] sm:$0xff] }
 0x22e   : > { %1152 = vmax.xlane.f32.xlu1 %v1151_v14  ;;  %v1121_v14 = vld [vmem:[#allocation13 + $0xb8] sm:$0xff] }
 0x230   : > { %v1143_v15 = vpop.f32.mrf.mxu2 }
 0x238   : > { %v1204_v16 = vpop.f32.mrf.mxu2 }
 0x239   : > { %v1208_v17 = vmul.f32 0.25, %v1204_v16  ;;  %v1118_v16 = vld [vmem:[#allocation13 + $0xa0] sm:$0xff] }
 0x23b   : > { %v1209_v18 = vadd.f32 %v3311_v10, %v1208_v17  ;;  %v1119_v17 = vld [vmem:[#allocation13 + $0xa8] sm:$0xff] }
 0x23d   : > { %v1210_v19 = vsel %vm1150_vm4, %v1209_v18, -inf }
 0x23e   : > { %1211 = vmax.xlane.f32.xlu1 %v1210_v19  ;;  %v1116_v19 = vld [vmem:[#allocation13 + $0x90] sm:$0xff] }
 0x240   : > { %v1206_v20 = vpop.f32.mrf.mxu2 }
 0x241   : > { %v1117_v20 = vld [vmem:[#allocation13 + $0x98] sm:$0xff] }
 0x2a1   : > { %v1153_v21 = vpop.xlane.xlu1 %1152 }
 0x2a2   : > { %v1154_v22 = vsub.f32 %v1149_v13, %v1153_v21  ;;  %v1120_v13 = vld [vmem:[#allocation13 + $0xb0] sm:$0xff]  ;;  %v1244_v21 = vpack.c.bf16 %v1117_v20, %v1116_v19 }
 0x2a3   : > { %v1246_v15 = vpack.c.bf16 %v1121_v14, %v1120_v13 }
 0x2a4   : > { %v1155_v23 = vmul.f32 1.442695, %v1154_v22  ;;  %v1114_v22 = vld [vmem:[#allocation13 + $0x80] sm:$0xff] }
 0x2a5   : > { %1255 = vmatpush.bf16.msra.mxu0 %v1246_v15 }
 0x2a6   : > { %2507 = vpow2.f32 %v1155_v23  ;;  %v1115_v23 = vld [vmem:[#allocation13 + $0x88] sm:$0xff] }
 0x2ac   : > { %v2508_v24 = vpop.eup %2507 }
 0x2ad   : > { %v1157_v25 = vsel %vm1150_vm4, %v2508_v24, 0.0 }
 0x2ae   : > { %1158 = vadd.xlane.f32.xlu2 %v1157_v25 }
 0x2b1   : > { %v1212_v26 = vpop.xlane.xlu1 %1211 }
 0x2b2   : > { %v1213_v27 = vsub.f32 %v1209_v18, %v1212_v26  ;;  %v1245_v18 = vpack.c.bf16 %v1119_v17, %v1118_v16 }
 0x2b4   : > { %v1214_v28 = vmul.f32 1.442695, %v1213_v27  ;;  %1256 = vmatpush.bf16.msra.mxu0 %v1245_v18 }
 0x2b6   : > { %2509 = vpow2.f32 %v1214_v28 }
 0x2b8   : > { %1257 = vmatpush.bf16.msra.mxu0 %v1244_v21  ;;  %v2492_v21 = vld [vmem:[%s3457_s8] ss:$0 sm:$0xff] }
 0x2bc   : > { %v2510_v29 = vpop.eup %2509 }
 0x2bd   : > { %v1216_v30 = vsel %vm1150_vm4, %v2510_v29, 0.0 }
 0x2be   : > { %1217 = vadd.xlane.f32.xlu2 %v1216_v30 }
 0x321   : > { %v1159_v41 = vpop.xlane.xlu2 %1158 }
 0x322   : > { %2511 = vrcp.f32 %v1159_v41  ;;  %v1329_v41 = vld [vmem:[#allocation14 + $0x70] sm:$0xff] }
 0x323   : > { %v1339_v0 = vpack.c.bf16 %v1330_v42, %v1329_v41  ;;  %v1368_v41 = vld [vmem:[#allocation16 + $0x10] sm:$0xff]  ;;  %v1369_v42 = vld [vmem:[#allocation16 + $0x18] sm:$0xff] }
 0x325   : > { %1344 = vmatpush.bf16.msrb.mxu2 %v1339_v0  ;;  %v1384_v0 = vpack.c.bf16 %v1369_v42, %v1368_v41 }
 0x328   : > { %v2512_v52 = vpop.eup %2511 }
 0x329   : > { %v1161_v54 = vmul.f32 %v2512_v52, %v2508_v24  ;;  %v1243_v24 = vpack.c.bf16 %v1115_v23, %v1114_v22  ;;  %1345 = vmatpush.bf16.msrb.mxu2 %v1338_v45  ;;  %v1322_v52 = vld [vmem:[#allocation14 + $0x38] sm:$0xff]  ;;  %v1383_v45 = vpack.c.bf16 %v1367_v44, %v1366_v43 }
 0x32a   : > { %v1335_v53 = vpack.c.bf16 %v1322_v52, %v1321_v51  ;;  %v1523_v43 = vld [vmem:[#allocation10 + $0x588] sm:$0xff] }
 0x32b   : > { %v1162_v57 = vpack.c.bf16 %v1161_v54, %v1161_v54  ;;  %1258 = vmatpush.bf16.msra.mxu0 %v1243_v24  ;;  %v1319_v54 = vld [vmem:[#allocation14 + $0x20] sm:$0xff]  ;;  %v2493_v24 = vld [vmem:[%s3458_s9] ss:$0 sm:$0xff] }
 0x32c   : > { %v1334_v56 = vpack.c.bf16 %v1320_v55, %v1319_v54 }
 0x32d   : > { %2325 = vmatmul.msk.bf16.vlgmr.msrb.gmra.mxu3 %vm1150_vm4, %v1162_v57  ;;  %1346 = vmatpush.bf16.msrb.mxu2 %v1337_v48  ;;  %v1317_v57 = vld [vmem:[#allocation14 + $0x10] sm:$0xff] }
 0x32e   : > { %v1333_v59 = vpack.c.bf16 %v1318_v58, %v1317_v57 }
 0x331   : > { %v1218_v62 = vpop.xlane.xlu2 %1217 }
 0x332   : > { %2513 = vrcp.f32 %v1218_v62  ;;  %v1332_v62 = vpack.c.bf16 %v1316_v61, %v1315_v60  ;;  %v1532_v60 = vld [vmem:[#allocation10 + $0x5d0] sm:$0xff]  ;;  %v1527_v61 = vld [vmem:[#allocation10 + $0x5a8] sm:$0xff] }
 0x338   : > { %v2514_v3 = vpop.eup %2513 }
 0x339   : > { %v1220_v4 = vmul.f32 %v2514_v3, %v2510_v29 }
 0x33b   : > { %v1221_v5 = vpack.c.bf16 %v1220_v4, %v1220_v4 }
 0x33d   : > { %2326 = vmatmul.msk.bf16.vlgmr.msra.gmra.mxu3 %vm1150_vm4, %v1221_v5  ;;  %v1380_v5 = vld [vmem:[#allocation16 + $0x70] sm:$0xff] }
 0x33e   : > { %v1390_v8 = vpack.c.bf16 %v1381_v6, %v1380_v5  ;;  %v1521_v5 = vld [vmem:[#allocation10 + $0x578] sm:$0xff] }
 0x340   : > { %1395 = vmatpush.bf16.msrb.mxu3 %v1390_v8  ;;  %v1502_v8 = vld [vmem:[#allocation10 + $0x4e0] sm:$0xff] }
 0x344   : > { %1396 = vmatpush.bf16.msrb.mxu3 %v1389_v12  ;;  %v1509_v12 = vld [vmem:[#allocation10 + $0x518] sm:$0xff] }
 0x3b0   : > { %v1180_v25 = vpop.f32.mrf.mxu3 }
 0x3b1   : > { %v1184_v26 = vpack.c.bf16 %v1180_v25, %v1180_v25 }
 0x3b3   : > { %1272 = vmatmul.bf16.vlgmr.msra.gmra.mxu1 %v1184_v26 }
 0x3b8   : > { %v1182_v27 = vpop.f32.mrf.mxu3 }
 0x3c0   : > { %v1238_v28 = vpop.f32.mrf.mxu3 }
 0x3c1   : > { %v1242_v29 = vpack.c.bf16 %v1238_v28, %v1238_v28  ;;  %v1376_v28 = vld [vmem:[#allocation16 + $0x50] sm:$0xff] }
 0x3c3   : > { %1259 = vmatmul.bf16.vlgmr.msra.gmra.mxu0 %v1242_v29  ;;  %v1377_v29 = vld [vmem:[#allocation16 + $0x58] sm:$0xff] }
 0x3c8   : > { %v1240_v30 = vpop.f32.mrf.mxu3 }
 0x3c9   : > { %v1388_v30 = vpack.c.bf16 %v1377_v29, %v1376_v28  ;;  %v1534_v28 = vld [vmem:[#allocation10 + $0x5e0] sm:$0xff] }
 0x3cb   : > { %1397 = vmatpush.bf16.msrb.mxu3 %v1388_v30 }
 0x430   : > { %v1273_v31 = vpop.f32.mrf.mxu1 }
 0x438   : > { %v1275_v32 = vpop.f32.mrf.mxu1 }
 0x439   : > { %v1375_v32 = vld [vmem:[#allocation16 + $0x48] sm:$0xff] }
 0x440   : > { %v1260_v34 = vpop.f32.mrf.mxu0 }
 0x441   : > { %v1274_v35 = vadd.f32 %v1273_v31, %v1260_v34  ;;  %v1374_v31 = vld [vmem:[#allocation16 + $0x40] sm:$0xff]  ;;  %v1372_v34 = vld [vmem:[#allocation16 + $0x30] sm:$0xff] }
 0x443   : > { %v1281_v36 = vadd.f32 %v2491_v33, %v1274_v35  ;;  %v1387_v33 = vpack.c.bf16 %v1375_v32, %v1374_v31  ;;  %v1373_v35 = vld [vmem:[#allocation16 + $0x38] sm:$0xff]  ;;  %v1529_v31 = vld [vmem:[#allocation10 + $0x5b8] sm:$0xff] }
 0x445   : > { %v3325_v37 = vadd.f32 %v1281_v36, %v3303_v39  ;;  %v1323_v39 = vld [vmem:[#allocation14 + $0x40] sm:$0xff]  ;;  %1398 = vmatpush.bf16.msrb.mxu3 %v1387_v33  ;;  %v1386_v36 = vpack.c.bf16 %v1373_v35, %v1372_v34  ;;  %v1478_v33 = vld [vmem:[#allocation10 + $0x420] sm:$0xff] }
 0x446   : > { %v1336_v50 = vpack.c.bf16 %v1324_v49, %v1323_v39  ;;  %v1484_v34 = vld [vmem:[#allocation10 + $0x450] sm:$0xff]  ;;  %v1479_v35 = vld [vmem:[#allocation10 + $0x428] sm:$0xff] }
 0x447   : > { %1285 = vadd.xlane.f32.xlu0 %v3325_v37  ;;  %v1287_v38 = vmul.f32 %v3325_v37, %v3325_v37 }
 0x448   : > { %v1262_v40 = vpop.f32.mrf.mxu0  ;;  %1347 = vmatpush.bf16.msrb.mxu2 %v1336_v50 }
 0x449   : > { %1288 = vadd.xlane.f32.xlu1 %v1287_v38  ;;  %v1371_v38 = vld [vmem:[#allocation16 + $0x28] sm:$0xff]  ;;  %1399 = vmatpush.bf16.msrb.mxu3 %v1386_v36  ;;  %v1557_v36 = vpack.c.bf16 %v1484_v34, %v1478_v33  ;;  %v1519_v34 = vld [vmem:[#allocation10 + $0x568] sm:$0xff] }
 0x44c   : > { %1348 = vmatpush.bf16.msrb.mxu2 %v1335_v53 }
 0x450   : > { %1349 = vmatpush.bf16.msrb.mxu2 %v1334_v56 }
 0x454   : > { %1350 = vmatpush.bf16.msrb.mxu2 %v1333_v59  ;;  %v1526_v59 = vld [vmem:[#allocation10 + $0x5a0] sm:$0xff] }
 0x458   : > { %1351 = vmatpush.bf16.msrb.mxu2 %v1332_v62  ;;  %v1581_v62 = vpack.c.bf16 %v1532_v60, %v1526_v59  ;;  %v1461_v60 = vld [vmem:[#allocation10 + $0x398] sm:$0xff] }
 0x45a   : > { %1602 = vmatpush.bf16.msrb.mxu0 %v1581_v62  ;;  %v1498_v62 = vld [vmem:[#allocation10 + $0x4c0] sm:$0xff] }
 0x4ba   : > { %v1286_v63 = vpop.xlane.xlu0 %1285 }
 0x4bb   : > { %v1290_v1 = vmul.f32 0.03125, %v1286_v63  ;;  %v1533_v63 = vld [vmem:[#allocation10 + $0x5d8] sm:$0xff] }
 0x4bc   : > { %v1289_v2 = vpop.xlane.xlu1 %1288 }
 0x4bd   : > { %v1292_v3 = vmul.f32 %v1290_v1, %v1290_v1  ;;  %v1291_v4 = vmul.f32 0.03125, %v1289_v2  ;;  %v1294_v20 = vsub.f32 %v3325_v37, %v1290_v1  ;;  %v1370_v37 = vld [vmem:[#allocation16 + $0x20] sm:$0xff]  ;;  %v1514_v1 = vld [vmem:[#allocation10 + $0x540] sm:$0xff] }
 0x4be   : > { %v1385_v40 = vpack.c.bf16 %v1371_v38, %v1370_v37  ;;  %v1520_v2 = vld [vmem:[#allocation10 + $0x570] sm:$0xff]  ;;  %v1485_v37 = vld [vmem:[#allocation10 + $0x458] sm:$0xff] }
 0x4bf   : > { %v1293_v11 = vsub.f32 %v1291_v4, %v1292_v3  ;;  %v1582_v3 = vpack.c.bf16 %v1533_v63, %v1527_v61  ;;  %v1515_v4 = vld [vmem:[#allocation10 + $0x548] sm:$0xff]  ;;  %v1575_v6 = vpack.c.bf16 %v1520_v2, %v1514_v1  ;;  %v1516_v38 = vld [vmem:[#allocation10 + $0x550] sm:$0xff]  ;;  %v1558_v41 = vpack.c.bf16 %v1485_v37, %v1479_v35  ;;  %v1493_v2 = vld [vmem:[#allocation10 + $0x498] sm:$0xff] }
 0x4c0   : > { %1400 = vmatpush.bf16.msrb.mxu3 %v1385_v40  ;;  %v1576_v7 = vpack.c.bf16 %v1521_v5, %v1515_v4  ;;  %v1522_v40 = vld [vmem:[#allocation10 + $0x580] sm:$0xff]  ;;  %v1492_v61 = vld [vmem:[#allocation10 + $0x490] sm:$0xff]  ;;  %v1525_v35 = vld [vmem:[#allocation10 + $0x598] sm:$0xff] }
 0x4c1   : > { %v1295_v13 = vadd.f32 1e-12, %v1293_v11  ;;  %1615 = vmatpush.bf16.msrb.mxu1 %v1582_v3  ;;  %v1503_v11 = vld [vmem:[#allocation10 + $0x4e8] sm:$0xff]  ;;  %1603 = vmatpush.bf16.msrb.mxu0 %v1575_v6  ;;  %v1577_v42 = vpack.c.bf16 %v1522_v40, %v1516_v38  ;;  %v1565_v1 = vpack.c.bf16 %v1498_v62, %v1492_v61  ;;  %v1442_v5 = vld [vmem:[#allocation10 + $0x300] sm:$0xff]  ;;  %v1448_v6 = vld [vmem:[#allocation10 + $0x330] sm:$0xff] }
 0x4c2   : > { %v1499_v3 = vld [vmem:[#allocation10 + $0x4c8] sm:$0xff]  ;;  %v1456_v37 = vld [vmem:[#allocation10 + $0x370] sm:$0xff]  ;;  %v1462_v38 = vld [vmem:[#allocation10 + $0x3a0] sm:$0xff] }
 0x4c3   : > { %2515 = vrsqrt.f32 %v1295_v13  ;;  %vm1302_vm6 = vweird.f32 %v1295_v13  ;;  %v1566_v4 = vpack.c.bf16 %v1499_v3, %v1493_v2  ;;  %v1457_v40 = vld [vmem:[#allocation10 + $0x378] sm:$0xff]  ;;  %v1483_v2 = vld [vmem:[#allocation10 + $0x448] sm:$0xff] }
 0x4c4   : > { %1401 = vmatpush.bf16.msrb.mxu3 %v1384_v0  ;;  %v1517_v0 = vld [vmem:[#allocation10 + $0x558] sm:$0xff] }
 0x4c5   : > { %1616 = vmatpush.bf16.msrb.mxu1 %v1576_v7  ;;  %v1578_v44 = vpack.c.bf16 %v1523_v43, %v1517_v0  ;;  %v1443_v7 = vld [vmem:[#allocation10 + $0x308] sm:$0xff]  ;;  %v1506_v0 = vld [vmem:[#allocation10 + $0x500] sm:$0xff]  ;;  %v1512_v43 = vld [vmem:[#allocation10 + $0x530] sm:$0xff] }
 0x4c8   : > { %1402 = vmatpush.bf16.msrb.mxu3 %v1383_v45  ;;  %v1466_v45 = vld [vmem:[#allocation10 + $0x3c0] sm:$0xff] }
 0x4c9   : > { %v2516_v14 = vpop.eup %2515 }
 0x4ca   : > { %v1297_v15 = vmul.f32 %v2516_v14, %v1295_v13  ;;  %vm1303_vm5 = vweird.f32 %v2516_v14  ;;  %v1569_v13 = vpack.c.bf16 %v1508_v9, %v1502_v8  ;;  %v1539_v8 = vpack.c.bf16 %v1448_v6, %v1442_v5  ;;  %v1449_v9 = vld [vmem:[#allocation10 + $0x338] sm:$0xff] }
 0x4cb   : > { %vm1304_vm7 = vmor %vm1302_vm6, %vm1303_vm5  ;;  %v1489_v6 = vld [vmem:[#allocation10 + $0x478] sm:$0xff] }
 0x4cc   : > { %v1298_v16 = vmul.f32 %v2516_v14, %v1297_v15  ;;  %1604 = vmatpush.bf16.msrb.mxu0 %v1569_v13  ;;  %v2495_v15 = vld [vmem:[%s3519_s13] ss:$0 sm:$0xff]  ;;  %v1540_v13 = vpack.c.bf16 %v1449_v9, %v1443_v7  ;;  %v1562_v7 = vpack.c.bf16 %v1489_v6, %v1483_v2  ;;  %v1476_v9 = vld [vmem:[#allocation10 + $0x410] sm:$0xff] }
 0x4ce   : > { %v1299_v17 = vmul.f32 0.5, %v1298_v16 }
 0x4d0   : > { %v1300_v18 = vsub.f32 1.5, %v1299_v17 }
 0x4d2   : > { %v1301_v19 = vmul.f32 %v2516_v14, %v1300_v18 }
 0x4d4   : > { %v1305_v22 = vsel %vm1304_vm7, %v2516_v14, %v1301_v19  ;;  %v1570_v14 = vpack.c.bf16 %v1509_v12, %v1503_v11  ;;  %v1480_v11 = vld [vmem:[#allocation10 + $0x430] sm:$0xff]  ;;  %v1486_v12 = vld [vmem:[#allocation10 + $0x460] sm:$0xff] }
 0x4d5   : > { %v1306_v23 = vmul.f32 %v1305_v22, %v1294_v20  ;;  %v1496_v22 = vld [vmem:[#allocation10 + $0x4b0] sm:$0xff] }
 0x4d6   : > { %1617 = vmatpush.bf16.msrb.mxu1 %v1570_v14  ;;  %v1559_v14 = vpack.c.bf16 %v1486_v12, %v1480_v11  ;;  %v1471_v12 = vld [vmem:[#allocation10 + $0x3e8] sm:$0xff] }
 0x4d7   : > { %v1310_v25 = vmul.f32 %v2492_v21, %v1306_v23  ;;  %v1490_v21 = vld [vmem:[#allocation10 + $0x480] sm:$0xff]  ;;  %v1491_v23 = vld [vmem:[#allocation10 + $0x488] sm:$0xff] }
 0x4d9   : > { %v3337_v26 = vadd.f32 %v2493_v24, %v1310_v25  ;;  %v1563_v24 = vpack.c.bf16 %v1496_v22, %v1490_v21  ;;  %v1497_v25 = vld [vmem:[#allocation10 + $0x4b8] sm:$0xff]  ;;  %v1531_v21 = vld [vmem:[#allocation10 + $0x5c8] sm:$0xff] }
 0x4da   : > { %v1564_v29 = vpack.c.bf16 %v1497_v25, %v1491_v23  ;;  %v1537_v22 = vld [vmem:[#allocation10 + $0x5f8] sm:$0xff]  ;;  %v1468_v25 = vld [vmem:[#allocation10 + $0x3d0] sm:$0xff] }
 0x4db   : > { %v1331_v27 = vpack.c.bf16 %v3337_v26, %v3337_v26  ;;  %1605 = vmatpush.bf16.msrb.mxu0 %v1563_v24  ;;  %v1586_v24 = vpack.c.bf16 %v1537_v22, %v1531_v21  ;;  %v1465_v21 = vld [vmem:[#allocation10 + $0x3b8] sm:$0xff] }
 0x4dc   : > { %1618 = vmatpush.bf16.msrb.mxu1 %v1564_v29 }
 0x4dd   : > { %1352 = vmatmul.bf16.vlgmr.msrb.gmra.mxu2 %v1331_v27  ;;  %v1528_v27 = vld [vmem:[#allocation10 + $0x5b0] sm:$0xff] }
 0x4de   : > { %v1583_v30 = vpack.c.bf16 %v1534_v28, %v1528_v27  ;;  %v1474_v27 = vld [vmem:[#allocation10 + $0x400] sm:$0xff]  ;;  %v1469_v28 = vld [vmem:[#allocation10 + $0x3d8] sm:$0xff] }
 0x4df   : > { %1606 = vmatpush.bf16.msrb.mxu0 %v1557_v36  ;;  %v1553_v29 = vpack.c.bf16 %v1474_v27, %v1468_v25  ;;  %v1580_v36 = vpack.c.bf16 %v1525_v35, %v1519_v34  ;;  %v1452_v25 = vld [vmem:[#allocation10 + $0x350] sm:$0xff]  ;;  %v1447_v27 = vld [vmem:[#allocation10 + $0x328] sm:$0xff] }
 0x4e0   : > { %1628 = vmatpush.bf16.msra.mxu2 %v1583_v30  ;;  %1619 = vmatpush.bf16.msrb.mxu1 %v1558_v41  ;;  %v1475_v30 = vld [vmem:[#allocation10 + $0x408] sm:$0xff]  ;;  %v1547_v41 = vpack.c.bf16 %v1462_v38, %v1456_v37 }
 0x4e1   : > { %v2496_v37 = vld [vmem:[%s3520_s0] ss:$0 sm:$0xff] }
 0x4e4   : > { %1629 = vmatpush.bf16.msra.mxu2 %v1577_v42  ;;  %v1463_v42 = vld [vmem:[#allocation10 + $0x3a8] sm:$0xff] }
 0x560   : > { %v1353_v47 = vpop.f32.mrf.mxu2 }
 0x561   : > { %v1354_v48 = vadd.f32 %v2494_v46, %v1353_v47  ;;  %v1472_v46 = vld [vmem:[#allocation10 + $0x3f0] sm:$0xff]  ;;  %v1467_v47 = vld [vmem:[#allocation10 + $0x3c8] sm:$0xff] }
 0x563   : > { %v1358_v39 = vmul.f32 0.044715, %v1354_v48  ;;  %v1357_v55 = vmul.f32 0.5, %v1354_v48 }
 0x565   : > { %v1359_v49 = vmul.f32 %v1358_v39, %v1354_v48  ;;  %v1473_v39 = vld [vmem:[#allocation10 + $0x3f8] sm:$0xff] }
 0x567   : > { %v1360_v50 = vmul.f32 %v1359_v49, %v1354_v48  ;;  %v1504_v49 = vld [vmem:[#allocation10 + $0x4f0] sm:$0xff] }
 0x568   : > { %v1355_v51 = vpop.f32.mrf.mxu2 }
 0x569   : > { %v1361_v52 = vadd.f32 %v1360_v50, %v1354_v48  ;;  %v1551_v48 = vpack.c.bf16 %v1472_v46, %v1466_v45  ;;  %v1510_v50 = vld [vmem:[#allocation10 + $0x520] sm:$0xff]  ;;  %v1552_v51 = vpack.c.bf16 %v1473_v39, %v1467_v47  ;;  %v1573_v45 = vpack.c.bf16 %v1512_v43, %v1506_v0  ;;  %v1507_v46 = vld [vmem:[#allocation10 + $0x508] sm:$0xff]  ;;  %v1513_v47 = vld [vmem:[#allocation10 + $0x538] sm:$0xff] }
 0x56a   : > { %v1444_v39 = vld [vmem:[#allocation10 + $0x310] sm:$0xff] }
 0x56b   : > { %v1362_v53 = vmul.f32 0.7978846, %v1361_v52  ;;  %v1571_v52 = vpack.c.bf16 %v1510_v50, %v1504_v49  ;;  %1607 = vmatpush.bf16.msrb.mxu0 %v1551_v48  ;;  %1620 = vmatpush.bf16.msrb.mxu1 %v1552_v51  ;;  %v1574_v48 = vpack.c.bf16 %v1513_v47, %v1507_v46  ;;  %v1450_v49 = vld [vmem:[#allocation10 + $0x340] sm:$0xff]  ;;  %v1445_v50 = vld [vmem:[#allocation10 + $0x318] sm:$0xff] }
 0x56c   : > { %v1541_v51 = vpack.c.bf16 %v1450_v49, %v1444_v39 }
 0x56d   : > { %2517 = vtanh.f32 %v1362_v53  ;;  %v1505_v53 = vld [vmem:[#allocation10 + $0x4f8] sm:$0xff]  ;;  %1630 = vmatpush.bf16.msra.mxu2 %v1571_v52  ;;  %v1451_v52 = vld [vmem:[#allocation10 + $0x348] sm:$0xff] }
 0x571   : > { %1631 = vmatpush.bf16.msra.mxu2 %v1565_v1  ;;  %v1488_v1 = vld [vmem:[#allocation10 + $0x470] sm:$0xff] }
 0x573   : > { %v2518_v54 = vpop.eup %2517 }
 0x574   : > { %v1364_v56 = vadd.f32 1.0, %v2518_v54  ;;  %v1511_v54 = vld [vmem:[#allocation10 + $0x528] sm:$0xff] }
 0x575   : > { %1632 = vmatpush.bf16.msra.mxu2 %v1559_v14 }
 0x576   : > { %v1365_v57 = vmul.f32 %v1364_v56, %v1357_v55  ;;  %v1572_v55 = vpack.c.bf16 %v1511_v54, %v1505_v53  ;;  %v1454_v56 = vld [vmem:[#allocation10 + $0x360] sm:$0xff]  ;;  %v1500_v54 = vld [vmem:[#allocation10 + $0x4d0] sm:$0xff] }
 0x577   : > { %v1494_v53 = vld [vmem:[#allocation10 + $0x4a0] sm:$0xff] }
 0x578   : > { %v1382_v58 = vpack.c.bf16 %v1365_v57, %v1365_v57  ;;  %v1460_v57 = vld [vmem:[#allocation10 + $0x390] sm:$0xff] }
 0x579   : > { %v1545_v59 = vpack.c.bf16 %v1460_v57, %v1454_v56  ;;  %1633 = vmatpush.bf16.msra.mxu2 %v1553_v29  ;;  %v1542_v56 = vpack.c.bf16 %v1451_v52, %v1445_v50  ;;  %v1567_v57 = vpack.c.bf16 %v1500_v54, %v1494_v53 }
 0x57a   : > { %1403 = vmatmul.bf16.vlgmr.msrb.gmra.mxu3 %v1382_v58  ;;  %v1455_v58 = vld [vmem:[#allocation10 + $0x368] sm:$0xff] }
 0x57b   : > { %v1546_v63 = vpack.c.bf16 %v1461_v60, %v1455_v58  ;;  %1608 = vmatpush.bf16.msrb.mxu0 %v1545_v59  ;;  %v1495_v58 = vld [vmem:[#allocation10 + $0x4a8] sm:$0xff]  ;;  %v1501_v59 = vld [vmem:[#allocation10 + $0x4d8] sm:$0xff] }
 0x57c   : > { %v1568_v61 = vpack.c.bf16 %v1501_v59, %v1495_v58 }
 0x57d   : > { %1621 = vmatpush.bf16.msrb.mxu1 %v1546_v63  ;;  %1634 = vmatpush.bf16.msra.mxu2 %v1547_v41  ;;  %v1482_v63 = vld [vmem:[#allocation10 + $0x440] sm:$0xff] }
 0x57e   : > { %v1561_v5 = vpack.c.bf16 %v1488_v1, %v1482_v63 }
 0x57f   : > { %1609 = vmatpush.bf16.msrb.mxu0 %v1539_v8  ;;  %v1470_v8 = vld [vmem:[#allocation10 + $0x3e0] sm:$0xff] }
 0x581   : > { %1622 = vmatpush.bf16.msrb.mxu1 %v1540_v13  ;;  %1635 = vmatpush.bf16.msra.mxu2 %v1541_v51  ;;  %v1477_v13 = vld [vmem:[#allocation10 + $0x418] sm:$0xff] }
 0x585   : > { %1667 = vmatpush.bf16.msra.mxu1 %v1586_v24  ;;  %v1446_v24 = vld [vmem:[#allocation10 + $0x320] sm:$0xff] }
 0x589   : > { %1668 = vmatpush.bf16.msra.mxu1 %v1580_v36 }
 0x58d   : > { %1669 = vmatpush.bf16.msra.mxu1 %v1574_v48 }
 0x591   : > { %1670 = vmatpush.bf16.msra.mxu1 %v1568_v61 }
 0x595   : > { %1671 = vmatpush.bf16.msra.mxu1 %v1562_v7 }
 0x5fd   : > { %v1404_v16 = vpop.f32.mrf.mxu3 }
 0x5fe   : > { %v1405_v17 = vadd.f32 %v2495_v15, %v1404_v16  ;;  %v1481_v15 = vld [vmem:[#allocation10 + $0x438] sm:$0xff]  ;;  %v1487_v16 = vld [vmem:[#allocation10 + $0x468] sm:$0xff] }
 0x600   : > { %v3348_v18 = vadd.f32 %v1405_v17, %v3337_v26  ;;  %v1535_v26 = vld [vmem:[#allocation10 + $0x5e8] sm:$0xff]  ;;  %v1530_v17 = vld [vmem:[#allocation10 + $0x5c0] sm:$0xff] }
 0x601   : > { %v1584_v32 = vpack.c.bf16 %v1535_v26, %v1529_v31  ;;  %v1518_v31 = vld [vmem:[#allocation10 + $0x560] sm:$0xff]  ;;  %v1524_v26 = vld [vmem:[#allocation10 + $0x590] sm:$0xff] }
 0x602   : > { %1411 = vadd.xlane.f32.xlu2 %v3348_v18  ;;  %v1413_v19 = vmul.f32 %v3348_v18, %v3348_v18  ;;  %v1579_v33 = vpack.c.bf16 %v1524_v26, %v1518_v31 }
 0x603   : > { %1641 = vmatpush.bf16.msra.mxu3 %v1584_v32  ;;  %v1554_v32 = vpack.c.bf16 %v1475_v30, %v1469_v28  ;;  %v1453_v28 = vld [vmem:[#allocation10 + $0x358] sm:$0xff]  ;;  %v1543_v30 = vpack.c.bf16 %v1452_v25, %v1446_v24 }
 0x604   : > { %1414 = vadd.xlane.f32.xlu0 %v1413_v19  ;;  %v1560_v19 = vpack.c.bf16 %v1487_v16, %v1481_v15  ;;  %v1555_v15 = vpack.c.bf16 %v1476_v9, %v1470_v8  ;;  %v1556_v16 = vpack.c.bf16 %v1477_v13, %v1471_v12  ;;  %v1544_v26 = vpack.c.bf16 %v1453_v28, %v1447_v27 }
 0x605   : > { %v1406_v20 = vpop.f32.mrf.mxu3 }
 0x606   : > { %v1536_v20 = vld [vmem:[#allocation10 + $0x5f0] sm:$0xff]  ;;  %1672 = vmatpush.bf16.msra.mxu1 %v1556_v16 }
 0x607   : > { %1642 = vmatpush.bf16.msra.mxu3 %v1578_v44  ;;  %v1585_v23 = vpack.c.bf16 %v1536_v20, %v1530_v17  ;;  %v1548_v44 = vpack.c.bf16 %v1463_v42, %v1457_v40  ;;  %v1458_v17 = vld [vmem:[#allocation10 + $0x380] sm:$0xff]  ;;  %v1459_v20 = vld [vmem:[#allocation10 + $0x388] sm:$0xff] }
 0x608   : > { %v2497_v40 = vld [vmem:[%s3521_s15] ss:$0 sm:$0xff] }
 0x609   : > { %1654 = vmatpush.bf16.msra.mxu0 %v1585_v23  ;;  %v1550_v23 = vpack.c.bf16 %v1465_v21, %v1459_v20 }
 0x60b   : > { %1643 = vmatpush.bf16.msra.mxu3 %v1572_v55  ;;  %1673 = vmatpush.bf16.msra.mxu1 %v1550_v23 }
 0x60d   : > { %1655 = vmatpush.bf16.msra.mxu0 %v1579_v33 }
 0x60f   : > { %1644 = vmatpush.bf16.msra.mxu3 %v1566_v4  ;;  %1674 = vmatpush.bf16.msra.mxu1 %v1544_v26 }
 0x611   : > { %1656 = vmatpush.bf16.msra.mxu0 %v1573_v45 }
 0x613   : > { %1645 = vmatpush.bf16.msra.mxu3 %v1560_v19  ;;  %v1464_v19 = vld [vmem:[#allocation10 + $0x3b0] sm:$0xff] }
 0x614   : > { %v1549_v22 = vpack.c.bf16 %v1464_v19, %v1458_v17 }
 0x615   : > { %1657 = vmatpush.bf16.msra.mxu0 %v1567_v57 }
 0x617   : > { %1646 = vmatpush.bf16.msra.mxu3 %v1554_v32 }
 0x619   : > { %1658 = vmatpush.bf16.msra.mxu0 %v1561_v5 }
 0x61b   : > { %1647 = vmatpush.bf16.msra.mxu3 %v1548_v44 }
 0x61d   : > { %1659 = vmatpush.bf16.msra.mxu0 %v1555_v15 }
 0x61f   : > { %1648 = vmatpush.bf16.msra.mxu3 %v1542_v56 }
 0x621   : > { %1660 = vmatpush.bf16.msra.mxu0 %v1549_v22 }
 0x625   : > { %1661 = vmatpush.bf16.msra.mxu0 %v1543_v30 }
 0x675   : > { %v1412_v55 = vpop.xlane.xlu2 %1411 }
 0x676   : > { %v1416_v60 = vmul.f32 0.03125, %v1412_v55 }
 0x677   : > { %v1415_v62 = vpop.xlane.xlu0 %1414 }
 0x678   : > { %v1418_v3 = vmul.f32 %v1416_v60, %v1416_v60  ;;  %v1417_v4 = vmul.f32 0.03125, %v1415_v62  ;;  %v1420_v36 = vsub.f32 %v3348_v18, %v1416_v60  ;;  %v1588_v18 = vld [vmem:[#allocation11 + $0x6] sm:$0x3f] }
 0x679   : > { %v1591_v44 = vperm.slane %v1588_v18, 1  ;;  %v1590_v48 = vperm.slane %v1588_v18, 0  ;;  %v1592_v49 = vperm.slane %v1588_v18, 2  ;;  %v1594_v59 = vperm.slane %v1588_v18, 4 }
 0x67a   : > { %v1419_v11 = vsub.f32 %v1417_v4, %v1418_v3  ;;  %v1595_v60 = vperm.slane %v1588_v18, 5  ;;  %v1593_v4 = vperm.slane %v1588_v18, 3  ;;  %v1692_v18 = vld [vmem:[#allocation13 + $0x158] sm:$0xff] }
 0x67c   : > { %v1421_v14 = vadd.f32 1e-12, %v1419_v11 }
 0x67e   : > { %2519 = vrsqrt.f32 %v1421_v14  ;;  %vm1428_vm9 = vweird.f32 %v1421_v14 }
 0x684   : > { %v2520_v29 = vpop.eup %2519 }
 0x685   : > { %v1423_v31 = vmul.f32 %v2520_v29, %v1421_v14  ;;  %vm1429_vm8 = vweird.f32 %v2520_v29 }
 0x686   : > { %vm1430_vm10 = vmor %vm1428_vm9, %vm1429_vm8 }
 0x687   : > { %v1424_v32 = vmul.f32 %v2520_v29, %v1423_v31 }
 0x689   : > { %v1425_v33 = vmul.f32 0.5, %v1424_v32 }
 0x68b   : > { %v1426_v34 = vsub.f32 1.5, %v1425_v33 }
 0x68d   : > { %v1427_v35 = vmul.f32 %v2520_v29, %v1426_v34  ;;  %v1696_v34 = vld [vmem:[#allocation13 + $0x178] sm:$0xff] }
 0x68f   : > { %v1431_v38 = vsel %vm1430_vm10, %v2520_v29, %v1427_v35  ;;  %v1693_v35 = vld [vmem:[#allocation13 + $0x160] sm:$0xff] }
 0x690   : > { %v1432_v41 = vmul.f32 %v1431_v38, %v1420_v36  ;;  %v1711_v38 = vld [vmem:[#allocation13 + $0x1f0] sm:$0xff] }
 0x692   : > { %v1436_v42 = vmul.f32 %v2496_v37, %v1432_v41  ;;  %v1694_v37 = vld [vmem:[#allocation13 + $0x168] sm:$0xff]  ;;  %v1691_v41 = vld [vmem:[#allocation13 + $0x150] sm:$0xff] }
 0x694   : > { %v3360_v0 = vadd.f32 %v2497_v40, %v1436_v42  ;;  %v1769_v40 = vpack.c.bf16 %v1694_v37, %v1693_v35  ;;  %v1712_v42 = vld [vmem:[#allocation13 + $0x1f8] sm:$0xff] }
 0x696   : > { %v1538_v43 = vpack.c.bf16 %v3360_v0, %v3360_v0 }
 0x698   : > { %1610 = vmatmul.bf16.vlgmr.msrb.gmra.mxu0 %v1538_v43  ;;  %1623 = vmatmul.bf16.vlgmr.msrb.gmra.mxu1 %v1538_v43 }
 0x699   : > { %1636 = vmatmul.bf16.vlgmr.msra.gmra.mxu2 %v1538_v43  ;;  %1649 = vmatmul.bf16.vlgmr.msra.gmra.mxu3 %v1538_v43 }
 0x6a8   : > { %1662 = vmatmul.bf16.vlgmr.msra.gmra.mxu0 %v1538_v43  ;;  %1675 = vmatmul.bf16.vlgmr.msra.gmra.mxu1 %v1538_v43 }
 0x715   : > { %v1611_v45 = vpop.f32.mrf.mxu0  ;;  %v1624_v46 = vpop.f32.mrf.mxu1 }
 0x716   : > { %v1625_v47 = vadd.f32 %v1624_v46, %v1591_v44  ;;  %v1612_v50 = vadd.f32 %v1611_v45, %v1590_v48  ;;  %v1828_v44 = vpack.c.bf16 %v1712_v42, %v1711_v38  ;;  %v1709_v45 = vld [vmem:[#allocation13 + $0x1e0] sm:$0xff]  ;;  %v1710_v46 = vld [vmem:[#allocation13 + $0x1e8] sm:$0xff]  ;;  %v1768_v48 = vpack.c.bf16 %v1692_v18, %v1691_v41  ;;  %v1911_v42 = vld [vmem:[#allocation14 + $0xf0] sm:$0xff] }
 0x718   : > { %v1714_v39 = vpack.c.bf16 %v1625_v47, %v1625_v47  ;;  %v1713_v56 = vpack.c.bf16 %v1612_v50, %v1612_v50  ;;  %1829 = vmatpush.bf16.msrb.mxu0 %v1828_v44  ;;  %v1827_v47 = vpack.c.bf16 %v1710_v46, %v1709_v45  ;;  %v1689_v50 = vld [vmem:[#allocation13 + $0x140] sm:$0xff]  ;;  %v1910_v45 = vld [vmem:[#allocation14 + $0xe8] sm:$0xff] }
 0x719   : > { %v1909_v44 = vld [vmem:[#allocation14 + $0xe0] sm:$0xff] }
 0x71a   : > { %1722 = vmatpush.bf16.xpose.msrb.mxu2 %v1714_v39  ;;  %v1707_v39 = vld [vmem:[#allocation13 + $0x1d0] sm:$0xff]  ;;  %v1920_v46 = vpack.c.bf16 %v1910_v45, %v1909_v44  ;;  %v1951_v44 = vld [vmem:[#allocation16 + $0x88] sm:$0xff] }
 0x71c   : > { %v1637_v51 = vpop.f32.mrf.mxu2  ;;  %v1650_v52 = vpop.f32.mrf.mxu3  ;;  %1830 = vmatpush.bf16.msrb.mxu0 %v1827_v47  ;;  %v1907_v47 = vld [vmem:[#allocation14 + $0xd0] sm:$0xff] }
 0x71d   : > { %v1638_v53 = vadd.f32 %v1637_v51, %v1592_v49  ;;  %v1613_v54 = vpop.f32.mrf.mxu0  ;;  %v1626_v55 = vpop.f32.mrf.mxu1  ;;  %v1651_v8 = vadd.f32 %v1650_v52, %v1593_v4  ;;  %v1708_v49 = vld [vmem:[#allocation13 + $0x1d8] sm:$0xff]  ;;  %v1690_v51 = vld [vmem:[#allocation13 + $0x148] sm:$0xff] }
 0x71e   : > { %v1826_v52 = vpack.c.bf16 %v1708_v49, %v1707_v39  ;;  %v1767_v54 = vpack.c.bf16 %v1690_v51, %v1689_v50  ;;  %v1906_v49 = vld [vmem:[#allocation14 + $0xc8] sm:$0xff]  ;;  %v1903_v51 = vld [vmem:[#allocation14 + $0xb0] sm:$0xff] }
 0x71f   : > { %v1742_v57 = vpack.c.bf16 %v1638_v53, %v1638_v53  ;;  %v1771_v12 = vpack.c.bf16 %v1651_v8, %v1651_v8  ;;  %v1706_v8 = vld [vmem:[#allocation13 + $0x1c8] sm:$0xff] }
 0x720   : > { %1831 = vmatpush.bf16.msrb.mxu0 %v1826_v52  ;;  %v1904_v52 = vld [vmem:[#allocation14 + $0xb8] sm:$0xff] }
 0x721   : > { %v1747_v58 = vsel %vm1167_vm3, %v1742_v57, 0  ;;  %1723 = vmatmul.bf16.vlgmr.msrb.gmra.mxu2 %v1713_v56  ;;  %v1687_v56 = vld [vmem:[#allocation13 + $0x130] sm:$0xff]  ;;  %v1688_v57 = vld [vmem:[#allocation13 + $0x138] sm:$0xff] }
 0x722   : > { %1756 = vmatpush.bf16.msrb.mxu3 %v1747_v58 }
 0x724   : > { %v1639_v61 = vpop.f32.mrf.mxu2  ;;  %v1652_v62 = vpop.f32.mrf.mxu3 }
 0x725   : > { %v1663_v63 = vpop.f32.mrf.mxu0  ;;  %v1676_v1 = vpop.f32.mrf.mxu1  ;;  %v1686_v61 = vld [vmem:[#allocation13 + $0x128] sm:$0xff] }
 0x726   : > { %v1664_v2 = vadd.f32 %v1663_v63, %v1594_v59  ;;  %v1677_v3 = vadd.f32 %v1676_v1, %v1595_v60  ;;  %v1766_v59 = vpack.c.bf16 %v1688_v57, %v1687_v56  ;;  %v1685_v60 = vld [vmem:[#allocation13 + $0x120] sm:$0xff]  ;;  %v1683_v1 = vld [vmem:[#allocation13 + $0x110] sm:$0xff] }
 0x727   : > { %v1765_v62 = vpack.c.bf16 %v1686_v61, %v1685_v60  ;;  %v1899_v57 = vld [vmem:[#allocation14 + $0x90] sm:$0xff]  ;;  %v1897_v60 = vld [vmem:[#allocation14 + $0x80] sm:$0xff]  ;;  %v1898_v61 = vld [vmem:[#allocation14 + $0x88] sm:$0xff] }
 0x728   : > { %v1772_v5 = vpack.c.bf16 %v1664_v2, %v1664_v2  ;;  %v1800_v6 = vpack.c.bf16 %v1677_v3, %v1677_v3  ;;  %v1684_v2 = vld [vmem:[#allocation13 + $0x118] sm:$0xff] }
 0x729   : > { %v1764_v3 = vpack.c.bf16 %v1684_v2, %v1683_v1 }
 0x72a   : > { %v1805_v7 = vsel %vm1167_vm3, %v1800_v6, 0  ;;  %1780 = vmatpush.bf16.xpose.msra.mxu2 %v1772_v5 }
 0x72b   : > { %1814 = vmatpush.bf16.msra.mxu3 %v1805_v7  ;;  %v1705_v7 = vld [vmem:[#allocation13 + $0x1c0] sm:$0xff] }
 0x72d   : > { %v1665_v9 = vpop.f32.mrf.mxu0  ;;  %v1678_v11 = vpop.f32.mrf.mxu1 }
 0x72e   : > { %v1681_v9 = vld [vmem:[#allocation13 + $0x100] sm:$0xff]  ;;  %v1825_v11 = vpack.c.bf16 %v1706_v8, %v1705_v7 }
 0x72f   : > { %v1962_v7 = vld [vmem:[#allocation16 + $0xe0] sm:$0xff] }
 0x730   : > { %1832 = vmatpush.bf16.msrb.mxu0 %v1825_v11 }
 0x731   : > { %1781 = vmatmul.bf16.vlgmr.msra.gmra.mxu2 %v1771_v12  ;;  %v1682_v12 = vld [vmem:[#allocation13 + $0x108] sm:$0xff] }
 0x7a4   : > { %v1724_v13 = vpop.f32.mrf.mxu2 }
 0x7a5   : > { %v1728_v14 = vmul.f32 0.25, %v1724_v13  ;;  %v1763_v13 = vpack.c.bf16 %v1682_v12, %v1681_v9  ;;  %v1963_v9 = vld [vmem:[#allocation16 + $0xe8] sm:$0xff] }
 0x7a6   : > { %v1973_v12 = vpack.c.bf16 %v1963_v9, %v1962_v7  ;;  %v2038_v7 = vld [vmem:[#allocation17 + $0x50] sm:$0xff] }
 0x7a7   : > { %v1729_v15 = vadd.f32 %v3311_v10, %v1728_v14  ;;  %v1703_v14 = vld [vmem:[#allocation13 + $0x1b0] sm:$0xff] }
 0x7a9   : > { %v1730_v16 = vsel %vm1150_vm4, %v1729_v15, -inf }
 0x7aa   : > { %1731 = vmax.xlane.f32.xlu1 %v1730_v16 }
 0x7ac   : > { %v1726_v17 = vpop.f32.mrf.mxu2 }
 0x7ad   : > { %v1701_v17 = vld [vmem:[#allocation13 + $0x1a0] sm:$0xff] }
 0x7b4   : > { %v1782_v19 = vpop.f32.mrf.mxu2 }
 0x7b5   : > { %v1786_v20 = vmul.f32 0.25, %v1782_v19  ;;  %v1702_v19 = vld [vmem:[#allocation13 + $0x1a8] sm:$0xff] }
 0x7b7   : > { %v1787_v21 = vadd.f32 %v3311_v10, %v1786_v20  ;;  %v1695_v10 = vld [vmem:[#allocation13 + $0x170] sm:$0xff]  ;;  %v1823_v20 = vpack.c.bf16 %v1702_v19, %v1701_v17 }
 0x7b8   : > { %v1770_v36 = vpack.c.bf16 %v1696_v34, %v1695_v10  ;;  %v2498_v34 = vld [vmem:[%s3456_s7 + $0x1] ss:$0 sm:$0xff] }
 0x7b9   : > { %v1788_v22 = vsel %vm1150_vm4, %v1787_v21, -inf }
 0x7ba   : > { %1789 = vmax.xlane.f32.xlu2 %v1788_v22  ;;  %1842 = vmatpush.bf16.msrb.mxu1 %v1770_v36  ;;  %v1700_v22 = vld [vmem:[#allocation13 + $0x198] sm:$0xff] }
 0x7bc   : > { %v1784_v23 = vpop.f32.mrf.mxu2 }
 0x7be   : > { %1843 = vmatpush.bf16.msrb.mxu1 %v1769_v40 }
 0x7c2   : > { %1844 = vmatpush.bf16.msrb.mxu1 %v1768_v48  ;;  %v1908_v48 = vld [vmem:[#allocation14 + $0xd8] sm:$0xff] }
 0x7c3   : > { %v1919_v39 = vpack.c.bf16 %v1908_v48, %v1907_v47 }
 0x7c6   : > { %1845 = vmatpush.bf16.msrb.mxu1 %v1767_v54  ;;  %v1901_v54 = vld [vmem:[#allocation14 + $0xa0] sm:$0xff] }
 0x7ca   : > { %1846 = vmatpush.bf16.msrb.mxu1 %v1766_v59 }
 0x7ce   : > { %1847 = vmatpush.bf16.msrb.mxu1 %v1765_v62  ;;  %v1914_v62 = vpack.c.bf16 %v1898_v61, %v1897_v60 }
 0x7d2   : > { %1848 = vmatpush.bf16.msrb.mxu1 %v1764_v3 }
 0x7d6   : > { %1849 = vmatpush.bf16.msrb.mxu1 %v1763_v13 }
 0x81d   : > { %v1732_v24 = vpop.xlane.xlu1 %1731 }
 0x81e   : > { %v1733_v25 = vsub.f32 %v1729_v15, %v1732_v24  ;;  %v1704_v15 = vld [vmem:[#allocation13 + $0x1b8] sm:$0xff]  ;;  %v1697_v24 = vld [vmem:[#allocation13 + $0x180] sm:$0xff] }
 0x81f   : > { %v1824_v16 = vpack.c.bf16 %v1704_v15, %v1703_v14 }
 0x820   : > { %v1734_v27 = vmul.f32 1.442695, %v1733_v25  ;;  %v1698_v25 = vld [vmem:[#allocation13 + $0x188] sm:$0xff] }
 0x821   : > { %1833 = vmatpush.bf16.msrb.mxu0 %v1824_v16 }
 0x822   : > { %2521 = vpow2.f32 %v1734_v27  ;;  %v1821_v27 = vpack.c.bf16 %v1698_v25, %v1697_v24  ;;  %v2500_v25 = vld [vmem:[%s3458_s9 + $0x1] ss:$0 sm:$0xff] }
 0x825   : > { %1834 = vmatpush.bf16.msrb.mxu0 %v1823_v20 }
 0x828   : > { %v2522_v28 = vpop.eup %2521 }
 0x829   : > { %v1736_v29 = vsel %vm1150_vm4, %v2522_v28, 0.0 }
 0x82a   : > { %1737 = vadd.xlane.f32.xlu0 %v1736_v29 }
 0x82d   : > { %v1790_v30 = vpop.xlane.xlu2 %1789 }
 0x82e   : > { %v1791_v31 = vsub.f32 %v1787_v21, %v1790_v30  ;;  %v1699_v21 = vld [vmem:[#allocation13 + $0x190] sm:$0xff] }
 0x82f   : > { %v1822_v23 = vpack.c.bf16 %v1700_v22, %v1699_v21  ;;  %v2499_v22 = vld [vmem:[%s3457_s8 + $0x1] ss:$0 sm:$0xff] }
 0x830   : > { %v1792_v26 = vmul.f32 1.442695, %v1791_v31 }
 0x831   : > { %1835 = vmatpush.bf16.msrb.mxu0 %v1822_v23 }
 0x832   : > { %2523 = vpow2.f32 %v1792_v26 }
 0x835   : > { %1836 = vmatpush.bf16.msrb.mxu0 %v1821_v27 }
 0x838   : > { %v2524_v32 = vpop.eup %2523 }
 0x839   : > { %v1794_v33 = vsel %vm1150_vm4, %v2524_v32, 0.0 }
 0x83a   : > { %1795 = vadd.xlane.f32.xlu1 %v1794_v33 }
 0x89d   : > { %v1738_v43 = vpop.xlane.xlu0 %1737 }
 0x89e   : > { %2525 = vrcp.f32 %v1738_v43  ;;  %v1912_v43 = vld [vmem:[#allocation14 + $0xf8] sm:$0xff] }
 0x89f   : > { %v1921_v18 = vpack.c.bf16 %v1912_v43, %v1911_v42  ;;  %v1953_v42 = vld [vmem:[#allocation16 + $0x98] sm:$0xff] }
 0x8a1   : > { %1927 = vmatpush.bf16.msrb.mxu2 %v1921_v18  ;;  %v1950_v18 = vld [vmem:[#allocation16 + $0x80] sm:$0xff] }
 0x8a2   : > { %v1967_v45 = vpack.c.bf16 %v1951_v44, %v1950_v18  ;;  %v2077_v18 = vld [vmem:[#allocation19 + $0x48] sm:$0xff] }
 0x8a4   : > { %v2526_v53 = vpop.eup %2525 }
 0x8a5   : > { %v1740_v55 = vmul.f32 %v2526_v53, %v2522_v28  ;;  %1928 = vmatpush.bf16.msrb.mxu2 %v1920_v46  ;;  %v1917_v53 = vpack.c.bf16 %v1904_v52, %v1903_v51  ;;  %v2501_v46 = vld [vmem:[%s3460_s11 + $0x1] ss:$0 sm:$0xff] }
 0x8a7   : > { %v1741_v58 = vpack.c.bf16 %v1740_v55, %v1740_v55  ;;  %v1902_v55 = vld [vmem:[#allocation14 + $0xa8] sm:$0xff] }
 0x8a8   : > { %v1916_v56 = vpack.c.bf16 %v1902_v55, %v1901_v54 }
 0x8a9   : > { %2327 = vmatmul.msk.bf16.vlgmr.msrb.gmra.mxu3 %vm1150_vm4, %v1741_v58  ;;  %1929 = vmatpush.bf16.msrb.mxu2 %v1919_v39  ;;  %v1900_v58 = vld [vmem:[#allocation14 + $0x98] sm:$0xff] }
 0x8aa   : > { %v1915_v59 = vpack.c.bf16 %v1900_v58, %v1899_v57  ;;  %v2502_v58 = vld [vmem:[%s3519_s13 + $0x1] ss:$0 sm:$0xff] }
 0x8ad   : > { %v1796_v63 = vpop.xlane.xlu1 %1795 }
 0x8ae   : > { %2527 = vrcp.f32 %v1796_v63 }
 0x8b4   : > { %v2528_v4 = vpop.eup %2527 }
 0x8b5   : > { %v1798_v5 = vmul.f32 %v2528_v4, %v2524_v32 }
 0x8b7   : > { %v1799_v6 = vpack.c.bf16 %v1798_v5, %v1798_v5  ;;  %v1964_v5 = vld [vmem:[#allocation16 + $0xf0] sm:$0xff] }
 0x8b9   : > { %2328 = vmatmul.msk.bf16.vlgmr.msra.gmra.mxu3 %vm1150_vm4, %v1799_v6  ;;  %v1965_v6 = vld [vmem:[#allocation16 + $0xf8] sm:$0xff] }
 0x8ba   : > { %v1974_v8 = vpack.c.bf16 %v1965_v6, %v1964_v5  ;;  %v2041_v5 = vld [vmem:[#allocation17 + $0x68] sm:$0xff] }
 0x8bc   : > { %1980 = vmatpush.bf16.msrb.mxu3 %v1974_v8  ;;  %v2039_v8 = vld [vmem:[#allocation17 + $0x58] sm:$0xff] }
 0x8bd   : > { %v2050_v9 = vpack.c.bf16 %v2039_v8, %v2038_v7 }
 0x8c0   : > { %1981 = vmatpush.bf16.msrb.mxu3 %v1973_v12  ;;  %v2037_v12 = vld [vmem:[#allocation17 + $0x48] sm:$0xff] }
 0x92c   : > { %v1758_v28 = vpop.f32.mrf.mxu3 }
 0x92d   : > { %v1762_v29 = vpack.c.bf16 %v1758_v28, %v1758_v28 }
 0x92f   : > { %1850 = vmatmul.bf16.vlgmr.msrb.gmra.mxu1 %v1762_v29 }
 0x934   : > { %v1760_v30 = vpop.f32.mrf.mxu3 }
 0x935   : > { %v1960_v30 = vld [vmem:[#allocation16 + $0xd0] sm:$0xff] }
 0x93c   : > { %v1816_v31 = vpop.f32.mrf.mxu3 }
 0x93d   : > { %v1820_v26 = vpack.c.bf16 %v1816_v31, %v1816_v31  ;;  %v1961_v31 = vld [vmem:[#allocation16 + $0xd8] sm:$0xff] }
 0x93f   : > { %1837 = vmatmul.bf16.vlgmr.msrb.gmra.mxu0 %v1820_v26  ;;  %v1972_v26 = vpack.c.bf16 %v1961_v31, %v1960_v30 }
 0x941   : > { %1982 = vmatpush.bf16.msrb.mxu3 %v1972_v26 }
 0x944   : > { %v1818_v32 = vpop.f32.mrf.mxu3 }
 0x945   : > { %v1958_v32 = vld [vmem:[#allocation16 + $0xc0] sm:$0xff] }
 0x9ac   : > { %v1851_v33 = vpop.f32.mrf.mxu1 }
 0x9b4   : > { %v1853_v10 = vpop.f32.mrf.mxu1 }
 0x9bc   : > { %v1838_v35 = vpop.f32.mrf.mxu0 }
 0x9bd   : > { %v1852_v36 = vadd.f32 %v1851_v33, %v1838_v35  ;;  %v1959_v33 = vld [vmem:[#allocation16 + $0xc8] sm:$0xff]  ;;  %v1957_v35 = vld [vmem:[#allocation16 + $0xb8] sm:$0xff] }
 0x9be   : > { %v1971_v10 = vpack.c.bf16 %v1959_v33, %v1958_v32  ;;  %v2082_v32 = vld [vmem:[#allocation19 + $0x70] sm:$0xff]  ;;  %v2083_v33 = vld [vmem:[#allocation19 + $0x78] sm:$0xff] }
 0x9bf   : > { %v1860_v37 = vadd.f32 %v2498_v34, %v1852_v36  ;;  %v1956_v34 = vld [vmem:[#allocation16 + $0xb0] sm:$0xff] }
 0x9c0   : > { %1983 = vmatpush.bf16.msrb.mxu3 %v1971_v10  ;;  %v1970_v36 = vpack.c.bf16 %v1957_v35, %v1956_v34  ;;  %v2080_v10 = vld [vmem:[#allocation19 + $0x60] sm:$0xff]  ;;  %v2092_v34 = vpack.c.bf16 %v2083_v33, %v2082_v32  ;;  %v2081_v35 = vld [vmem:[#allocation19 + $0x68] sm:$0xff] }
 0x9c1   : > { %v3378_v38 = vadd.f32 %v1860_v37, %v3360_v0  ;;  %v1905_v0 = vld [vmem:[#allocation14 + $0xc0] sm:$0xff] }
 0x9c2   : > { %v1918_v50 = vpack.c.bf16 %v1906_v49, %v1905_v0  ;;  %v1954_v37 = vld [vmem:[#allocation16 + $0xa0] sm:$0xff]  ;;  %2094 = vmatpush.bf16.msra.mxu1 %v2092_v34 }
 0x9c3   : > { %1866 = vadd.xlane.f32.xlu2 %v3378_v38  ;;  %v1868_v40 = vmul.f32 %v3378_v38, %v3378_v38 }
 0x9c4   : > { %v1840_v41 = vpop.f32.mrf.mxu0  ;;  %1930 = vmatpush.bf16.msrb.mxu2 %v1918_v50  ;;  %1984 = vmatpush.bf16.msrb.mxu3 %v1970_v36 }
 0x9c5   : > { %1869 = vadd.xlane.f32.xlu0 %v1868_v40  ;;  %v1952_v41 = vld [vmem:[#allocation16 + $0x90] sm:$0xff] }
 0x9c6   : > { %v1968_v43 = vpack.c.bf16 %v1953_v42, %v1952_v41  ;;  %v2079_v41 = vld [vmem:[#allocation19 + $0x58] sm:$0xff] }
 0x9c8   : > { %1931 = vmatpush.bf16.msrb.mxu2 %v1917_v53 }
 0x9cc   : > { %1932 = vmatpush.bf16.msrb.mxu2 %v1916_v56 }
 0x9d0   : > { %1933 = vmatpush.bf16.msrb.mxu2 %v1915_v59 }
 0x9d4   : > { %1934 = vmatpush.bf16.msrb.mxu2 %v1914_v62 }
 0xa36   : > { %v1867_v63 = vpop.xlane.xlu2 %1866 }
 0xa37   : > { %v1871_v1 = vmul.f32 0.03125, %v1867_v63 }
 0xa38   : > { %v1870_v2 = vpop.xlane.xlu0 %1869 }
 0xa39   : > { %v1873_v3 = vmul.f32 %v1871_v1, %v1871_v1  ;;  %v1872_v4 = vmul.f32 0.03125, %v1870_v2  ;;  %v1875_v21 = vsub.f32 %v3378_v38, %v1871_v1  ;;  %v1955_v38 = vld [vmem:[#allocation16 + $0xa8] sm:$0xff]  ;;  %v2042_v1 = vld [vmem:[#allocation17 + $0x70] sm:$0xff]  ;;  %v2043_v2 = vld [vmem:[#allocation17 + $0x78] sm:$0xff] }
 0xa3a   : > { %v1969_v40 = vpack.c.bf16 %v1955_v38, %v1954_v37  ;;  %v2091_v37 = vpack.c.bf16 %v2081_v35, %v2080_v10 }
 0xa3b   : > { %v1874_v11 = vsub.f32 %v1872_v4, %v1873_v3  ;;  %v2052_v3 = vpack.c.bf16 %v2043_v2, %v2042_v1  ;;  %v2040_v4 = vld [vmem:[#allocation17 + $0x60] sm:$0xff]  ;;  %v2071_v1 = vld [vmem:[#allocation19 + $0x18] sm:$0xff] }
 0xa3c   : > { %1985 = vmatpush.bf16.msrb.mxu3 %v1969_v40  ;;  %v2051_v6 = vpack.c.bf16 %v2041_v5, %v2040_v4  ;;  %v2078_v40 = vld [vmem:[#allocation19 + $0x50] sm:$0xff]  ;;  %2095 = vmatpush.bf16.msra.mxu1 %v2091_v37  ;;  %v2069_v4 = vld [vmem:[#allocation19 + $0x8] sm:$0xff] }
 0xa3d   : > { %v1876_v13 = vadd.f32 1e-12, %v1874_v11  ;;  %2054 = vmatpush.bf16.msra.mxu0 %v2052_v3  ;;  %v2036_v11 = vld [vmem:[#allocation17 + $0x40] sm:$0xff]  ;;  %v2090_v42 = vpack.c.bf16 %v2079_v41, %v2078_v40 }
 0xa3e   : > { %v2068_v3 = vld [vmem:[#allocation19] sm:$0xff] }
 0xa3f   : > { %2529 = vrsqrt.f32 %v1876_v13  ;;  %vm1883_vm12 = vweird.f32 %v1876_v13  ;;  %v2085_v5 = vpack.c.bf16 %v2069_v4, %v2068_v3 }
 0xa40   : > { %1986 = vmatpush.bf16.msrb.mxu3 %v1968_v43  ;;  %v2076_v43 = vld [vmem:[#allocation19 + $0x40] sm:$0xff]  ;;  %2096 = vmatpush.bf16.msra.mxu1 %v2090_v42 }
 0xa41   : > { %2055 = vmatpush.bf16.msra.mxu0 %v2051_v6  ;;  %v2089_v44 = vpack.c.bf16 %v2077_v18, %v2076_v43  ;;  %v2053_v6 = vld [vmem:[%s3522_s29] sm:$0x1] }
 0xa44   : > { %1987 = vmatpush.bf16.msrb.mxu3 %v1967_v45  ;;  %2097 = vmatpush.bf16.msra.mxu1 %v2089_v44 }
 0xa45   : > { %v2530_v14 = vpop.eup %2529  ;;  %2056 = vmatpush.bf16.msra.mxu0 %v2050_v9 }
 0xa46   : > { %v1878_v15 = vmul.f32 %v2530_v14, %v1876_v13  ;;  %vm1884_vm11 = vweird.f32 %v2530_v14  ;;  %v2049_v13 = vpack.c.bf16 %v2037_v12, %v2036_v11 }
 0xa47   : > { %vm1885_vm13 = vmor %vm1883_vm12, %vm1884_vm11 }
 0xa48   : > { %v1879_v16 = vmul.f32 %v2530_v14, %v1878_v15  ;;  %v2035_v15 = vld [vmem:[#allocation17 + $0x38] sm:$0xff] }
 0xa49   : > { %2057 = vmatpush.bf16.msra.mxu0 %v2049_v13  ;;  %v2093_v13 = vld [vmem:[%s3524_s20] sm:$0x1] }
 0xa4a   : > { %v1880_v17 = vmul.f32 0.5, %v1879_v16 }
 0xa4c   : > { %v1881_v19 = vsub.f32 1.5, %v1880_v17  ;;  %v2032_v17 = vld [vmem:[#allocation17 + $0x20] sm:$0xff] }
 0xa4e   : > { %v1882_v20 = vmul.f32 %v2530_v14, %v1881_v19  ;;  %v2033_v19 = vld [vmem:[#allocation17 + $0x28] sm:$0xff] }
 0xa50   : > { %v1886_v23 = vsel %vm1885_vm13, %v2530_v14, %v1882_v20  ;;  %v2034_v14 = vld [vmem:[#allocation17 + $0x30] sm:$0xff]  ;;  %v2047_v20 = vpack.c.bf16 %v2033_v19, %v2032_v17 }
 0xa51   : > { %v1887_v24 = vmul.f32 %v1886_v23, %v1875_v21  ;;  %v2048_v16 = vpack.c.bf16 %v2035_v15, %v2034_v14  ;;  %v2030_v21 = vld [vmem:[#allocation17 + $0x10] sm:$0xff] }
 0xa53   : > { %v1891_v27 = vmul.f32 %v2499_v22, %v1887_v24  ;;  %2058 = vmatpush.bf16.msra.mxu0 %v2048_v16  ;;  %v2031_v22 = vld [vmem:[#allocation17 + $0x18] sm:$0xff]  ;;  %v2028_v24 = vld [vmem:[#allocation17] sm:$0xff] }
 0xa54   : > { %v2046_v23 = vpack.c.bf16 %v2031_v22, %v2030_v21 }
 0xa55   : > { %v1895_v28 = vadd.f32 %v2500_v25, %v1891_v27  ;;  %v2029_v25 = vld [vmem:[#allocation17 + $0x8] sm:$0xff] }
 0xa56   : > { %v2045_v27 = vpack.c.bf16 %v2029_v25, %v2028_v24 }
 0xa57   : > { %v1913_v29 = vpack.c.bf16 %v1895_v28, %v1895_v28  ;;  %2059 = vmatpush.bf16.msra.mxu0 %v2047_v20 }
 0xa59   : > { %1935 = vmatmul.bf16.vlgmr.msrb.gmra.mxu2 %v1913_v29 }
 0xa5b   : > { %2060 = vmatpush.bf16.msra.mxu0 %v2046_v23 }
 0xa5f   : > { %2061 = vmatpush.bf16.msra.mxu0 %v2045_v27 }
 0xadc   : > { %v1936_v47 = vpop.f32.mrf.mxu2 }
 0xadd   : > { %v1937_v48 = vadd.f32 %v2501_v46, %v1936_v47  ;;  %v2074_v46 = vld [vmem:[#allocation19 + $0x30] sm:$0xff]  ;;  %v2075_v47 = vld [vmem:[#allocation19 + $0x38] sm:$0xff] }
 0xadf   : > { %v1941_v39 = vmul.f32 0.044715, %v1937_v48  ;;  %v1940_v54 = vmul.f32 0.5, %v1937_v48 }
 0xae1   : > { %v1942_v0 = vmul.f32 %v1941_v39, %v1937_v48 }
 0xae3   : > { %v1943_v49 = vmul.f32 %v1942_v0, %v1937_v48  ;;  %v2088_v0 = vpack.c.bf16 %v2075_v47, %v2074_v46 }
 0xae4   : > { %v1938_v50 = vpop.f32.mrf.mxu2 }
 0xae5   : > { %v1944_v51 = vadd.f32 %v1943_v49, %v1937_v48  ;;  %2098 = vmatpush.bf16.msra.mxu1 %v2088_v0 }
 0xae7   : > { %v1945_v52 = vmul.f32 0.7978846, %v1944_v51 }
 0xae9   : > { %2531 = vtanh.f32 %v1945_v52 }
 0xaef   : > { %v2532_v53 = vpop.eup %2531 }
 0xaf0   : > { %v1947_v55 = vadd.f32 1.0, %v2532_v53  ;;  %v2503_v53 = vld [vmem:[%s3520_s0 + $0x1] ss:$0 sm:$0xff] }
 0xaf2   : > { %v1948_v56 = vmul.f32 %v1947_v55, %v1940_v54 }
 0xaf4   : > { %v1966_v57 = vpack.c.bf16 %v1948_v56, %v1948_v56  ;;  %v2504_v56 = vld [vmem:[%s3521_s15 + $0x1] ss:$0 sm:$0xff] }
 0xaf6   : > { %1988 = vmatmul.bf16.vlgmr.msrb.gmra.mxu3 %v1966_v57 }
 0xb79   : > { %v1989_v59 = vpop.f32.mrf.mxu3 }
 0xb7a   : > { %v1990_v60 = vadd.f32 %v2502_v58, %v1989_v59 }
 0xb7c   : > { %v3396_v61 = vadd.f32 %v1990_v60, %v1895_v28  ;;  %v2072_v60 = vld [vmem:[#allocation19 + $0x20] sm:$0xff] }
 0xb7e   : > { %1998 = vadd.xlane.f32.xlu1 %v3396_v61  ;;  %v2000_v62 = vmul.f32 %v3396_v61, %v3396_v61 }
 0xb80   : > { %2001 = vadd.xlane.f32.xlu2 %v2000_v62  ;;  %v2073_v62 = vld [vmem:[#allocation19 + $0x28] sm:$0xff] }
 0xb81   : > { %v1991_v63 = vpop.f32.mrf.mxu3 }
 0xb82   : > { %v2087_v63 = vpack.c.bf16 %v2073_v62, %v2072_v60 }
 0xb84   : > { %2099 = vmatpush.bf16.msra.mxu1 %v2087_v63 }
 0xbf1   : > { %v1999_v28 = vpop.xlane.xlu1 %1998 }
 0xbf2   : > { %v2003_v29 = vmul.f32 0.03125, %v1999_v28 }
 0xbf3   : > { %v2002_v30 = vpop.xlane.xlu2 %2001 }
 0xbf4   : > { %v2005_v31 = vmul.f32 %v2003_v29, %v2003_v29  ;;  %v2004_v26 = vmul.f32 0.03125, %v2002_v30  ;;  %v2007_v52 = vsub.f32 %v3396_v61, %v2003_v29  ;;  %v2070_v61 = vld [vmem:[#allocation19 + $0x10] sm:$0xff] }
 0xbf5   : > { %v2086_v2 = vpack.c.bf16 %v2071_v1, %v2070_v61 }
 0xbf6   : > { %v2006_v36 = vsub.f32 %v2004_v26, %v2005_v31 }
 0xbf7   : > { %2100 = vmatpush.bf16.msra.mxu1 %v2086_v2 }
 0xbf8   : > { %v2008_v38 = vadd.f32 1e-12, %v2006_v36 }
 0xbfa   : > { %2533 = vrsqrt.f32 %v2008_v38  ;;  %vm2015_vm15 = vweird.f32 %v2008_v38 }
 0xbfb   : > { %2101 = vmatpush.bf16.msra.mxu1 %v2085_v5 }
 0xc00   : > { %v2534_v45 = vpop.eup %2533 }
 0xc01   : > { %v2010_v48 = vmul.f32 %v2534_v45, %v2008_v38  ;;  %vm2016_vm14 = vweird.f32 %v2534_v45 }
 0xc02   : > { %vm2017_vm0 = vmor %vm2015_vm15, %vm2016_vm14 }
 0xc03   : > { %v2011_v39 = vmul.f32 %v2534_v45, %v2010_v48 }
 0xc05   : > { %v2012_v49 = vmul.f32 0.5, %v2011_v39 }
 0xc07   : > { %v2013_v50 = vsub.f32 1.5, %v2012_v49 }
 0xc09   : > { %v2014_v51 = vmul.f32 %v2534_v45, %v2013_v50 }
 0xc0b   : > { %v2018_v54 = vsel %vm2017_vm0, %v2534_v45, %v2014_v51 }
 0xc0c   : > { %v2019_v55 = vmul.f32 %v2018_v54, %v2007_v52 }
 0xc0e   : > { %v2023_v57 = vmul.f32 %v2503_v53, %v2019_v55 }
 0xc10   : > { %v2027_v58 = vadd.f32 %v2504_v56, %v2023_v57 }
 0xc12   : > { %v2044_v59 = vpack.c.bf16 %v2027_v58, %v2027_v58 }
 0xc14   : > { %2062 = vmatmul.bf16.vlgmr.msra.gmra.mxu0 %v2044_v59 }
 0xc91   : > { %v2063_v7 = vpop.f32.mrf.mxu0 }
 0xc92   : > { %v2064_v8 = vadd.f32 %v2063_v7, %v2053_v6 }
 0xc94   : > { %2535 = vtanh.f32 %v2064_v8 }
 0xc99   : > { %v2065_v9 = vpop.f32.mrf.mxu0 }
 0xc9a   : > { %v2536_v11 = vpop.eup %2535 }
 0xc9b   : > { %v2084_v12 = vpack.c.bf16 %v2536_v11, %v2536_v11 }
 0xc9d   : > { %2102 = vmatmul.bf16.vlgmr.msra.gmra.mxu1 %v2084_v12 }
 0xd1a   : > { %v2103_v14 = vpop.f32.mrf.mxu1 }
 0xd1b   : > { %v2104_v15 = vadd.f32 %v2103_v14, %v2093_v13 }
 0xd1d   : > { %v2107_v16 = vperm.slane %v2104_v15, 0 }
 0xd1f   : > { %2108 = vst [vmem:[%s825_s3] sm:$0xff] %v2107_v16 }
 0xd20   : > { %2894 = shalt.err (!%p2891_p10)
}
 0xd21   : > { %2380 = dma.vmem_to_hbm [thread:$0]  (%p3204_p0), %s2123_s26, 128, %s2125_s6, %s2110_s27  }
 0xd22   : > { %v2105_v17 = vpop.f32.mrf.mxu1 }
 0xd23 PF: > { %s3525_s10 = sld [smem:[#allocation30_spill]]  ;;  %s2136_s19 = sand.u32 1, %s2945_s1  }
 0xd24   : > { %s2137_s16 = scalar_lea.sflag [#allocation4], %s2136_s19 }
 0xd29   : > { %p3526_p11 = scmp.ge.s32.totalorder %s3525_s10, 2 }
 0xd2b   : > { %p2418_p4 = pnand %p3526_p11, %p3212_p6 }
 0xd2d   : > { %p2419_p12 = pneg %p2418_p4 }
 0xd2f   : > { %2940 = dma.done.wait (%p2419_p12), %s2137_s16, 128  }
 0xd30   : > { %2942 = vsyncadd (%p2419_p12), %s2137_s16, 4294967168  ;;  %s3527_s24 = sld [smem:[#allocation31_spill]]  ;;  %s3530_s1 = smov %s2949_s22 }
 0xd31   : > { %s3528_s25 = sld [smem:[#allocation29_spill]] }
 0xd32   : > { %s3529_s23 = sld [smem:[#allocation32_spill]] }
 0xd36   : > { %p40_p2 = scmp.ge.s32.totalorder %s3527_s24, 4  }
 0xd37   : > { %s3531_s22 = smov %s3528_s25 }
 0xd38   :  { %42 = sbr.rel (!%p40_p2) target bundleno = 29 (0x1d), region = 206 }
 0xd3d   :  { %2143 = vsyncpa [#allocation3], 1 }
 0xd3e   :  { %2145 = vsyncpa [#allocation3 + $0x1], 1 }
 0xd3f   :  { %2146 = vsyncpa [#allocation6], 1 }
 0xd40   :  { %2148 = vsyncpa [#allocation6 + $0x1], 1 }
 0xd41   :  { %2149 = vsyncpa [#allocation9], 1 }
 0xd42   :  { %2150 = vsyncpa [#allocation12], 1 }
 0xd43   :  { %2151 = vsyncpa [#allocation15], 1 }
 0xd44   :  { %2152 = vsyncpa [#allocation18], 1 }
 0xd45   :  { %2153 = vsyncpa [#allocation4], 1 }
 0xd46   :  { %2155 = vsyncpa [#allocation4 + $0x1], 1 }

</bundles_post_ra>
